<compile_context>
chip_gen: v5e
topology: v5e:2x2
jax: 0.10.0
libtpu: 0.0.40
codegen_flags: <defaults>
</compile_context>

<pallas_src>
import numpy as np
import jax
import jax.numpy as jnp
from jax.experimental import pallas as pl
from jax.experimental.pallas import tpu as pltpu

BN_EPS = 1e-5
LRELU_SLOPE = 0.2
LANE = 128


# ---------------------------------------------------------------------------
# tablegan layer geometry
# ---------------------------------------------------------------------------
def determine_layer_dims(side, num_channels):
    layer_dims = [(1, side), (num_channels, side // 2)]
    while layer_dims[-1][1] > 3 and len(layer_dims) < 4:
        layer_dims.append((layer_dims[-1][0] * 2, layer_dims[-1][1] // 2))
    return layer_dims


# ---------------------------------------------------------------------------
# Trace-time constants -- all weight-sized, nothing scales with batch
# ---------------------------------------------------------------------------
def _placement(h, w, k, stride, pad):
    """0/1 tensor (OH*OW, k*k, H*W): which input pixel feeds which output pixel at
    which kernel offset (padding taps simply have no 1s)."""
    oh = (h + 2 * pad - k) // stride + 1
    ow = (w + 2 * pad - k) // stride + 1
    place = np.zeros((oh * ow, k * k, h * w), np.float32)
    for oi in range(oh):
        for oj in range(ow):
            p = oi * ow + oj
            for ki in range(k):
                i = stride * oi - pad + ki
                if not (0 <= i < h):
                    continue
                for kj in range(k):
                    j = stride * oj - pad + kj
                    if 0 <= j < w:
                        place[p, ki * k + kj, i * w + j] = 1.0
    return place


def _conv_as_dense(w_oihw, h, w, stride, pad):
    """Fold a Conv2d into one dense matrix (C_out*OH*OW, C_in*H*W) so that
    out_rows = W_dense @ act_rows with activations laid out (c*H*W + y*W + x, n)."""
    co, ci, k, _ = w_oihw.shape
    place_np = _placement(h, w, k, stride, pad)            # (P, k*k, H*W) constant
    p_out = place_np.shape[0]
    wr = w_oihw.reshape(co, ci, k * k).astype(jnp.float32)
    big = jnp.einsum('abt,pth->apbh', wr, jnp.asarray(place_np))
    return big.reshape(co * p_out, ci * h * w)


def _group_mean_mat(c, s, n_true):
    """(C*S, C*S) f32 block-diag ones/(N*S).  Right-multiplying the per-row lane
    sums by this both groups the S spatial rows of each channel and broadcasts the
    per-channel mean back to every row of the channel."""
    return np.kron(np.eye(c, dtype=np.float32),
                   np.full((s, s), 1.0 / (n_true * s), np.float32))


def _pack_affine(conv_params, b_final, layer_dims):
    """Pack gamma/beta pre-broadcast to each layer's row layout (+ final bias) into
    a single (R_total, 2) f32 array: col 0 = scale, col 1 = shift/bias."""
    rows, offsets, off = [], [], 0
    for li, (_, gamma, beta) in enumerate(conv_params):
        s = layer_dims[li + 1][1] ** 2
        g = jnp.repeat(gamma.astype(jnp.float32), s)       # (C*S,)
        b = jnp.repeat(beta.astype(jnp.float32), s)
        rows.append(jnp.stack([g, b], axis=1))             # (C*S, 2)
        offsets.append(off)
        off += g.shape[0]
    rows.append(jnp.stack([jnp.zeros((1,), jnp.float32),
                           b_final.reshape(1).astype(jnp.float32)], axis=1))
    offsets.append(off)
    off += 1
    pad = (-off) % 8
    if pad:
        rows.append(jnp.zeros((pad, 2), jnp.float32))
    return jnp.concatenate(rows, axis=0), offsets


# ---------------------------------------------------------------------------
# Fused Pallas kernel: 3x (conv + BN + LeakyReLU) + final conv (+ optional sigmoid)
# ---------------------------------------------------------------------------
def _make_kernel(row_dims, aff_offsets, apply_sigmoid):
    r1, r2, r3 = row_dims                  # 256, 128, 64 rows per layer output
    o1, o2, o3, ob = aff_offsets           # sublane-aligned offsets into the affine pack

    def bn_lrelu(y, blk_ref, off, rows, aff_ref, lane_mask):
        # y: (rows, Npad) f32 conv output; rows = channel*spatial, lanes = batch.
        rowsum = jnp.sum(y, axis=1, keepdims=True)                     # (rows, 1)
        rowsq = jnp.sum(y * y, axis=1, keepdims=True)
        # Block-diag matmul = per-channel sum over (spatial, batch) broadcast back
        # to every row; the 1/(N*S) scale is folded into the constant.
        mean = jnp.dot(blk_ref[...], rowsum, preferred_element_type=jnp.float32)
        ex2 = jnp.dot(blk_ref[...], rowsq, preferred_element_type=jnp.float32)
        var = jnp.maximum(ex2 - mean * mean, 0.0)
        gamma = aff_ref[off:off + rows, 0:1]                           # (rows, 1)
        beta = aff_ref[off:off + rows, 1:2]
        scale = gamma * jax.lax.rsqrt(var + BN_EPS)                    # (rows, 1)
        shift = beta - mean * scale
        z = y * scale + shift                                          # fused BN affine
        z = jnp.where(z >= 0.0, z, LRELU_SLOPE * z)                    # LeakyReLU(0.2)
        # Re-zero padded batch lanes so next layer's global stats stay exact.
        return (z * lane_mask).astype(jnp.bfloat16)

    def kernel(a0_ref, w1_ref, w2_ref, w3_ref, w4_ref,
               blk1_ref, blk2_ref, blk3_ref, aff_ref, mask_ref, out_ref):
        lane_mask = mask_ref[...]                                      # (1, Npad) f32

        y1 = jnp.dot(w1_ref[...], a0_ref[...], preferred_element_type=jnp.float32)
        a1 = bn_lrelu(y1, blk1_ref, o1, r1, aff_ref, lane_mask)        # (256, Npad) bf16

        y2 = jnp.dot(w2_ref[...], a1, preferred_element_type=jnp.float32)
        a2 = bn_lrelu(y2, blk2_ref, o2, r2, aff_ref, lane_mask)        # (128, Npad) bf16

        y3 = jnp.dot(w3_ref[...], a2, preferred_element_type=jnp.float32)
        a3 = bn_lrelu(y3, blk3_ref, o3, r3, aff_ref, lane_mask)        # (64, Npad) bf16

        logits = jnp.dot(w4_ref[...], a3, preferred_element_type=jnp.float32)
        logits = logits + aff_ref[ob:ob + 1, 1:2]                      # final conv bias
        if apply_sigmoid:
            logits = jax.nn.sigmoid(logits)
        out_ref[...] = logits                                          # (8, Npad) f32

    return kernel


# ---------------------------------------------------------------------------
# Classifier: parameters + forward
# ---------------------------------------------------------------------------
def init_classifier_params(key, layer_dims):
    """Mimics tablegan weights_init: conv ~ N(0,0.02), BN gamma ~ N(1,0.02),
    beta = 0, final conv with (zero-initialised) bias."""
    conv_params = []
    for (cin, _), (cout, _) in zip(layer_dims, layer_dims[1:]):
        key, kw_, kg_ = jax.random.split(key, 3)
        w = 0.02 * jax.random.normal(kw_, (cout, cin, 4, 4), jnp.float32)
        gamma = 1.0 + 0.02 * jax.random.normal(kg_, (cout,), jnp.float32)
        beta = jnp.zeros((cout,), jnp.float32)
        conv_params.append((w, gamma, beta))
    cin_f, ks_f = layer_dims[-1]
    key, kw_ = jax.random.split(key)
    w_final = 0.02 * jax.random.normal(kw_, (1, cin_f, ks_f, ks_f), jnp.float32)
    b_final = jnp.zeros((1,), jnp.float32)
    return conv_params, (w_final, b_final)


def classifier_forward(x_nchw, params, r, c, apply_sigmoid=False):
    """Returns (seq(masked input).reshape(-1), label) -- matches the PyTorch module."""
    conv_params, (w_final, b_final) = params
    assert len(conv_params) == 3, "expects the standard side=16 tablegan stack"
    n, cin, side, _ = x_nchw.shape
    layer_dims = determine_layer_dims(side, conv_params[0][0].shape[0])
    assert cin == conv_params[0][0].shape[1], "input channels must match conv1 in_channels"

    x = x_nchw.astype(jnp.float32)

    # --- label + single-pixel mask, exactly as PyTorch (all channels) ----------
    label = (x[:, :, r, c].reshape(-1) + 1.0) * 0.5                 # (N*C,)
    pix_mask = jnp.ones((side, side), jnp.float32).at[r, c].set(0.0)
    xm = x * pix_mask[None, None]

    # --- canonical layout: rows = c*H*W + h*W + w, lanes = padded batch --------
    npad = max(LANE, ((n + LANE - 1) // LANE) * LANE)
    a0 = xm.reshape(n, cin * side * side).T                         # (C*H*W, N)
    a0 = jnp.pad(a0, ((0, 0), (0, npad - n))).astype(jnp.bfloat16)  # (256, Npad)
    lane_mask = (jnp.arange(npad) < n).astype(jnp.float32).reshape(1, npad)

    # --- fold each conv into one dense (C_out*OH*OW, C_in*H*W) matrix ----------
    dense_ws = [
        _conv_as_dense(conv_params[li][0],
                       layer_dims[li][1], layer_dims[li][1], 2, 1).astype(jnp.bfloat16)
        for li in range(3)
    ]                                                                # (256,256) (128,256) (64,128)
    w4 = _conv_as_dense(w_final, layer_dims[3][1], layer_dims[3][1], 1, 0)   # (1, 64)
    w4 = jnp.pad(w4, ((0, 7), (0, 0))).astype(jnp.bfloat16)                   # (8, 64)

    # --- per-layer BN group-mean matrices + packed per-row affine constants ----
    blks, row_dims = [], []
    for li in range(3):
        c_out, s_side = layer_dims[li + 1]
        s = s_side * s_side
        row_dims.append(c_out * s)
        blks.append(jnp.asarray(_group_mean_mat(c_out, s, n)))      # f32, exact stats
    aff, aff_offsets = _pack_affine(conv_params, b_final, layer_dims)

    # --- single fused pallas_call ----------------------------------------------
    kernel = _make_kernel(tuple(row_dims), tuple(aff_offsets), apply_sigmoid)
    vmem = pl.BlockSpec(memory_space=pltpu.MemorySpace.VMEM)
    out = pl.pallas_call(
        kernel,
        out_shape=jax.ShapeDtypeStruct((8, npad), jnp.float32),
        in_specs=[vmem] * 10,
        out_specs=vmem,
        compiler_params=pltpu.CompilerParams(vmem_limit_bytes=48 * 1024 * 1024),
    )(a0, dense_ws[0], dense_ws[1], dense_ws[2], w4,
      blks[0], blks[1], blks[2], aff, lane_mask)

    return out[0, :n], label


# ---------------------------------------------------------------------------
# Pure-JAX reference (lax.conv) for in-script correctness checking
# ---------------------------------------------------------------------------
def reference_forward(x_nchw, params, r, c, apply_sigmoid=False):
    conv_params, (w_f, b_f) = params
    n, _, side, _ = x_nchw.shape
    x = x_nchw.astype(jnp.float32)
    label = (x[:, :, r, c].reshape(-1) + 1.0) * 0.5
    mask = jnp.ones((side, side), jnp.float32).at[r, c].set(0.0)
    h = x * mask[None, None]
    dn = ('NCHW', 'OIHW', 'NCHW')
    prec = jax.lax.Precision.HIGHEST
    for (w, gamma, beta) in conv_params:
        h = jax.lax.conv_general_dilated(h, w, (2, 2), ((1, 1), (1, 1)),
                                         dimension_numbers=dn, precision=prec)
        mean = jnp.mean(h, axis=(0, 2, 3), keepdims=True)
        var = jnp.mean(jnp.square(h - mean), axis=(0, 2, 3), keepdims=True)
        h = (h - mean) * jax.lax.rsqrt(var + BN_EPS)
        h = h * gamma.reshape(1, -1, 1, 1) + beta.reshape(1, -1, 1, 1)
        h = jnp.where(h >= 0, h, LRELU_SLOPE * h)
    h = jax.lax.conv_general_dilated(h, w_f, (1, 1), 'VALID',
                                     dimension_numbers=dn, precision=prec)
    h = h + b_f.reshape(1, -1, 1, 1)
    out = h.reshape(-1)
    if apply_sigmoid:
        out = jax.nn.sigmoid(out)
    return out, label


# ---------------------------------------------------------------------------
if __name__ == "__main__":
    side = 16
    num_channels = 4
    batch = 4

    # Classifier metadata: last column must be named 'label'; its flat index
    # determines the masked pixel (r, c).
    meta = [{'name': f'col{i}'} for i in range(19)] + [{'name': 'label'}]
    assert meta[-1]['name'] == 'label'
    index = len(meta) - 1
    r, c = index // side, index % side

    layer_dims = determine_layer_dims(side, num_channels)
    assert layer_dims == [(1, 16), (4, 8), (8, 4), (16, 2)]

    key = jax.random.PRNGKey(0)
    key, k_x, k_p = jax.random.split(key, 3)
    x = jax.random.normal(k_x, (batch, 1, side, side), jnp.float32)
    params = init_classifier_params(k_p, layer_dims)

    fwd = jax.jit(classifier_forward, static_argnums=(2, 3, 4))
    out, label = fwd(x, params, r, c, False)
    out, label = jax.block_until_ready((out, label))

    assert out.shape == (batch,), out.shape
    assert label.shape == (batch,), label.shape
    assert bool(jnp.all(jnp.isfinite(out)))
    assert bool(jnp.all(jnp.isfinite(label)))

    # Cross-check the fused kernel against a pure-JAX reference
    # (bf16 MXU inputs in the kernel -> loose tolerance).
    out_expected, label_expected = reference_forward(x, params, r, c, False)
    assert bool(jnp.allclose(label, label_expected, atol=1e-6))
    assert bool(jnp.allclose(out, out_expected, rtol=0.1, atol=0.03)), (out, out_expected)

    print("KERNEL_OK")
</pallas_src>

<mosaic_0001>
module attributes {stable_mosaic.version = 11 : i64} {
  func.func @kernel(%arg0: memref<256x128xbf16, #tpu.memory_space<vmem>>, %arg1: memref<256x256xbf16, #tpu.memory_space<vmem>>, %arg2: memref<128x256xbf16, #tpu.memory_space<vmem>>, %arg3: memref<64x128xbf16, #tpu.memory_space<vmem>>, %arg4: memref<8x64xbf16, #tpu.memory_space<vmem>>, %arg5: memref<256x256xf32, #tpu.memory_space<vmem>>, %arg6: memref<128x128xf32, #tpu.memory_space<vmem>>, %arg7: memref<64x64xf32, #tpu.memory_space<vmem>>, %arg8: memref<456x2xf32, #tpu.memory_space<vmem>>, %arg9: memref<1x128xf32, #tpu.memory_space<vmem>>, %arg10: memref<8x128xf32, #tpu.memory_space<vmem>>) attributes {dimension_semantics = [], scalar_prefetch = 0 : i64, scratch_operands = 0 : i64, tpu.core_type = #tpu.core_type<tc>} {
    %c0 = arith.constant 0 : index
    %c0_0 = arith.constant 0 : index
    %0 = vector.load %arg9[%c0, %c0_0] : memref<1x128xf32, #tpu.memory_space<vmem>>, vector<1x128xf32>
    %c0_1 = arith.constant 0 : index
    %c0_2 = arith.constant 0 : index
    %1 = vector.load %arg1[%c0_1, %c0_2] : memref<256x256xbf16, #tpu.memory_space<vmem>>, vector<256x256xbf16>
    %c0_3 = arith.constant 0 : index
    %c0_4 = arith.constant 0 : index
    %2 = vector.load %arg0[%c0_3, %c0_4] : memref<256x128xbf16, #tpu.memory_space<vmem>>, vector<256x128xbf16>
    %cst = arith.constant dense<0.000000e+00> : vector<256x128xf32>
    %3 = tpu.matmul %1, %2, %cst {dimension_numbers = #tpu.dot_dimension_numbers<[1], [0], [0], [1], [0, 0, 1, 1], [], []>} : vector<256x256xbf16>, vector<256x128xbf16>, vector<256x128xf32> -> vector<256x128xf32>
    %cst_5 = arith.constant dense<0.000000e+00> : vector<256xf32>
    %4 = vector.multi_reduction <add>, %3, %cst_5 [1] : vector<256x128xf32> to vector<256xf32>
    %5 = vector.shape_cast %4 : vector<256xf32> to vector<256x1xf32>
    %6 = arith.mulf %3, %3 : vector<256x128xf32>
    %cst_6 = arith.constant dense<0.000000e+00> : vector<256xf32>
    %7 = vector.multi_reduction <add>, %6, %cst_6 [1] : vector<256x128xf32> to vector<256xf32>
    %8 = vector.shape_cast %7 : vector<256xf32> to vector<256x1xf32>
    %c0_7 = arith.constant 0 : index
    %c0_8 = arith.constant 0 : index
    %9 = vector.load %arg5[%c0_7, %c0_8] : memref<256x256xf32, #tpu.memory_space<vmem>>, vector<256x256xf32>
    %cst_9 = arith.constant dense<0.000000e+00> : vector<256x1xf32>
    %10 = tpu.matmul %9, %5, %cst_9 {dimension_numbers = #tpu.dot_dimension_numbers<[1], [0], [0], [1], [0, 0, 1, 1], [], []>} : vector<256x256xf32>, vector<256x1xf32>, vector<256x1xf32> -> vector<256x1xf32>
    %c0_10 = arith.constant 0 : index
    %c0_11 = arith.constant 0 : index
    %11 = vector.load %arg5[%c0_10, %c0_11] : memref<256x256xf32, #tpu.memory_space<vmem>>, vector<256x256xf32>
    %cst_12 = arith.constant dense<0.000000e+00> : vector<256x1xf32>
    %12 = tpu.matmul %11, %8, %cst_12 {dimension_numbers = #tpu.dot_dimension_numbers<[1], [0], [0], [1], [0, 0, 1, 1], [], []>} : vector<256x256xf32>, vector<256x1xf32>, vector<256x1xf32> -> vector<256x1xf32>
    %13 = arith.mulf %10, %10 : vector<256x1xf32>
    %14 = arith.subf %12, %13 : vector<256x1xf32>
    %cst_13 = arith.constant 0.000000e+00 : f32
    %15 = vector.broadcast %cst_13 : f32 to vector<256x1xf32>
    %16 = arith.maximumf %14, %15 : vector<256x1xf32>
    %c0_14 = arith.constant 0 : index
    %c0_15 = arith.constant 0 : index
    %17 = vector.load %arg8[%c0_14, %c0_15] : memref<456x2xf32, #tpu.memory_space<vmem>>, vector<256x1xf32>
    %c0_16 = arith.constant 0 : index
    %c1 = arith.constant 1 : index
    %18 = vector.load %arg8[%c0_16, %c1] : memref<456x2xf32, #tpu.memory_space<vmem>>, vector<256x1xf32>
    %cst_17 = arith.constant 9.99999974E-6 : f32
    %19 = vector.broadcast %cst_17 : f32 to vector<256x1xf32>
    %20 = arith.addf %16, %19 : vector<256x1xf32>
    %21 = math.rsqrt %20 : vector<256x1xf32>
    %22 = arith.mulf %17, %21 : vector<256x1xf32>
    %23 = arith.mulf %10, %22 : vector<256x1xf32>
    %24 = arith.subf %18, %23 : vector<256x1xf32>
    %25 = vector.broadcast %22 : vector<256x1xf32> to vector<256x128xf32>
    %26 = arith.mulf %3, %25 : vector<256x128xf32>
    %27 = vector.broadcast %24 : vector<256x1xf32> to vector<256x128xf32>
    %28 = arith.addf %26, %27 : vector<256x128xf32>
    %cst_18 = arith.constant 0.000000e+00 : f32
    %29 = vector.broadcast %cst_18 : f32 to vector<256x128xf32>
    %30 = arith.cmpf oge, %28, %29 : vector<256x128xf32>
    %cst_19 = arith.constant 2.000000e-01 : f32
    %31 = vector.broadcast %cst_19 : f32 to vector<256x128xf32>
    %32 = arith.mulf %31, %28 : vector<256x128xf32>
    %33 = arith.select %30, %28, %32 : vector<256x128xi1>, vector<256x128xf32>
    %34 = vector.broadcast %0 : vector<1x128xf32> to vector<256x128xf32>
    %35 = arith.mulf %33, %34 : vector<256x128xf32>
    %36 = arith.truncf %35 : vector<256x128xf32> to vector<256x128xbf16>
    %c0_20 = arith.constant 0 : index
    %c0_21 = arith.constant 0 : index
    %37 = vector.load %arg2[%c0_20, %c0_21] : memref<128x256xbf16, #tpu.memory_space<vmem>>, vector<128x256xbf16>
    %cst_22 = arith.constant dense<0.000000e+00> : vector<128x128xf32>
    %38 = tpu.matmul %37, %36, %cst_22 {dimension_numbers = #tpu.dot_dimension_numbers<[1], [0], [0], [1], [0, 0, 1, 1], [], []>} : vector<128x256xbf16>, vector<256x128xbf16>, vector<128x128xf32> -> vector<128x128xf32>
    %cst_23 = arith.constant dense<0.000000e+00> : vector<128xf32>
    %39 = vector.multi_reduction <add>, %38, %cst_23 [1] : vector<128x128xf32> to vector<128xf32>
    %40 = vector.shape_cast %39 : vector<128xf32> to vector<128x1xf32>
    %41 = arith.mulf %38, %38 : vector<128x128xf32>
    %cst_24 = arith.constant dense<0.000000e+00> : vector<128xf32>
    %42 = vector.multi_reduction <add>, %41, %cst_24 [1] : vector<128x128xf32> to vector<128xf32>
    %43 = vector.shape_cast %42 : vector<128xf32> to vector<128x1xf32>
    %c0_25 = arith.constant 0 : index
    %c0_26 = arith.constant 0 : index
    %44 = vector.load %arg6[%c0_25, %c0_26] : memref<128x128xf32, #tpu.memory_space<vmem>>, vector<128x128xf32>
    %cst_27 = arith.constant dense<0.000000e+00> : vector<128x1xf32>
    %45 = tpu.matmul %44, %40, %cst_27 {dimension_numbers = #tpu.dot_dimension_numbers<[1], [0], [0], [1], [0, 0, 1, 1], [], []>} : vector<128x128xf32>, vector<128x1xf32>, vector<128x1xf32> -> vector<128x1xf32>
    %c0_28 = arith.constant 0 : index
    %c0_29 = arith.constant 0 : index
    %46 = vector.load %arg6[%c0_28, %c0_29] : memref<128x128xf32, #tpu.memory_space<vmem>>, vector<128x128xf32>
    %cst_30 = arith.constant dense<0.000000e+00> : vector<128x1xf32>
    %47 = tpu.matmul %46, %43, %cst_30 {dimension_numbers = #tpu.dot_dimension_numbers<[1], [0], [0], [1], [0, 0, 1, 1], [], []>} : vector<128x128xf32>, vector<128x1xf32>, vector<128x1xf32> -> vector<128x1xf32>
    %48 = arith.mulf %45, %45 : vector<128x1xf32>
    %49 = arith.subf %47, %48 : vector<128x1xf32>
    %cst_31 = arith.constant 0.000000e+00 : f32
    %50 = vector.broadcast %cst_31 : f32 to vector<128x1xf32>
    %51 = arith.maximumf %49, %50 : vector<128x1xf32>
    %c256 = arith.constant 256 : index
    %c0_32 = arith.constant 0 : index
    %52 = vector.load %arg8[%c256, %c0_32] : memref<456x2xf32, #tpu.memory_space<vmem>>, vector<128x1xf32>
    %c256_33 = arith.constant 256 : index
    %c1_34 = arith.constant 1 : index
    %53 = vector.load %arg8[%c256_33, %c1_34] : memref<456x2xf32, #tpu.memory_space<vmem>>, vector<128x1xf32>
    %cst_35 = arith.constant 9.99999974E-6 : f32
    %54 = vector.broadcast %cst_35 : f32 to vector<128x1xf32>
    %55 = arith.addf %51, %54 : vector<128x1xf32>
    %56 = math.rsqrt %55 : vector<128x1xf32>
    %57 = arith.mulf %52, %56 : vector<128x1xf32>
    %58 = arith.mulf %45, %57 : vector<128x1xf32>
    %59 = arith.subf %53, %58 : vector<128x1xf32>
    %60 = vector.broadcast %57 : vector<128x1xf32> to vector<128x128xf32>
    %61 = arith.mulf %38, %60 : vector<128x128xf32>
    %62 = vector.broadcast %59 : vector<128x1xf32> to vector<128x128xf32>
    %63 = arith.addf %61, %62 : vector<128x128xf32>
    %cst_36 = arith.constant 0.000000e+00 : f32
    %64 = vector.broadcast %cst_36 : f32 to vector<128x128xf32>
    %65 = arith.cmpf oge, %63, %64 : vector<128x128xf32>
    %cst_37 = arith.constant 2.000000e-01 : f32
    %66 = vector.broadcast %cst_37 : f32 to vector<128x128xf32>
    %67 = arith.mulf %66, %63 : vector<128x128xf32>
    %68 = arith.select %65, %63, %67 : vector<128x128xi1>, vector<128x128xf32>
    %69 = vector.broadcast %0 : vector<1x128xf32> to vector<128x128xf32>
    %70 = arith.mulf %68, %69 : vector<128x128xf32>
    %71 = arith.truncf %70 : vector<128x128xf32> to vector<128x128xbf16>
    %c0_38 = arith.constant 0 : index
    %c0_39 = arith.constant 0 : index
    %72 = vector.load %arg3[%c0_38, %c0_39] : memref<64x128xbf16, #tpu.memory_space<vmem>>, vector<64x128xbf16>
    %cst_40 = arith.constant dense<0.000000e+00> : vector<64x128xf32>
    %73 = tpu.matmul %72, %71, %cst_40 {dimension_numbers = #tpu.dot_dimension_numbers<[1], [0], [0], [1], [0, 0, 1, 1], [], []>} : vector<64x128xbf16>, vector<128x128xbf16>, vector<64x128xf32> -> vector<64x128xf32>
    %cst_41 = arith.constant dense<0.000000e+00> : vector<64xf32>
    %74 = vector.multi_reduction <add>, %73, %cst_41 [1] : vector<64x128xf32> to vector<64xf32>
    %75 = vector.shape_cast %74 : vector<64xf32> to vector<64x1xf32>
    %76 = arith.mulf %73, %73 : vector<64x128xf32>
    %cst_42 = arith.constant dense<0.000000e+00> : vector<64xf32>
    %77 = vector.multi_reduction <add>, %76, %cst_42 [1] : vector<64x128xf32> to vector<64xf32>
    %78 = vector.shape_cast %77 : vector<64xf32> to vector<64x1xf32>
    %c0_43 = arith.constant 0 : index
    %c0_44 = arith.constant 0 : index
    %79 = vector.load %arg7[%c0_43, %c0_44] : memref<64x64xf32, #tpu.memory_space<vmem>>, vector<64x64xf32>
    %cst_45 = arith.constant dense<0.000000e+00> : vector<64x1xf32>
    %80 = tpu.matmul %79, %75, %cst_45 {dimension_numbers = #tpu.dot_dimension_numbers<[1], [0], [0], [1], [0, 0, 1, 1], [], []>} : vector<64x64xf32>, vector<64x1xf32>, vector<64x1xf32> -> vector<64x1xf32>
    %c0_46 = arith.constant 0 : index
    %c0_47 = arith.constant 0 : index
    %81 = vector.load %arg7[%c0_46, %c0_47] : memref<64x64xf32, #tpu.memory_space<vmem>>, vector<64x64xf32>
    %cst_48 = arith.constant dense<0.000000e+00> : vector<64x1xf32>
    %82 = tpu.matmul %81, %78, %cst_48 {dimension_numbers = #tpu.dot_dimension_numbers<[1], [0], [0], [1], [0, 0, 1, 1], [], []>} : vector<64x64xf32>, vector<64x1xf32>, vector<64x1xf32> -> vector<64x1xf32>
    %83 = arith.mulf %80, %80 : vector<64x1xf32>
    %84 = arith.subf %82, %83 : vector<64x1xf32>
    %cst_49 = arith.constant 0.000000e+00 : f32
    %85 = vector.broadcast %cst_49 : f32 to vector<64x1xf32>
    %86 = arith.maximumf %84, %85 : vector<64x1xf32>
    %c384 = arith.constant 384 : index
    %c0_50 = arith.constant 0 : index
    %87 = vector.load %arg8[%c384, %c0_50] : memref<456x2xf32, #tpu.memory_space<vmem>>, vector<64x1xf32>
    %c384_51 = arith.constant 384 : index
    %c1_52 = arith.constant 1 : index
    %88 = vector.load %arg8[%c384_51, %c1_52] : memref<456x2xf32, #tpu.memory_space<vmem>>, vector<64x1xf32>
    %cst_53 = arith.constant 9.99999974E-6 : f32
    %89 = vector.broadcast %cst_53 : f32 to vector<64x1xf32>
    %90 = arith.addf %86, %89 : vector<64x1xf32>
    %91 = math.rsqrt %90 : vector<64x1xf32>
    %92 = arith.mulf %87, %91 : vector<64x1xf32>
    %93 = arith.mulf %80, %92 : vector<64x1xf32>
    %94 = arith.subf %88, %93 : vector<64x1xf32>
    %95 = vector.broadcast %92 : vector<64x1xf32> to vector<64x128xf32>
    %96 = arith.mulf %73, %95 : vector<64x128xf32>
    %97 = vector.broadcast %94 : vector<64x1xf32> to vector<64x128xf32>
    %98 = arith.addf %96, %97 : vector<64x128xf32>
    %cst_54 = arith.constant 0.000000e+00 : f32
    %99 = vector.broadcast %cst_54 : f32 to vector<64x128xf32>
    %100 = arith.cmpf oge, %98, %99 : vector<64x128xf32>
    %cst_55 = arith.constant 2.000000e-01 : f32
    %101 = vector.broadcast %cst_55 : f32 to vector<64x128xf32>
    %102 = arith.mulf %101, %98 : vector<64x128xf32>
    %103 = arith.select %100, %98, %102 : vector<64x128xi1>, vector<64x128xf32>
    %104 = vector.broadcast %0 : vector<1x128xf32> to vector<64x128xf32>
    %105 = arith.mulf %103, %104 : vector<64x128xf32>
    %106 = arith.truncf %105 : vector<64x128xf32> to vector<64x128xbf16>
    %c0_56 = arith.constant 0 : index
    %c0_57 = arith.constant 0 : index
    %107 = vector.load %arg4[%c0_56, %c0_57] : memref<8x64xbf16, #tpu.memory_space<vmem>>, vector<8x64xbf16>
    %cst_58 = arith.constant dense<0.000000e+00> : vector<8x128xf32>
    %108 = tpu.matmul %107, %106, %cst_58 {dimension_numbers = #tpu.dot_dimension_numbers<[1], [0], [0], [1], [0, 0, 1, 1], [], []>} : vector<8x64xbf16>, vector<64x128xbf16>, vector<8x128xf32> -> vector<8x128xf32>
    %c448 = arith.constant 448 : index
    %c1_59 = arith.constant 1 : index
    %109 = vector.load %arg8[%c448, %c1_59] : memref<456x2xf32, #tpu.memory_space<vmem>>, vector<1x1xf32>
    %110 = vector.broadcast %109 : vector<1x1xf32> to vector<8x128xf32>
    %111 = arith.addf %108, %110 : vector<8x128xf32>
    %c0_60 = arith.constant 0 : index
    %c0_61 = arith.constant 0 : index
    %112 = vector.load %arg10[%c0_60, %c0_61] : memref<8x128xf32, #tpu.memory_space<vmem>>, vector<8x128xf32>
    tpu.vector_store %arg10[%c0_60, %c0_61], %111 {strides = array<i32>} : memref<8x128xf32, #tpu.memory_space<vmem>>, vector<8x128xf32>,
    return
  }
}

</mosaic_0001>

<bundles_post_ra>
// kernel: classifier_forward.1
= control target key start
LH: loop header
LB: loop body
LE: loop exit
PB: predicated region body
PF: predicated region fallthrough
CT: control target
= control target key end

     0   :  { %s4572_s12 = smov 1   ;;  %s7105_s0 = inlined_call_operand.vmem [shape: bf16[256,128], index: 0, kind: input, shape index: {}]   ;;  %s7106_s1 = inlined_call_operand.vmem [shape: bf16[256,256], index: 1, kind: input, shape index: {}]   ;;  %s7107_s5 = inlined_call_operand.vmem [shape: f32[256,256], index: 5, kind: input, shape index: {}]   ;;  %s7108_s8 = inlined_call_operand.vmem [shape: f32[456,2], index: 8, kind: input, shape index: {}]   ;;  %s7109_s9 = inlined_call_operand.vmem [shape: f32[1,128], index: 9, kind: input, shape index: {}]   ;;  %s7110_s2 = inlined_call_operand.vmem [shape: bf16[128,256], index: 2, kind: input, shape index: {}]   ;;  %s7111_s6 = inlined_call_operand.vmem [shape: f32[128,128], index: 6, kind: input, shape index: {}]   ;;  %s7112_s3 = inlined_call_operand.vmem [shape: bf16[64,128], index: 3, kind: input, shape index: {}]   ;;  %s7113_s7 = inlined_call_operand.vmem [shape: f32[64,64], index: 7, kind: input, shape index: {}]   ;;  %s7114_s4 = inlined_call_operand.vmem [shape: bf16[8,64], index: 4, kind: input, shape index: {}]   ;;  %s7115_s10 = inlined_call_operand.vmem [shape: f32[8,128], index: 10, kind: output, shape index: {}]  }
   0x1   :  { %v4363_v0 = vld [vmem:[%s7105_s0 + $0x38] sm:$0xff]  ;;  %v4362_v2 = vld [vmem:[%s7105_s0 + $0x30] sm:$0xff]  ;;  %v4361_v4 = vld [vmem:[%s7105_s0 + $0x28] sm:$0xff] }
   0x2   :  { %v4371_v1 = vld [vmem:[%s7105_s0 + $0x78] sm:$0xff]  ;;  %357 = vmatpush.bf16.msra.mxu0 %v4363_v0  ;;  %v4370_v3 = vld [vmem:[%s7105_s0 + $0x70] sm:$0xff]  ;;  %v4369_v5 = vld [vmem:[%s7105_s0 + $0x68] sm:$0xff] }
   0x3   :  { %446 = vmatpush.bf16.msra.mxu1 %v4371_v1  ;;  %v4360_v6 = vld [vmem:[%s7105_s0 + $0x20] sm:$0xff]  ;;  %v4359_v8 = vld [vmem:[%s7105_s0 + $0x18] sm:$0xff]  ;;  %v4358_v10 = vld [vmem:[%s7105_s0 + $0x10] sm:$0xff] }
   0x4   :  { %v4368_v7 = vld [vmem:[%s7105_s0 + $0x60] sm:$0xff]  ;;  %v4367_v9 = vld [vmem:[%s7105_s0 + $0x58] sm:$0xff]  ;;  %v4366_v11 = vld [vmem:[%s7105_s0 + $0x50] sm:$0xff] }
   0x5   :  { %v4357_v12 = vld [vmem:[%s7105_s0 + $0x8] sm:$0xff]  ;;  %v4356_v14 = vld [vmem:[%s7105_s0] sm:$0xff]  ;;  %v4045_v22 = vld [vmem:[%s7106_s1 + $0x10] sm:$0xf] }
   0x6   :  { %358 = vmatpush.bf16.msra.mxu0 %v4362_v2  ;;  %v4365_v13 = vld [vmem:[%s7105_s0 + $0x48] sm:$0xff]  ;;  %v4364_v15 = vld [vmem:[%s7105_s0 + $0x40] sm:$0xff]  ;;  %v4327_v23 = vld [vmem:[%s7106_s1 + $0x14] sm:$0xf0] }
   0x7   :  { %447 = vmatpush.bf16.msra.mxu1 %v4370_v3  ;;  %v4037_v16 = vld [vmem:[%s7106_s1] sm:$0xf]  ;;  %v4325_v17 = vld [vmem:[%s7106_s1 + $0x4] sm:$0xf0]  ;;  %v4324_v18 = vld [vmem:[%s7106_s1 + $0x4] sm:$0xf]  ;;  %v4046_v26 = vor.u32 %v4327_v23, %v4045_v22 }
   0x8   :  { %v4039_v19 = vld [vmem:[%s7106_s1 + $0x8] sm:$0xf0]  ;;  %v4038_v20 = vor.u32 %v4325_v17, %v4037_v16  ;;  %v4326_v24 = vld [vmem:[%s7106_s1 + $0x14] sm:$0xf]  ;;  %v4047_v25 = vld [vmem:[%s7106_s1 + $0x18] sm:$0xf0] }
   0x9   :  { %v4042_v21 = vor.u32 %v4324_v18, %v4039_v19  ;;  %v4050_v27 = vor.u32 %v4326_v24, %v4047_v25  ;;  %v4053_v28 = vld [vmem:[%s7106_s1 + $0x20] sm:$0xf]  ;;  %v4329_v29 = vld [vmem:[%s7106_s1 + $0x24] sm:$0xf0]  ;;  %v4328_v30 = vld [vmem:[%s7106_s1 + $0x24] sm:$0xf] }
   0xa   :  { %359 = vmatpush.bf16.msra.mxu0 %v4361_v4  ;;  %v4055_v31 = vld [vmem:[%s7106_s1 + $0x28] sm:$0xf0]  ;;  %v4054_v32 = vor.u32 %v4329_v29, %v4053_v28  ;;  %v4061_v34 = vld [vmem:[%s7106_s1 + $0x30] sm:$0xf]  ;;  %v4331_v35 = vld [vmem:[%s7106_s1 + $0x34] sm:$0xf0] }
   0xb   :  { %448 = vmatpush.bf16.msra.mxu1 %v4369_v5  ;;  %v4058_v33 = vor.u32 %v4328_v30, %v4055_v31  ;;  %v4330_v36 = vld [vmem:[%s7106_s1 + $0x34] sm:$0xf]  ;;  %v4063_v37 = vld [vmem:[%s7106_s1 + $0x38] sm:$0xf0]  ;;  %v4062_v38 = vor.u32 %v4331_v35, %v4061_v34  ;;  %v4069_v40 = vld [vmem:[%s7106_s1 + $0x40] sm:$0xf] }
   0xc   :  { %v4066_v39 = vor.u32 %v4330_v36, %v4063_v37  ;;  %v4333_v41 = vld [vmem:[%s7106_s1 + $0x44] sm:$0xf0]  ;;  %v4332_v42 = vld [vmem:[%s7106_s1 + $0x44] sm:$0xf]  ;;  %v4071_v43 = vld [vmem:[%s7106_s1 + $0x48] sm:$0xf0] }
   0xd   :  { %v4070_v44 = vor.u32 %v4333_v41, %v4069_v40  ;;  %v4074_v45 = vor.u32 %v4332_v42, %v4071_v43  ;;  %v4077_v46 = vld [vmem:[%s7106_s1 + $0x50] sm:$0xf]  ;;  %v4335_v47 = vld [vmem:[%s7106_s1 + $0x54] sm:$0xf0]  ;;  %v4334_v48 = vld [vmem:[%s7106_s1 + $0x54] sm:$0xf] }
   0xe   :  { %360 = vmatpush.bf16.msra.mxu0 %v4360_v6  ;;  %v4079_v49 = vld [vmem:[%s7106_s1 + $0x58] sm:$0xf0]  ;;  %v4078_v50 = vor.u32 %v4335_v47, %v4077_v46  ;;  %v4085_v52 = vld [vmem:[%s7106_s1 + $0x60] sm:$0xf]  ;;  %v4337_v53 = vld [vmem:[%s7106_s1 + $0x64] sm:$0xf0] }
   0xf   :  { %449 = vmatpush.bf16.msra.mxu1 %v4368_v7  ;;  %v4082_v51 = vor.u32 %v4334_v48, %v4079_v49  ;;  %v4336_v54 = vld [vmem:[%s7106_s1 + $0x64] sm:$0xf]  ;;  %v4087_v55 = vld [vmem:[%s7106_s1 + $0x68] sm:$0xf0]  ;;  %v4086_v56 = vor.u32 %v4337_v53, %v4085_v52  ;;  %v4093_v58 = vld [vmem:[%s7106_s1 + $0x70] sm:$0xf] }
  0x10   :  { %v4090_v57 = vor.u32 %v4336_v54, %v4087_v55  ;;  %v4339_v59 = vld [vmem:[%s7106_s1 + $0x74] sm:$0xf0]  ;;  %v4338_v60 = vld [vmem:[%s7106_s1 + $0x74] sm:$0xf]  ;;  %v4095_v61 = vld [vmem:[%s7106_s1 + $0x78] sm:$0xf0] }
  0x11   :  { %v4094_v62 = vor.u32 %v4339_v59, %v4093_v58  ;;  %v4098_v63 = vor.u32 %v4338_v60, %v4095_v61  ;;  %v4101_v0 = vld [vmem:[%s7106_s1 + $0x80] sm:$0xf]  ;;  %v4341_v1 = vld [vmem:[%s7106_s1 + $0x84] sm:$0xf0]  ;;  %v4340_v2 = vld [vmem:[%s7106_s1 + $0x84] sm:$0xf] }
  0x12   :  { %361 = vmatpush.bf16.msra.mxu0 %v4359_v8  ;;  %v4103_v3 = vld [vmem:[%s7106_s1 + $0x88] sm:$0xf0]  ;;  %v4102_v4 = vor.u32 %v4341_v1, %v4101_v0  ;;  %v4117_v24 = vld [vmem:[%s7106_s1 + $0xa0] sm:$0xf]  ;;  %v4345_v25 = vld [vmem:[%s7106_s1 + $0xa4] sm:$0xf0] }
  0x13   :  { %450 = vmatpush.bf16.msra.mxu1 %v4367_v9  ;;  %v4106_v5 = vor.u32 %v4340_v2, %v4103_v3  ;;  %v4118_v28 = vor.u32 %v4345_v25, %v4117_v24  ;;  %v4125_v36 = vld [vmem:[%s7106_s1 + $0xb0] sm:$0xf]  ;;  %v4347_v37 = vld [vmem:[%s7106_s1 + $0xb4] sm:$0xf0]  ;;  %v4133_v49 = vld [vmem:[%s7106_s1 + $0xc0] sm:$0xf] }
  0x14   :  { %v4126_v40 = vor.u32 %v4347_v37, %v4125_v36  ;;  %v4135_v52 = vld [vmem:[%s7106_s1 + $0xc8] sm:$0xf0]  ;;  %v4351_v0 = vld [vmem:[%s7106_s1 + $0xd4] sm:$0xf0]  ;;  %v4350_v1 = vld [vmem:[%s7106_s1 + $0xd4] sm:$0xf] }
  0x15   :  { %v4143_v2 = vld [vmem:[%s7106_s1 + $0xd8] sm:$0xf0]  ;;  %v4354_v36 = vld [vmem:[%s7106_s1 + $0xf4] sm:$0xf] }
  0x16   :  { %362 = vmatpush.bf16.msra.mxu0 %v4358_v10  ;;  %v4159_v37 = vld [vmem:[%s7106_s1 + $0xf8] sm:$0xf0] }
  0x17   :  { %451 = vmatpush.bf16.msra.mxu1 %v4366_v11 }
  0x1a   :  { %363 = vmatpush.bf16.msra.mxu0 %v4357_v12  ;;  %v4109_v12 = vld [vmem:[%s7106_s1 + $0x90] sm:$0xf] }
  0x1b   :  { %452 = vmatpush.bf16.msra.mxu1 %v4365_v13  ;;  %v4343_v13 = vld [vmem:[%s7106_s1 + $0x94] sm:$0xf0] }
  0x1c   :  { %v4110_v16 = vor.u32 %v4343_v13, %v4109_v12 }
  0x1e   :  { %364 = vmatpush.bf16.msra.mxu0 %v4356_v14  ;;  %v4342_v14 = vld [vmem:[%s7106_s1 + $0x94] sm:$0xf] }
  0x1f   :  { %453 = vmatpush.bf16.msra.mxu1 %v4364_v15  ;;  %v4111_v15 = vld [vmem:[%s7106_s1 + $0x98] sm:$0xf0] }
  0x20   :  { %v4114_v17 = vor.u32 %v4342_v14, %v4111_v15  ;;  %v4149_v15 = vld [vmem:[%s7106_s1 + $0xe0] sm:$0xf] }
  0x21   :  { %365 = vmatmul.bf16.vlgmr.msra.gmra.mxu0 %v4038_v20 }
  0x22   :  { %454 = vmatmul.bf16.vlgmr.msra.gmra.mxu1 %v4042_v21 }
  0x31   :  { %370 = vmatmul.bf16.gmra.mxu0 %v4046_v26  ;;  %v4344_v26 = vld [vmem:[%s7106_s1 + $0xa4] sm:$0xf] }
  0x32   :  { %459 = vmatmul.bf16.gmra.mxu1 %v4050_v27  ;;  %v4119_v27 = vld [vmem:[%s7106_s1 + $0xa8] sm:$0xf0] }
  0x33   :  { %v4122_v29 = vor.u32 %v4344_v26, %v4119_v27 }
  0x41   :  { %375 = vmatmul.bf16.gmra.mxu0 %v4054_v32 }
  0x42   :  { %464 = vmatmul.bf16.gmra.mxu1 %v4058_v33 }
  0x51   :  { %380 = vmatmul.bf16.gmra.mxu0 %v4062_v38  ;;  %v4346_v38 = vld [vmem:[%s7106_s1 + $0xb4] sm:$0xf] }
  0x52   :  { %469 = vmatmul.bf16.gmra.mxu1 %v4066_v39  ;;  %v4127_v39 = vld [vmem:[%s7106_s1 + $0xb8] sm:$0xf0] }
  0x53   :  { %v4130_v41 = vor.u32 %v4346_v38, %v4127_v39  ;;  %v4162_v39 = vor.u32 %v4354_v36, %v4159_v37 }
  0x61   :  { %385 = vmatmul.bf16.gmra.mxu0 %v4070_v44 }
  0x62   :  { %474 = vmatmul.bf16.gmra.mxu1 %v4074_v45 }
  0x71   :  { %390 = vmatmul.bf16.gmra.mxu0 %v4078_v50  ;;  %v4349_v50 = vld [vmem:[%s7106_s1 + $0xc4] sm:$0xf0] }
  0x72   :  { %479 = vmatmul.bf16.gmra.mxu1 %v4082_v51  ;;  %v4348_v51 = vld [vmem:[%s7106_s1 + $0xc4] sm:$0xf]  ;;  %v4134_v53 = vor.u32 %v4349_v50, %v4133_v49 }
  0x73   :  { %v4138_v54 = vor.u32 %v4348_v51, %v4135_v52 }
  0x81   :  { %395 = vmatmul.bf16.gmra.mxu0 %v4086_v56 }
  0x82   :  { %484 = vmatmul.bf16.gmra.mxu1 %v4090_v57 }
  0x91   :  { %400 = vmatmul.bf16.gmra.mxu0 %v4094_v62 }
  0x92   :  { %489 = vmatmul.bf16.gmra.mxu1 %v4098_v63  ;;  %v4141_v63 = vld [vmem:[%s7106_s1 + $0xd0] sm:$0xf] }
  0x93   :  { %v4142_v3 = vor.u32 %v4351_v0, %v4141_v63 }
  0x9e   :  { %v366_v6 = vpop.f32.mrf.mxu0 }
  0x9f   :  { %v455_v7 = vpop.f32.mrf.mxu1 }
  0xa0   :  { %v4786_v8 = vadd.f32 %v455_v7, %v366_v6 }
  0xa1   :  { %405 = vmatmul.bf16.gmra.mxu0 %v4102_v4  ;;  %v4146_v4 = vor.u32 %v4350_v1, %v4143_v2 }
  0xa2   :  { %7151 = vst [vmem:[#allocation2_spill] sm:$0xff] %v4786_v8  ;;  %494 = vmatmul.bf16.gmra.mxu1 %v4106_v5 }
  0xa6   :  { %v368_v9 = vpop.f32.mrf.mxu0 }
  0xa7   :  { %v457_v10 = vpop.f32.mrf.mxu1 }
  0xa8   :  { %v4788_v11 = vadd.f32 %v457_v10, %v368_v9 }
  0xaa   :  { %7152 = vst [vmem:[#allocation3_spill] sm:$0xff] %v4788_v11  ;;  %537 = vadd.xlane.f32.xlu0 %v4788_v11 }
  0xae   :  { %v371_v18 = vpop.f32.mrf.mxu0 }
  0xaf   :  { %v460_v19 = vpop.f32.mrf.mxu1 }
  0xb0   :  { %v4803_v20 = vadd.f32 %v460_v19, %v371_v18  ;;  %v4151_v18 = vld [vmem:[%s7106_s1 + $0xe8] sm:$0xf0] }
  0xb1   :  { %410 = vmatmul.bf16.gmra.mxu0 %v4110_v16  ;;  %v4353_v16 = vld [vmem:[%s7106_s1 + $0xe4] sm:$0xf0] }
  0xb2   :  { %7153 = vst [vmem:[#allocation4_spill] sm:$0xff] %v4803_v20  ;;  %499 = vmatmul.bf16.gmra.mxu1 %v4114_v17  ;;  %539 = vadd.xlane.f32.xlu2 %v4803_v20  ;;  %v4352_v17 = vld [vmem:[%s7106_s1 + $0xe4] sm:$0xf]  ;;  %v4150_v19 = vor.u32 %v4353_v16, %v4149_v15 }
  0xb6   :  { %v373_v21 = vpop.f32.mrf.mxu0 }
  0xb7   :  { %v462_v22 = vpop.f32.mrf.mxu1 }
  0xb8   :  { %v4806_v23 = vadd.f32 %v462_v22, %v373_v21  ;;  %v4154_v21 = vor.u32 %v4352_v17, %v4151_v18 }
  0xba   :  { %7154 = vst [vmem:[#allocation5_spill] sm:$0xff] %v4806_v23  ;;  %541 = vadd.xlane.f32.xlu1 %v4806_v23 }
  0xbe   :  { %v376_v30 = vpop.f32.mrf.mxu0 }
  0xbf   :  { %v465_v31 = vpop.f32.mrf.mxu1 }
  0xc0   :  { %v4821_v32 = vadd.f32 %v465_v31, %v376_v30 }
  0xc1   :  { %415 = vmatmul.bf16.gmra.mxu0 %v4118_v28 }
  0xc2   :  { %7155 = vst [vmem:[#allocation6_spill] sm:$0xff] %v4821_v32  ;;  %504 = vmatmul.bf16.gmra.mxu1 %v4122_v29  ;;  %543 = vadd.xlane.f32.xlu0 %v4821_v32 }
  0xc6   :  { %v378_v33 = vpop.f32.mrf.mxu0 }
  0xc7   :  { %v467_v34 = vpop.f32.mrf.mxu1 }
  0xc8   :  { %v4824_v35 = vadd.f32 %v467_v34, %v378_v33  ;;  %v4157_v33 = vld [vmem:[%s7106_s1 + $0xf0] sm:$0xf]  ;;  %v4355_v34 = vld [vmem:[%s7106_s1 + $0xf4] sm:$0xf0] }
  0xc9   :  { %v4158_v38 = vor.u32 %v4355_v34, %v4157_v33 }
  0xca   :  { %7156 = vst [vmem:[#allocation7_spill] sm:$0xff] %v4824_v35  ;;  %545 = vadd.xlane.f32.xlu2 %v4824_v35 }
  0xce   :  { %v381_v42 = vpop.f32.mrf.mxu0 }
  0xcf   :  { %v470_v43 = vpop.f32.mrf.mxu1 }
  0xd0   :  { %v4839_v44 = vadd.f32 %v470_v43, %v381_v42 }
  0xd1   :  { %420 = vmatmul.bf16.gmra.mxu0 %v4126_v40 }
  0xd2   :  { %7157 = vst [vmem:[#allocation8_spill] sm:$0xff] %v4839_v44  ;;  %509 = vmatmul.bf16.gmra.mxu1 %v4130_v41  ;;  %547 = vadd.xlane.f32.xlu1 %v4839_v44  ;;  %v605_v48 = vmul.f32 %v4839_v44, %v4839_v44 }
  0xd6   :  { %v383_v45 = vpop.f32.mrf.mxu0 }
  0xd7   :  { %v472_v46 = vpop.f32.mrf.mxu1 }
  0xd8   :  { %v4842_v47 = vadd.f32 %v472_v46, %v383_v45 }
  0xda   :  { %7158 = vst [vmem:[#allocation9_spill] sm:$0xff] %v4842_v47  ;;  %549 = vadd.xlane.f32.xlu0 %v4842_v47  ;;  %643 = vadd.xlane.f32.xlu1 %v605_v48  ;;  %v606_v58 = vmul.f32 %v4842_v47, %v4842_v47 }
  0xde   :  { %v386_v55 = vpop.f32.mrf.mxu0 }
  0xdf   :  { %v475_v56 = vpop.f32.mrf.mxu1 }
  0xe0   :  { %v4859_v57 = vadd.f32 %v475_v56, %v386_v55 }
  0xe1   :  { %425 = vmatmul.bf16.gmra.mxu0 %v4134_v53 }
  0xe2   :  { %7159 = vst [vmem:[#allocation10_spill] sm:$0xff] %v4859_v57  ;;  %514 = vmatmul.bf16.gmra.mxu1 %v4138_v54  ;;  %645 = vadd.xlane.f32.xlu0 %v606_v58  ;;  %v607_v62 = vmul.f32 %v4859_v57, %v4859_v57 }
  0xe3   :  { %551 = vadd.xlane.f32.xlu2 %v4859_v57 }
  0xe6   :  { %v388_v59 = vpop.f32.mrf.mxu0 }
  0xe7   :  { %v477_v60 = vpop.f32.mrf.mxu1 }
  0xe8   :  { %v4864_v61 = vadd.f32 %v477_v60, %v388_v59 }
  0xea   :  { %7160 = vst [vmem:[#allocation11_spill] sm:$0xff] %v4864_v61  ;;  %553 = vadd.xlane.f32.xlu1 %v4864_v61  ;;  %v608_v9 = vmul.f32 %v4864_v61, %v4864_v61 }
  0xeb   :  { %647 = vadd.xlane.f32.xlu2 %v607_v62 }
  0xee   :  { %v391_v5 = vpop.f32.mrf.mxu0 }
  0xef   :  { %v480_v6 = vpop.f32.mrf.mxu1 }
  0xf0   :  { %v4881_v7 = vadd.f32 %v480_v6, %v391_v5 }
  0xf1   :  { %430 = vmatmul.bf16.gmra.mxu0 %v4142_v3 }
  0xf2   :  { %7161 = vst [vmem:[#allocation12_spill] sm:$0xff] %v4881_v7  ;;  %519 = vmatmul.bf16.gmra.mxu1 %v4146_v4  ;;  %649 = vadd.xlane.f32.xlu1 %v608_v9  ;;  %v609_v14 = vmul.f32 %v4881_v7, %v4881_v7 }
  0xf3   :  { %555 = vadd.xlane.f32.xlu0 %v4881_v7 }
  0xf6   :  { %v393_v10 = vpop.f32.mrf.mxu0 }
  0xf7   :  { %v482_v12 = vpop.f32.mrf.mxu1 }
  0xf8   :  { %v4886_v13 = vadd.f32 %v482_v12, %v393_v10 }
  0xfa   :  { %7162 = vst [vmem:[#allocation13_spill] sm:$0xff] %v4886_v13  ;;  %557 = vadd.xlane.f32.xlu2 %v4886_v13  ;;  %v610_v26 = vmul.f32 %v4886_v13, %v4886_v13 }
  0xfb   :  { %651 = vadd.xlane.f32.xlu0 %v609_v14 }
  0xfe   :  { %v396_v22 = vpop.f32.mrf.mxu0 }
  0xff   :  { %v485_v24 = vpop.f32.mrf.mxu1 }
 0x100   :  { %v4903_v25 = vadd.f32 %v485_v24, %v396_v22 }
 0x101   :  { %435 = vmatmul.bf16.gmra.mxu0 %v4150_v19 }
 0x102   :  { %524 = vmatmul.bf16.gmra.mxu1 %v4154_v21  ;;  %v611_v27 = vmul.f32 %v4903_v25, %v4903_v25  ;;  %653 = vadd.xlane.f32.xlu2 %v610_v26 }
 0x103   :  { %559 = vadd.xlane.f32.xlu0 %v4903_v25 }
 0x104   :  { %655 = vadd.xlane.f32.xlu1 %v611_v27 }
 0x106   :  { %v398_v28 = vpop.f32.mrf.mxu0 }
 0x107   :  { %v487_v29 = vpop.f32.mrf.mxu1 }
 0x108   :  { %v4910_v30 = vadd.f32 %v487_v29, %v398_v28 }
 0x10a   :  { %v612_v31 = vmul.f32 %v4910_v30, %v4910_v30  ;;  %561 = vadd.xlane.f32.xlu2 %v4910_v30 }
 0x10c   :  { %657 = vadd.xlane.f32.xlu0 %v612_v31 }
 0x10e   :  { %v401_v40 = vpop.f32.mrf.mxu0 }
 0x10f   :  { %v490_v41 = vpop.f32.mrf.mxu1 }
 0x110   :  { %v4927_v42 = vadd.f32 %v490_v41, %v401_v40 }
 0x111   :  { %440 = vmatmul.bf16.gmra.mxu0 %v4158_v38 }
 0x112   :  { %529 = vmatmul.bf16.gmra.mxu1 %v4162_v39  ;;  %v613_v43 = vmul.f32 %v4927_v42, %v4927_v42  ;;  %563 = vadd.xlane.f32.xlu1 %v4927_v42 }
 0x114   :  { %659 = vadd.xlane.f32.xlu2 %v613_v43 }
 0x116   :  { %v403_v45 = vpop.f32.mrf.mxu0 }
 0x117   :  { %v492_v46 = vpop.f32.mrf.mxu1 }
 0x118   :  { %v4932_v48 = vadd.f32 %v492_v46, %v403_v45 }
 0x11a   :  { %565 = vadd.xlane.f32.xlu0 %v4932_v48  ;;  %v614_v49 = vmul.f32 %v4932_v48, %v4932_v48 }
 0x11c   :  { %661 = vadd.xlane.f32.xlu1 %v614_v49 }
 0x11d   :  { %v4954_v1 = vpop.xlane.xlu0 %537 }
 0x11e   :  { %v4937_v50 = vpop.f32.mrf.mxu0 }
 0x11f   :  { %v4939_v51 = vpop.f32.mrf.mxu1 }
 0x125   :  { %v4963_v12 = vpop.xlane.xlu2 %539 }
 0x126   :  { %v4941_v52 = vpop.f32.mrf.mxu0 }
 0x127   :  { %v4943_v53 = vpop.f32.mrf.mxu1 }
 0x12d   :  { %v4966_v14 = vpop.xlane.xlu1 %541 }
 0x12e   :  { %v411_v54 = vpop.f32.mrf.mxu0 }
 0x12f   :  { %v500_v55 = vpop.f32.mrf.mxu1 }
 0x130   :  { %v4945_v56 = vadd.f32 %v500_v55, %v411_v54 }
 0x132   :  { %7163 = vst [vmem:[#allocation14_spill] sm:$0xff] %v4945_v56  ;;  %571 = vadd.xlane.f32.xlu0 %v4945_v56 }
 0x135   :  { %v4959_v5 = vpop.xlane.xlu0 %543 }
 0x136   :  { %v413_v58 = vpop.f32.mrf.mxu0 }
 0x137   :  { %v502_v59 = vpop.f32.mrf.mxu1 }
 0x138   :  { %v4948_v60 = vadd.f32 %v502_v59, %v413_v58 }
 0x13a   :  { %7164 = vst [vmem:[#allocation15_spill] sm:$0xff] %v4948_v60  ;;  %573 = vadd.xlane.f32.xlu2 %v4948_v60 }
 0x13d   :  { %v4974_v21 = vpop.xlane.xlu2 %545 }
 0x13e   :  { %v416_v62 = vpop.f32.mrf.mxu0 }
 0x13f   :  { %v505_v63 = vpop.f32.mrf.mxu1 }
 0x140   :  { %v4951_v0 = vadd.f32 %v505_v63, %v416_v62 }
 0x142   :  { %7165 = vst [vmem:[#allocation16_spill] sm:$0xff] %v4951_v0  ;;  %575 = vadd.xlane.f32.xlu1 %v4951_v0 }
 0x145   :  { %v4977_v22 = vpop.xlane.xlu1 %547 }
 0x146   :  { %v418_v2 = vpop.f32.mrf.mxu0 }
 0x147   :  { %v507_v3 = vpop.f32.mrf.mxu1 }
 0x148   :  { %v4956_v4 = vadd.f32 %v507_v3, %v418_v2 }
 0x14a   :  { %7166 = vst [vmem:[#allocation17_spill] sm:$0xff] %v4956_v4  ;;  %577 = vadd.xlane.f32.xlu0 %v4956_v4 }
 0x14d   :  { %v4968_v15 = vpop.xlane.xlu0 %549  ;;  %v4988_v33 = vpop.xlane.xlu1 %643 }
 0x14e   :  { %v421_v6 = vpop.f32.mrf.mxu0 }
 0x14f   :  { %v510_v9 = vpop.f32.mrf.mxu1 }
 0x150   :  { %v4961_v10 = vadd.f32 %v510_v9, %v421_v6 }
 0x152   :  { %7167 = vst [vmem:[#allocation18_spill] sm:$0xff] %v4961_v10  ;;  %579 = vadd.xlane.f32.xlu2 %v4961_v10  ;;  %v621_v19 = vmul.f32 %v4961_v10, %v4961_v10 }
 0x155   :  { %v4983_v29 = vpop.xlane.xlu0 %645 }
 0x156   :  { %v423_v16 = vpop.f32.mrf.mxu0  ;;  %v4985_v31 = vpop.xlane.xlu2 %551 }
 0x157   :  { %v512_v17 = vpop.f32.mrf.mxu1 }
 0x158   :  { %v4970_v18 = vadd.f32 %v512_v17, %v423_v16 }
 0x15a   :  { %7168 = vst [vmem:[#allocation19_spill] sm:$0xff] %v4970_v18  ;;  %675 = vadd.xlane.f32.xlu2 %v621_v19  ;;  %581 = vadd.xlane.f32.xlu1 %v4970_v18  ;;  %v622_v28 = vmul.f32 %v4970_v18, %v4970_v18 }
 0x15d   :  { %v554_v41 = vpop.xlane.xlu1 %553 }
 0x15e   :  { %v426_v24 = vpop.f32.mrf.mxu0  ;;  %v4995_v40 = vpop.xlane.xlu2 %647 }
 0x15f   :  { %v515_v26 = vpop.f32.mrf.mxu1 }
 0x160   :  { %v4979_v27 = vadd.f32 %v515_v26, %v426_v24 }
 0x162   :  { %7169 = vst [vmem:[#allocation20_spill] sm:$0xff] %v4979_v27  ;;  %677 = vadd.xlane.f32.xlu1 %v622_v28  ;;  %583 = vadd.xlane.f32.xlu0 %v4979_v27  ;;  %v623_v38 = vmul.f32 %v4979_v27, %v4979_v27 }
 0x165   :  { %v650_v58 = vpop.xlane.xlu1 %649 }
 0x166   :  { %v428_v34 = vpop.f32.mrf.mxu0  ;;  %v556_v39 = vpop.xlane.xlu0 %555 }
 0x167   :  { %v517_v36 = vpop.f32.mrf.mxu1 }
 0x168   :  { %v4990_v37 = vadd.f32 %v517_v36, %v428_v34 }
 0x16a   :  { %7170 = vst [vmem:[#allocation21_spill] sm:$0xff] %v4990_v37  ;;  %679 = vadd.xlane.f32.xlu0 %v623_v38  ;;  %585 = vadd.xlane.f32.xlu2 %v4990_v37  ;;  %v624_v49 = vmul.f32 %v4990_v37, %v4990_v37 }
 0x16d   :  { %v558_v55 = vpop.xlane.xlu2 %557 }
 0x16e   :  { %v431_v43 = vpop.f32.mrf.mxu0  ;;  %v652_v54 = vpop.xlane.xlu0 %651 }
 0x16f   :  { %v520_v45 = vpop.f32.mrf.mxu1 }
 0x170   :  { %v4997_v46 = vadd.f32 %v520_v45, %v431_v43 }
 0x172   :  { %7171 = vst [vmem:[#allocation22_spill] sm:$0xff] %v4997_v46  ;;  %681 = vadd.xlane.f32.xlu2 %v624_v49  ;;  %587 = vadd.xlane.f32.xlu1 %v4997_v46  ;;  %v625_v63 = vmul.f32 %v4997_v46, %v4997_v46 }
 0x175   :  { %v654_v6 = vpop.xlane.xlu2 %653 }
 0x176   :  { %v433_v62 = vpop.f32.mrf.mxu0  ;;  %v560_v3 = vpop.xlane.xlu0 %559 }
 0x177   :  { %v522_v59 = vpop.f32.mrf.mxu1  ;;  %v656_v9 = vpop.xlane.xlu1 %655 }
 0x178   :  { %v5004_v2 = vadd.f32 %v522_v59, %v433_v62 }
 0x17a   :  { %7172 = vst [vmem:[#allocation23_spill] sm:$0xff] %v5004_v2  ;;  %683 = vadd.xlane.f32.xlu1 %v625_v63  ;;  %589 = vadd.xlane.f32.xlu0 %v5004_v2  ;;  %v626_v24 = vmul.f32 %v5004_v2, %v5004_v2 }
 0x17d   :  { %v562_v43 = vpop.xlane.xlu2 %561 }
 0x17e   :  { %v436_v17 = vpop.f32.mrf.mxu0 }
 0x17f   :  { %v525_v16 = vpop.f32.mrf.mxu1  ;;  %v658_v28 = vpop.xlane.xlu0 %657 }
 0x180   :  { %v5007_v19 = vadd.f32 %v525_v16, %v436_v17 }
 0x182   :  { %7173 = vst [vmem:[#allocation24_spill] sm:$0xff] %v5007_v19  ;;  %685 = vadd.xlane.f32.xlu0 %v626_v24  ;;  %591 = vadd.xlane.f32.xlu1 %v5007_v19  ;;  %v627_v26 = vmul.f32 %v5007_v19, %v5007_v19 }
 0x184   :  { %687 = vadd.xlane.f32.xlu2 %v627_v26  ;;  %v604_v26 = vmul.f32 %v4824_v35, %v4824_v35 }
 0x185   :  { %v564_v34 = vpop.xlane.xlu1 %563 }
 0x186   :  { %v438_v38 = vpop.f32.mrf.mxu0 }
 0x187   :  { %v527_v36 = vpop.f32.mrf.mxu1  ;;  %v660_v17 = vpop.xlane.xlu2 %659 }
 0x188   :  { %v5014_v45 = vadd.f32 %v527_v36, %v438_v38 }
 0x18a   :  { %7174 = vst [vmem:[#allocation25_spill] sm:$0xff] %v5014_v45  ;;  %v628_v49 = vmul.f32 %v5014_v45, %v5014_v45 }
 0x18c   :  { %593 = vadd.xlane.f32.xlu2 %v5014_v45  ;;  %689 = vadd.xlane.f32.xlu1 %v628_v49 }
 0x18d   :  { %v566_v59 = vpop.xlane.xlu0 %565 }
 0x18e   :  { %759 = vmatpush.msra.mxu2 %v566_v59  ;;  %v441_v16 = vpop.f32.mrf.mxu0 }
 0x18f   :  { %v530_v62 = vpop.f32.mrf.mxu1  ;;  %v662_v63 = vpop.xlane.xlu1 %661 }
 0x190   :  { %760 = vmatpush.msra.mxu2 %v564_v34  ;;  %985 = vmatpush.msrb.mxu0 %v662_v63  ;;  %v5019_v24 = vadd.f32 %v530_v62, %v441_v16 }
 0x192   :  { %7175 = vst [vmem:[#allocation26_spill] sm:$0xff] %v5019_v24  ;;  %761 = vmatpush.msra.mxu2 %v562_v43  ;;  %986 = vmatpush.msrb.mxu0 %v660_v17  ;;  %v629_v36 = vmul.f32 %v5019_v24, %v5019_v24  ;;  %v5030_v43 = vadd.f32 %v4943_v53, %v4941_v52 }
 0x193   :  { %v5045_v52 = vadd.f32 %v4939_v51, %v4937_v50  ;;  %v620_v53 = vmul.f32 %v4956_v4, %v4956_v4  ;;  %v619_v50 = vmul.f32 %v4951_v0, %v4951_v0  ;;  %v603_v51 = vmul.f32 %v4821_v32, %v4821_v32 }
 0x194   :  { %762 = vmatpush.msra.mxu2 %v560_v3  ;;  %987 = vmatpush.msrb.mxu0 %v658_v28  ;;  %7177 = vst [vmem:[#allocation28_spill] sm:$0xff] %v5030_v43 }
 0x195   :  { %641 = vadd.xlane.f32.xlu2 %v604_v26  ;;  %595 = vadd.xlane.f32.xlu1 %v5019_v24  ;;  %7178 = vst [vmem:[#allocation29_spill] sm:$0xff] %v5045_v52 }
 0x196   :  { %691 = vadd.xlane.f32.xlu0 %v629_v36  ;;  %763 = vmatpush.msra.mxu2 %v558_v55  ;;  %v443_v38 = vpop.f32.mrf.mxu0 }
 0x197   :  { %988 = vmatpush.msrb.mxu0 %v656_v9  ;;  %v532_v34 = vpop.f32.mrf.mxu1 }
 0x198   :  { %764 = vmatpush.msra.mxu2 %v556_v39  ;;  %v5026_v49 = vadd.f32 %v532_v34, %v443_v38 }
 0x199   :  { %989 = vmatpush.msrb.mxu0 %v654_v6 }
 0x19a   :  { %7176 = vst [vmem:[#allocation27_spill] sm:$0xff] %v5026_v49  ;;  %765 = vmatpush.msra.mxu2 %v554_v41  ;;  %v630_v3 = vmul.f32 %v5026_v49, %v5026_v49 }
 0x19b   :  { %990 = vmatpush.msrb.mxu0 %v652_v54 }
 0x19c   :  { %766 = vmatpush.msra.mxu2 %v4985_v31 }
 0x19d   :  { %991 = vmatpush.msrb.mxu0 %v650_v58  ;;  %569 = vadd.xlane.f32.xlu1 %v5030_v43 }
 0x19e   :  { %597 = vadd.xlane.f32.xlu0 %v5026_v49  ;;  %693 = vadd.xlane.f32.xlu2 %v630_v3 }
 0x19f   :  { %767 = vmatpush.msra.mxu2 %v4968_v15  ;;  %992 = vmatpush.msrb.mxu0 %v4995_v40  ;;  %v601_v15 = vmul.f32 %v4803_v20, %v4803_v20 }
 0x1a1   :  { %768 = vmatpush.msra.mxu2 %v4977_v22  ;;  %993 = vmatpush.msrb.mxu0 %v4983_v29  ;;  %v599_v22 = vmul.f32 %v4786_v8, %v4786_v8  ;;  %v615_v29 = vmul.f32 %v5045_v52, %v5045_v52 }
 0x1a3   :  { %769 = vmatpush.msra.mxu2 %v4974_v21  ;;  %994 = vmatpush.msrb.mxu0 %v4988_v33  ;;  %v600_v21 = vmul.f32 %v4788_v11, %v4788_v11 }
 0x1a5   :  { %770 = vmatpush.msra.mxu2 %v4959_v5  ;;  %535 = vadd.xlane.f32.xlu1 %v4786_v8  ;;  %v602_v5 = vmul.f32 %v4806_v23, %v4806_v23  ;;  %v5077_v41 = vpop.xlane.xlu0 %571 }
 0x1a6   :  { %673 = vadd.xlane.f32.xlu0 %v620_v53  ;;  %567 = vadd.xlane.f32.xlu2 %v5045_v52 }
 0x1a7   :  { %771 = vmatpush.msra.mxu2 %v4966_v14  ;;  %v616_v14 = vmul.f32 %v5030_v43, %v5030_v43 }
 0x1a9   :  { %772 = vmatpush.msra.mxu2 %v4963_v12  ;;  %v618_v12 = vmul.f32 %v4948_v60, %v4948_v60 }
 0x1ab   :  { %773 = vmatpush.msra.mxu2 %v4954_v1  ;;  %v617_v1 = vmul.f32 %v4945_v56, %v4945_v56 }
 0x1ad   :  { %671 = vadd.xlane.f32.xlu1 %v619_v50  ;;  %v5075_v33 = vpop.xlane.xlu2 %573 }
 0x1ae   :  { %639 = vadd.xlane.f32.xlu0 %v603_v51  ;;  %637 = vadd.xlane.f32.xlu2 %v602_v5 }
 0x1b5   :  { %635 = vadd.xlane.f32.xlu1 %v601_v15  ;;  %v576_v31 = vpop.xlane.xlu1 %575 }
 0x1b6   :  { %669 = vadd.xlane.f32.xlu0 %v618_v12  ;;  %667 = vadd.xlane.f32.xlu2 %v617_v1  ;;  %v695_v1 = vld [vmem:[%s7107_s5] sm:$0xff] }
 0x1bd   :  { %665 = vadd.xlane.f32.xlu1 %v616_v14  ;;  %v578_v54 = vpop.xlane.xlu0 %577 }
 0x1be   :  { %633 = vadd.xlane.f32.xlu0 %v600_v21  ;;  %631 = vadd.xlane.f32.xlu2 %v599_v22 }
 0x1c5   :  { %v580_v40 = vpop.xlane.xlu2 %579 }
 0x1c6   :  { %663 = vadd.xlane.f32.xlu0 %v615_v29  ;;  %v697_v29 = vld [vmem:[%s7107_s5 + $0x10] sm:$0xff] }
 0x1cd   :  { %v582_v39 = vpop.xlane.xlu1 %581  ;;  %v676_v58 = vpop.xlane.xlu2 %675 }
 0x1d5   :  { %v678_v55 = vpop.xlane.xlu1 %677  ;;  %v584_v6 = vpop.xlane.xlu0 %583 }
 0x1dd   :  { %v586_v28 = vpop.xlane.xlu2 %585  ;;  %v680_v62 = vpop.xlane.xlu0 %679 }
 0x1e5   :  { %v588_v9 = vpop.xlane.xlu1 %587  ;;  %v682_v63 = vpop.xlane.xlu2 %681 }
 0x1ed   :  { %v684_v59 = vpop.xlane.xlu1 %683  ;;  %v590_v16 = vpop.xlane.xlu0 %589 }
 0x1f5   :  { %v592_v17 = vpop.xlane.xlu1 %591  ;;  %v686_v38 = vpop.xlane.xlu0 %685 }
 0x1f7   :  { %v688_v26 = vpop.xlane.xlu2 %687 }
 0x1ff   :  { %v594_v36 = vpop.xlane.xlu2 %593  ;;  %v690_v34 = vpop.xlane.xlu1 %689 }
 0x208   :  { %v642_v3 = vpop.xlane.xlu2 %641  ;;  %v596_v53 = vpop.xlane.xlu1 %595 }
 0x209   :  { %v692_v50 = vpop.xlane.xlu0 %691  ;;  %995 = vmatpush.msrb.mxu0 %v642_v3  ;;  %v706_v3 = vld [vmem:[%s7107_s5 + $0x58] sm:$0xff] }
 0x210   :  { %v570_v51 = vpop.xlane.xlu1 %569 }
 0x211   :  { %v598_v5 = vpop.xlane.xlu0 %597  ;;  %v694_v15 = vpop.xlane.xlu2 %693 }
 0x212   :  { %872 = vmatpush.msra.mxu3 %v598_v5  ;;  %1098 = vmatpush.msrb.mxu1 %v694_v15  ;;  %v710_v5 = vld [vmem:[%s7107_s5 + $0x78] sm:$0xff]  ;;  %v715_v15 = vld [vmem:[%s7107_s5 + $0xa0] sm:$0xff] }
 0x214   :  { %873 = vmatpush.msra.mxu3 %v596_v53  ;;  %1099 = vmatpush.msrb.mxu1 %v692_v50  ;;  %v711_v53 = vld [vmem:[%s7107_s5 + $0x80] sm:$0xff]  ;;  %v708_v50 = vld [vmem:[%s7107_s5 + $0x68] sm:$0xff] }
 0x216   :  { %874 = vmatpush.msra.mxu3 %v594_v36  ;;  %1100 = vmatpush.msrb.mxu1 %v690_v34  ;;  %v707_v36 = vld [vmem:[%s7107_s5 + $0x60] sm:$0xff]  ;;  %v704_v34 = vld [vmem:[%s7107_s5 + $0x48] sm:$0xff] }
 0x218   :  { %875 = vmatpush.msra.mxu3 %v592_v17  ;;  %1101 = vmatpush.msrb.mxu1 %v688_v26  ;;  %v536_v12 = vpop.xlane.xlu1 %535 }
 0x219   :  { %v674_v14 = vpop.xlane.xlu0 %673  ;;  %v568_v21 = vpop.xlane.xlu2 %567  ;;  %774 = vmatpush.msra.mxu2 %v536_v12  ;;  %v712_v12 = vld [vmem:[%s7107_s5 + $0x88] sm:$0xff] }
 0x21a   :  { %876 = vmatpush.msra.mxu3 %v590_v16  ;;  %1102 = vmatpush.msrb.mxu1 %v686_v38  ;;  %v702_v16 = vld [vmem:[%s7107_s5 + $0x38] sm:$0xff]  ;;  %v709_v38 = vld [vmem:[%s7107_s5 + $0x70] sm:$0xff] }
 0x21b   :  { %775 = vmatmul.f32.vlgmr.msra.gmra.mxu2 %v695_v1 }
 0x21c   :  { %877 = vmatpush.msra.mxu3 %v588_v9  ;;  %1103 = vmatpush.msrb.mxu1 %v684_v59 }
 0x21e   :  { %878 = vmatpush.msra.mxu3 %v586_v28  ;;  %1104 = vmatpush.msrb.mxu1 %v682_v63  ;;  %v705_v63 = vld [vmem:[%s7107_s5 + $0x50] sm:$0xff] }
 0x220   :  { %879 = vmatpush.msra.mxu3 %v584_v6  ;;  %1105 = vmatpush.msrb.mxu1 %v680_v62  ;;  %v672_v22 = vpop.xlane.xlu1 %671  ;;  %v699_v6 = vld [vmem:[%s7107_s5 + $0x20] sm:$0xff]  ;;  %v700_v62 = vld [vmem:[%s7107_s5 + $0x28] sm:$0xff] }
 0x221   :  { %v640_v17 = vpop.xlane.xlu0 %639  ;;  %v638_v26 = vpop.xlane.xlu2 %637 }
 0x222   :  { %880 = vmatpush.msra.mxu3 %v582_v39  ;;  %996 = vmatpush.msrb.mxu0 %v640_v17  ;;  %v718_v17 = vld [vmem:[%s7107_s5 + $0xb8] sm:$0xff] }
 0x223   :  { %1106 = vmatpush.msrb.mxu1 %v678_v55  ;;  %778 = vmatmul.f32.gmra.mxu2 %v697_v29  ;;  %v703_v55 = vld [vmem:[%s7107_s5 + $0x40] sm:$0xff] }
 0x224   :  { %881 = vmatpush.msra.mxu3 %v580_v40  ;;  %997 = vmatpush.msrb.mxu0 %v638_v26  ;;  %v701_v40 = vld [vmem:[%s7107_s5 + $0x30] sm:$0xff]  ;;  %v723_v26 = vld [vmem:[%s7107_s5 + $0xe0] sm:$0xff] }
 0x225   :  { %1107 = vmatpush.msrb.mxu1 %v676_v58 }
 0x226   :  { %882 = vmatpush.msra.mxu3 %v578_v54 }
 0x227   :  { %1108 = vmatpush.msrb.mxu1 %v674_v14  ;;  %v714_v14 = vld [vmem:[%s7107_s5 + $0x98] sm:$0xff] }
 0x228   :  { %883 = vmatpush.msra.mxu3 %v576_v31  ;;  %v636_v9 = vpop.xlane.xlu1 %635  ;;  %v696_v31 = vld [vmem:[%s7107_s5 + $0x8] sm:$0xff] }
 0x229   :  { %1109 = vmatpush.msrb.mxu1 %v672_v22  ;;  %v670_v28 = vpop.xlane.xlu0 %669  ;;  %v668_v59 = vpop.xlane.xlu2 %667  ;;  %998 = vmatpush.msrb.mxu0 %v636_v9  ;;  %v716_v22 = vld [vmem:[%s7107_s5 + $0xa8] sm:$0xff] }
 0x22a   :  { %884 = vmatpush.msra.mxu3 %v5075_v33  ;;  %v720_v9 = vld [vmem:[%s7107_s5 + $0xc8] sm:$0xff] }
 0x22b   :  { %1110 = vmatpush.msrb.mxu1 %v670_v28  ;;  %781 = vmatmul.f32.gmra.mxu2 %v699_v6  ;;  %v722_v28 = vld [vmem:[%s7107_s5 + $0xd8] sm:$0xff] }
 0x22c   :  { %885 = vmatpush.msra.mxu3 %v5077_v41  ;;  %v698_v41 = vld [vmem:[%s7107_s5 + $0x18] sm:$0xff] }
 0x22d   :  { %1111 = vmatpush.msrb.mxu1 %v668_v59  ;;  %v727_v59 = vld [vmem:[%s7107_s5 + $0x100] sm:$0xff] }
 0x22e   :  { %886 = vmatpush.msra.mxu3 %v570_v51  ;;  %v713_v51 = vld [vmem:[%s7107_s5 + $0x90] sm:$0xff] }
 0x230   :  { %887 = vmatpush.msra.mxu3 %v568_v21  ;;  %v666_v39 = vpop.xlane.xlu1 %665  ;;  %v719_v21 = vld [vmem:[%s7107_s5 + $0xc0] sm:$0xff] }
 0x231   :  { %v634_v54 = vpop.xlane.xlu0 %633  ;;  %1112 = vmatpush.msrb.mxu1 %v666_v39  ;;  %888 = vmatmul.f32.vlgmr.msra.gmra.mxu3 %v696_v31  ;;  %v632_v33 = vpop.xlane.xlu2 %631 }
 0x232   :  { %999 = vmatpush.msrb.mxu0 %v634_v54  ;;  %v726_v54 = vld [vmem:[%s7107_s5 + $0xf8] sm:$0xff] }
 0x233   :  { %784 = vmatmul.f32.gmra.mxu2 %v701_v40 }
 0x234   :  { %1000 = vmatpush.msrb.mxu0 %v632_v33 }
 0x235   :  { %1001 = vmatmul.f32.vlgmr.msrb.gmra.mxu0 %v695_v1  ;;  %v717_v1 = vld [vmem:[%s7107_s5 + $0xb0] sm:$0xff] }
 0x239   :  { %v664_v58 = vpop.xlane.xlu0 %663  ;;  %891 = vmatmul.f32.gmra.mxu3 %v698_v41 }
 0x23a   :  { %1113 = vmatpush.msrb.mxu1 %v664_v58 }
 0x23b   :  { %1114 = vmatmul.f32.vlgmr.msrb.gmra.mxu1 %v696_v31  ;;  %787 = vmatmul.f32.gmra.mxu2 %v703_v55  ;;  %v724_v31 = vld [vmem:[%s7107_s5 + $0xe8] sm:$0xff] }
 0x23d   :  { %1004 = vmatmul.f32.gmra.mxu0 %v697_v29  ;;  %v721_v29 = vld [vmem:[%s7107_s5 + $0xd0] sm:$0xff] }
 0x241   :  { %894 = vmatmul.f32.gmra.mxu3 %v700_v62 }
 0x243   :  { %1117 = vmatmul.f32.gmra.mxu1 %v698_v41  ;;  %790 = vmatmul.f32.gmra.mxu2 %v705_v63  ;;  %v731_v41 = vld [vmem:[%s7107_s5 + $0x120] sm:$0xff] }
 0x245   :  { %1007 = vmatmul.f32.gmra.mxu0 %v699_v6  ;;  %v725_v6 = vld [vmem:[%s7107_s5 + $0xf0] sm:$0xff] }
 0x249   :  { %897 = vmatmul.f32.gmra.mxu3 %v702_v16 }
 0x24b   :  { %1120 = vmatmul.f32.gmra.mxu1 %v700_v62  ;;  %793 = vmatmul.f32.gmra.mxu2 %v707_v36  ;;  %v733_v62 = vld [vmem:[%s7107_s5 + $0x130] sm:$0xff] }
 0x24d   :  { %1010 = vmatmul.f32.gmra.mxu0 %v701_v40  ;;  %v729_v40 = vld [vmem:[%s7107_s5 + $0x110] sm:$0xff] }
 0x251   :  { %900 = vmatmul.f32.gmra.mxu3 %v704_v34 }
 0x253   :  { %1123 = vmatmul.f32.gmra.mxu1 %v702_v16  ;;  %796 = vmatmul.f32.gmra.mxu2 %v709_v38 }
 0x255   :  { %1013 = vmatmul.f32.gmra.mxu0 %v703_v55  ;;  %v728_v55 = vld [vmem:[%s7107_s5 + $0x108] sm:$0xff] }
 0x259   :  { %903 = vmatmul.f32.gmra.mxu3 %v706_v3 }
 0x25b   :  { %1126 = vmatmul.f32.gmra.mxu1 %v704_v34  ;;  %799 = vmatmul.f32.gmra.mxu2 %v711_v53  ;;  %v730_v34 = vld [vmem:[%s7107_s5 + $0x118] sm:$0xff] }
 0x25d   :  { %1016 = vmatmul.f32.gmra.mxu0 %v705_v63 }
 0x261   :  { %906 = vmatmul.f32.gmra.mxu3 %v708_v50 }
 0x263   :  { %1129 = vmatmul.f32.gmra.mxu1 %v706_v3  ;;  %802 = vmatmul.f32.gmra.mxu2 %v713_v51 }
 0x265   :  { %1019 = vmatmul.f32.gmra.mxu0 %v707_v36 }
 0x269   :  { %909 = vmatmul.f32.gmra.mxu3 %v710_v5 }
 0x26b   :  { %1132 = vmatmul.f32.gmra.mxu1 %v708_v50  ;;  %805 = vmatmul.f32.gmra.mxu2 %v715_v15  ;;  %v5202_v50 = vld [vmem:[%s7107_s5 + $0x140] sm:$0xff] }
 0x26d   :  { %1022 = vmatmul.f32.gmra.mxu0 %v709_v38 }
 0x271   :  { %912 = vmatmul.f32.gmra.mxu3 %v712_v12 }
 0x273   :  { %1135 = vmatmul.f32.gmra.mxu1 %v710_v5  ;;  %808 = vmatmul.f32.gmra.mxu2 %v717_v1 }
 0x275   :  { %1025 = vmatmul.f32.gmra.mxu0 %v711_v53 }
 0x279   :  { %915 = vmatmul.f32.gmra.mxu3 %v714_v14 }
 0x27b   :  { %1138 = vmatmul.f32.gmra.mxu1 %v712_v12  ;;  %811 = vmatmul.f32.gmra.mxu2 %v719_v21 }
 0x27d   :  { %1028 = vmatmul.f32.gmra.mxu0 %v713_v51 }
 0x281   :  { %918 = vmatmul.f32.gmra.mxu3 %v716_v22 }
 0x283   :  { %1141 = vmatmul.f32.gmra.mxu1 %v714_v14  ;;  %814 = vmatmul.f32.gmra.mxu2 %v721_v29 }
 0x285   :  { %1031 = vmatmul.f32.gmra.mxu0 %v715_v15 }
 0x289   :  { %921 = vmatmul.f32.gmra.mxu3 %v718_v17 }
 0x28b   :  { %1144 = vmatmul.f32.gmra.mxu1 %v716_v22  ;;  %817 = vmatmul.f32.gmra.mxu2 %v723_v26 }
 0x28d   :  { %1034 = vmatmul.f32.gmra.mxu0 %v717_v1 }
 0x291   :  { %924 = vmatmul.f32.gmra.mxu3 %v720_v9 }
 0x293   :  { %1147 = vmatmul.f32.gmra.mxu1 %v718_v17  ;;  %820 = vmatmul.f32.gmra.mxu2 %v725_v6 }
 0x295   :  { %1037 = vmatmul.f32.gmra.mxu0 %v719_v21  ;;  %v732_v21 = vld [vmem:[%s7107_s5 + $0x128] sm:$0xff] }
 0x299   :  { %927 = vmatmul.f32.gmra.mxu3 %v722_v28 }
 0x29b   :  { %1150 = vmatmul.f32.gmra.mxu1 %v720_v9  ;;  %823 = vmatmul.f32.gmra.mxu2 %v727_v59  ;;  %v5217_v9 = vld [vmem:[%s7107_s5 + $0x150] sm:$0xff] }
 0x29d   :  { %1040 = vmatmul.f32.gmra.mxu0 %v721_v29 }
 0x29e   :  { %v776_v39 = vpop.f32.mrf.mxu2 }
 0x2a1   :  { %930 = vmatmul.f32.gmra.mxu3 %v724_v31 }
 0x2a3   :  { %1153 = vmatmul.f32.gmra.mxu1 %v722_v28  ;;  %826 = vmatmul.f32.gmra.mxu2 %v729_v40 }
 0x2a5   :  { %1043 = vmatmul.f32.gmra.mxu0 %v723_v26 }
 0x2a6   :  { %v779_v33 = vpop.f32.mrf.mxu2 }
 0x2a9   :  { %933 = vmatmul.f32.gmra.mxu3 %v726_v54 }
 0x2ab   :  { %1156 = vmatmul.f32.gmra.mxu1 %v724_v31  ;;  %829 = vmatmul.f32.gmra.mxu2 %v731_v41 }
 0x2ad   :  { %1046 = vmatmul.f32.gmra.mxu0 %v725_v6 }
 0x2ae   :  { %v782_v58 = vpop.f32.mrf.mxu2 }
 0x2b1   :  { %936 = vmatmul.f32.gmra.mxu3 %v728_v55 }
 0x2b2   :  { %v1002_v63 = vpop.f32.mrf.mxu0 }
 0x2b3   :  { %1159 = vmatmul.f32.gmra.mxu1 %v726_v54  ;;  %832 = vmatmul.f32.gmra.mxu2 %v733_v62  ;;  %v734_v54 = vld [vmem:[%s7107_s5 + $0x138] sm:$0xff] }
 0x2b4   :  { %v889_v16 = vpop.f32.mrf.mxu3 }
 0x2b5   :  { %v5192_v36 = vadd.f32 %v889_v16, %v776_v39  ;;  %1049 = vmatmul.f32.gmra.mxu0 %v727_v59 }
 0x2b6   :  { %v785_v38 = vpop.f32.mrf.mxu2 }
 0x2b7   :  { %v1211_v3 = vmul.f32 %v5192_v36, %v5192_v36 }
 0x2b8   :  { %v1115_v53 = vpop.f32.mrf.mxu1 }
 0x2b9   :  { %v1116_v51 = vadd.f32 %v1115_v53, %v1002_v63  ;;  %939 = vmatmul.f32.gmra.mxu3 %v730_v34 }
 0x2ba   :  { %v1005_v5 = vpop.f32.mrf.mxu0 }
 0x2bb   :  { %v1243_v15 = vsub.f32 %v1116_v51, %v1211_v3  ;;  %1162 = vmatmul.f32.gmra.mxu1 %v728_v55  ;;  %835 = vmatmul.f32.gmra.mxu2 %v5202_v50 }
 0x2bc   :  { %v892_v12 = vpop.f32.mrf.mxu3 }
 0x2bd   :  { %v1275_v1 = vmax.f32 %v1243_v15, 0.0  ;;  %v5205_v14 = vadd.f32 %v892_v12, %v779_v33  ;;  %1052 = vmatmul.f32.gmra.mxu0 %v729_v40 }
 0x2be   :  { %v5210_v22 = vpop.f32.mrf.mxu2 }
 0x2bf   :  { %v1339_v29 = vadd.f32 1e-05, %v1275_v1  ;;  %v1212_v17 = vmul.f32 %v5205_v14, %v5205_v14 }
 0x2c0   :  { %v1118_v26 = vpop.f32.mrf.mxu1 }
 0x2c1   :  { %4448 = vrsqrt.f32 %v1339_v29  ;;  %v1119_v6 = vadd.f32 %v1118_v26, %v1005_v5  ;;  %942 = vmatmul.f32.gmra.mxu3 %v732_v21  ;;  %vm1377_vm1 = vweird.f32 %v1339_v29 }
 0x2c2   :  { %v1008_v28 = vpop.f32.mrf.mxu0 }
 0x2c3   :  { %v1244_v59 = vsub.f32 %v1119_v6, %v1212_v17  ;;  %1165 = vmatmul.f32.gmra.mxu1 %v730_v34  ;;  %838 = vmatmul.f32.gmra.mxu2 %v5217_v9  ;;  %v736_v6 = vld [vmem:[%s7107_s5 + $0x148] sm:$0xff] }
 0x2c4   :  { %v895_v31 = vpop.f32.mrf.mxu3 }
 0x2c5   :  { %v1276_v39 = vmax.f32 %v1244_v59, 0.0  ;;  %v5220_v40 = vadd.f32 %v895_v31, %v782_v58  ;;  %1055 = vmatmul.f32.gmra.mxu0 %v731_v41  ;;  %v5234_v58 = vld [vmem:[%s7107_s5 + $0x160] sm:$0xff] }
 0x2c6   :  { %v5225_v33 = vpop.f32.mrf.mxu2 }
 0x2c7   :  { %v4449_v55 = vpop.eup %4448  ;;  %v5227_v63 = vadd.f32 1e-05, %v1276_v39  ;;  %v1213_v16 = vmul.f32 %v5220_v40, %v5220_v40 }
 0x2c8   :  { %v1372_v34 = vmul.f32 %v4449_v55, %v1339_v29  ;;  %v1121_v3 = vpop.f32.mrf.mxu1  ;;  %vm1378_vm0 = vweird.f32 %v4449_v55 }
 0x2c9   :  { %4450 = vrsqrt.f32 %v5227_v63  ;;  %v1122_v41 = vadd.f32 %v1121_v3, %v1008_v28  ;;  %945 = vmatmul.f32.gmra.mxu3 %v734_v54  ;;  %vm1379_vm2 = vmor %vm1377_vm1, %vm1378_vm0  ;;  %vm1387_vm4 = vweird.f32 %v5227_v63 }
 0x2ca   :  { %v1373_v53 = vmul.f32 %v4449_v55, %v1372_v34  ;;  %v1011_v51 = vpop.f32.mrf.mxu0  ;;  %v5256_v34 = vld [vmem:[%s7107_s5 + $0x170] sm:$0xff] }
 0x2cb   :  { %v1245_v5 = vsub.f32 %v1122_v41, %v1213_v16  ;;  %1168 = vmatmul.f32.gmra.mxu1 %v732_v21  ;;  %841 = vmatmul.f32.gmra.mxu2 %v5234_v58 }
 0x2cc   :  { %v1374_v15 = vmul.f32 0.5, %v1373_v53  ;;  %v898_v12 = vpop.f32.mrf.mxu3 }
 0x2cd   :  { %v1277_v1 = vmax.f32 %v1245_v5, 0.0  ;;  %v5238_v17 = vadd.f32 %v898_v12, %v785_v38  ;;  %1058 = vmatmul.f32.gmra.mxu0 %v733_v62  ;;  %v1307_v62 = vld [vmem:[%s7108_s8] sm:$0xff] }
 0x2ce   :  { %v1375_v26 = vsub.f32 1.5, %v1374_v15  ;;  %v5243_v28 = vpop.f32.mrf.mxu2 }
 0x2cf   :  { %v4451_v59 = vpop.eup %4450  ;;  %v5245_v31 = vadd.f32 1e-05, %v1277_v1  ;;  %v1214_v21 = vmul.f32 %v5238_v17, %v5238_v17 }
 0x2d0   :  { %v1382_v39 = vmul.f32 %v4451_v59, %v5227_v63  ;;  %v1124_v38 = vpop.f32.mrf.mxu1  ;;  %v1376_v16 = vmul.f32 %v4449_v55, %v1375_v26  ;;  %vm1388_vm3 = vweird.f32 %v4451_v59 }
 0x2d1   :  { %4452 = vrsqrt.f32 %v5245_v31  ;;  %v1125_v3 = vadd.f32 %v1124_v38, %v1011_v51  ;;  %948 = vmatmul.f32.gmra.mxu3 %v736_v6  ;;  %vm1389_vm5 = vmor %vm1387_vm4, %vm1388_vm3  ;;  %vm1397_vm7 = vweird.f32 %v5245_v31 }
 0x2d2   :  { %v1383_v41 = vmul.f32 %v4451_v59, %v1382_v39  ;;  %v1380_v29 = vsel %vm1379_vm2, %v4449_v55, %v1376_v16  ;;  %v1014_v53 = vpop.f32.mrf.mxu0  ;;  %v7117_v39 = vmov 0   ;;  %v1308_v16 = vld [vmem:[%s7108_s8 + $0x8] sm:$0xff] }
 0x2d3   :  { %v1246_v5 = vsub.f32 %v1125_v3, %v1214_v21  ;;  %1171 = vmatmul.f32.gmra.mxu1 %v734_v54  ;;  %v5259_v15 = vmul.f32 %v1380_v29, %v1307_v62  ;;  %844 = vmatmul.f32.gmra.mxu2 %v5256_v34  ;;  %v738_v54 = vld [vmem:[%s7107_s5 + $0x158] sm:$0xff] }
 0x2d4   :  { %v1384_v12 = vmul.f32 0.5, %v1383_v41  ;;  %v901_v1 = vpop.f32.mrf.mxu3  ;;  %4398 = vset.pattern.permute.xlu2 %v7117_v39  ;;  %4399 = vset.pattern.permute.xlu1 %v7117_v39  ;;  %v5289_v41 = vld [vmem:[%s7107_s5 + $0x180] sm:$0xff] }
 0x2d5   :  { %v1278_v26 = vmax.f32 %v1246_v5, 0.0  ;;  %v5263_v43 = vadd.f32 %v901_v1, %v5210_v22  ;;  %v1723_v51 = vmul.f32 %v5259_v15, %v5192_v36  ;;  %1061 = vmatmul.f32.gmra.mxu0 %v5202_v50  ;;  %4400 = vset.pattern.permute.xlu0 %v7117_v39 }
 0x2d6   :  { %v1385_v55 = vsub.f32 1.5, %v1384_v12  ;;  %v5272_v21 = vpop.f32.mrf.mxu2 }
 0x2d7   :  { %v4453_v22 = vpop.eup %4452  ;;  %v5276_v38 = vadd.f32 1e-05, %v1278_v26  ;;  %v1215_v36 = vmul.f32 %v5263_v43, %v5263_v43  ;;  %1787 = vrot.lane.b32.xlu1 %v1723_v51, %s4572_s12 }
 0x2d8   :  { %v1392_v50 = vmul.f32 %v4453_v22, %v5245_v31  ;;  %v1127_v62 = vpop.f32.mrf.mxu1  ;;  %v1386_v3 = vmul.f32 %v4451_v59, %v1385_v55  ;;  %vm1398_vm6 = vweird.f32 %v4453_v22 }
 0x2d9   :  { %4454 = vrsqrt.f32 %v5276_v38  ;;  %v1128_v29 = vadd.f32 %v1127_v62, %v1014_v53  ;;  %951 = vmatmul.f32.gmra.mxu3 %v738_v54  ;;  %vm1399_vm8 = vmor %vm1397_vm7, %vm1398_vm6  ;;  %vm1407_vm10 = vweird.f32 %v5276_v38 }
 0x2da   :  { %v1393_v63 = vmul.f32 %v4453_v22, %v1392_v50  ;;  %v1390_v5 = vsel %vm1389_vm5, %v4451_v59, %v1386_v3  ;;  %v1017_v12 = vpop.f32.mrf.mxu0 }
 0x2db   :  { %v1247_v1 = vsub.f32 %v1128_v29, %v1215_v36  ;;  %1174 = vmatmul.f32.gmra.mxu1 %v736_v6  ;;  %v5293_v26 = vmul.f32 %v1390_v5, %v1308_v16  ;;  %847 = vmatmul.f32.gmra.mxu2 %v5289_v41  ;;  %v740_v6 = vld [vmem:[%s7107_s5 + $0x168] sm:$0xff]  ;;  %v1309_v16 = vld [vmem:[%s7108_s8 + $0x10] sm:$0xff] }
 0x2dc   :  { %v1394_v51 = vmul.f32 0.5, %v1393_v63  ;;  %v904_v55 = vpop.f32.mrf.mxu3 }
 0x2dd   :  { %v1279_v39 = vmax.f32 %v1247_v1, 0.0  ;;  %v5297_v52 = vadd.f32 %v904_v55, %v5225_v33  ;;  %v1724_v53 = vmul.f32 %v5293_v26, %v5205_v14  ;;  %1064 = vmatmul.f32.gmra.mxu0 %v5217_v9 }
 0x2de   :  { %v1395_v50 = vsub.f32 1.5, %v1394_v51  ;;  %v5305_v59 = vpop.f32.mrf.mxu2 }
 0x2df   :  { %v4455_v36 = vpop.eup %4454  ;;  %v5307_v62 = vadd.f32 1e-05, %v1279_v39  ;;  %v1216_v33 = vmul.f32 %v5297_v52, %v5297_v52  ;;  %1789 = vrot.lane.b32.xlu0 %v1724_v53, %s4572_s12  ;;  %v5320_v39 = vld [vmem:[%s7107_s5 + $0x190] sm:$0xff] }
 0x2e0   :  { %v1402_v14 = vmul.f32 %v4455_v36, %v5276_v38  ;;  %v1130_v9 = vpop.f32.mrf.mxu1  ;;  %v1396_v3 = vmul.f32 %v4453_v22, %v1395_v50  ;;  %vm1408_vm9 = vweird.f32 %v4455_v36 }
 0x2e1   :  { %4456 = vrsqrt.f32 %v5307_v62  ;;  %v1131_v29 = vadd.f32 %v1130_v9, %v1017_v12  ;;  %954 = vmatmul.f32.gmra.mxu3 %v740_v6  ;;  %vm1409_vm11 = vmor %vm1407_vm10, %vm1408_vm9  ;;  %vm1417_vm13 = vweird.f32 %v5307_v62 }
 0x2e2   :  { %v1403_v31 = vmul.f32 %v4455_v36, %v1402_v14  ;;  %v1400_v63 = vsel %vm1399_vm8, %v4453_v22, %v1396_v3  ;;  %v1020_v5 = vpop.f32.mrf.mxu0 }
 0x2e3   :  { %v1248_v1 = vsub.f32 %v1131_v29, %v1216_v33  ;;  %1177 = vmatmul.f32.gmra.mxu1 %v738_v54  ;;  %v5324_v51 = vmul.f32 %v1400_v63, %v1309_v16  ;;  %850 = vmatmul.f32.gmra.mxu2 %v5320_v39  ;;  %v742_v54 = vld [vmem:[%s7107_s5 + $0x178] sm:$0xff]  ;;  %v5351_v29 = vld [vmem:[%s7107_s5 + $0x1a0] sm:$0xff] }
 0x2e4   :  { %v1404_v55 = vmul.f32 0.5, %v1403_v31  ;;  %v907_v53 = vpop.f32.mrf.mxu3  ;;  %v1310_v16 = vld [vmem:[%s7108_s8 + $0x18] sm:$0xff] }
 0x2e5   :  { %v1280_v50 = vmax.f32 %v1248_v1, 0.0  ;;  %v5328_v60 = vadd.f32 %v907_v53, %v5243_v28  ;;  %v1725_v12 = vmul.f32 %v5324_v51, %v5220_v40  ;;  %1067 = vmatmul.f32.gmra.mxu0 %v5234_v58 }
 0x2e6   :  { %v1405_v14 = vsub.f32 1.5, %v1404_v55  ;;  %v5336_v22 = vpop.f32.mrf.mxu2 }
 0x2e7   :  { %v4457_v33 = vpop.eup %4456  ;;  %v5338_v9 = vadd.f32 1e-05, %v1280_v50  ;;  %v1217_v28 = vmul.f32 %v5328_v60, %v5328_v60  ;;  %1791 = vrot.lane.b32.xlu2 %v1725_v12, %s4572_s12 }
 0x2e8   :  { %v1412_v40 = vmul.f32 %v4457_v33, %v5307_v62  ;;  %v1133_v58 = vpop.f32.mrf.mxu1  ;;  %v1406_v3 = vmul.f32 %v4455_v36, %v1405_v14  ;;  %vm1418_vm12 = vweird.f32 %v4457_v33 }
 0x2e9   :  { %4458 = vrsqrt.f32 %v5338_v9  ;;  %v1134_v31 = vadd.f32 %v1133_v58, %v1020_v5  ;;  %957 = vmatmul.f32.gmra.mxu3 %v742_v54  ;;  %vm1419_vm14 = vmor %vm1417_vm13, %vm1418_vm12  ;;  %vm1427_vm0 = vweird.f32 %v5338_v9 }
 0x2ea   :  { %v1413_v38 = vmul.f32 %v4457_v33, %v1412_v40  ;;  %v1410_v63 = vsel %vm1409_vm11, %v4455_v36, %v1406_v3  ;;  %v1023_v1 = vpop.f32.mrf.mxu0  ;;  %v744_v36 = vld [vmem:[%s7107_s5 + $0x188] sm:$0xff] }
 0x2eb   :  { %v1249_v55 = vsub.f32 %v1134_v31, %v1217_v28  ;;  %1180 = vmatmul.f32.gmra.mxu1 %v740_v6  ;;  %v5355_v53 = vmul.f32 %v1410_v63, %v1310_v16  ;;  %853 = vmatmul.f32.gmra.mxu2 %v5351_v29  ;;  %v5382_v31 = vld [vmem:[%s7107_s5 + $0x1b0] sm:$0xff] }
 0x2ec   :  { %v1414_v50 = vmul.f32 0.5, %v1413_v38  ;;  %v910_v12 = vpop.f32.mrf.mxu3 }
 0x2ed   :  { %v1281_v14 = vmax.f32 %v1249_v55, 0.0  ;;  %v5359_v56 = vadd.f32 %v910_v12, %v5272_v21  ;;  %v1726_v5 = vmul.f32 %v5355_v53, %v5238_v17  ;;  %1070 = vmatmul.f32.gmra.mxu0 %v5256_v34  ;;  %v1311_v34 = vld [vmem:[%s7108_s8 + $0x20] sm:$0xff] }
 0x2ee   :  { %v1415_v6 = vsub.f32 1.5, %v1414_v50  ;;  %v5367_v28 = vpop.f32.mrf.mxu2 }
 0x2ef   :  { %v4459_v40 = vpop.eup %4458  ;;  %v5369_v58 = vadd.f32 1e-05, %v1281_v14  ;;  %v1218_v21 = vmul.f32 %v5359_v56, %v5359_v56  ;;  %1793 = vrot.lane.b32.xlu1 %v1726_v5, %s4572_s12 }
 0x2f0   :  { %v1422_v17 = vmul.f32 %v4459_v40, %v5338_v9  ;;  %v1136_v16 = vpop.f32.mrf.mxu1  ;;  %v1416_v3 = vmul.f32 %v4457_v33, %v1415_v6  ;;  %vm1428_vm15 = vweird.f32 %v4459_v40 }
 0x2f1   :  { %4460 = vrsqrt.f32 %v5369_v58  ;;  %v1137_v38 = vadd.f32 %v1136_v16, %v1023_v1  ;;  %960 = vmatmul.f32.gmra.mxu3 %v744_v36  ;;  %vm1429_vm1 = vmor %vm1427_vm0, %vm1428_vm15  ;;  %vm1437_vm3 = vweird.f32 %v5369_v58 }
 0x2f2   :  { %v1423_v63 = vmul.f32 %v4459_v40, %v1422_v17  ;;  %v1420_v55 = vsel %vm1419_vm14, %v4457_v33, %v1416_v3  ;;  %v1026_v50 = vpop.f32.mrf.mxu0  ;;  %v746_v33 = vld [vmem:[%s7107_s5 + $0x198] sm:$0xff] }
 0x2f3   :  { %v1250_v12 = vsub.f32 %v1137_v38, %v1218_v21  ;;  %1183 = vmatmul.f32.gmra.mxu1 %v742_v54  ;;  %v1695_v14 = vmul.f32 %v1420_v55, %v1311_v34  ;;  %856 = vmatmul.f32.gmra.mxu2 %v5382_v31  ;;  %v5410_v38 = vld [vmem:[%s7107_s5 + $0x1c0] sm:$0xff] }
 0x2f4   :  { %v1424_v62 = vmul.f32 0.5, %v1423_v63  ;;  %v913_v5 = vpop.f32.mrf.mxu3 }
 0x2f5   :  { %v1282_v6 = vmax.f32 %v1250_v12, 0.0  ;;  %1937 = vperm.xlu2 %4398, %v1695_v14   ;;  %v5388_v20 = vadd.f32 %v913_v5, %v5305_v59  ;;  %v1727_v1 = vmul.f32 %v1695_v14, %v5263_v43  ;;  %1073 = vmatmul.f32.gmra.mxu0 %v5289_v41  ;;  %v1312_v41 = vld [vmem:[%s7108_s8 + $0x28] sm:$0xff] }
 0x2f6   :  { %v1425_v21 = vsub.f32 1.5, %v1424_v62  ;;  %v5395_v54 = vpop.f32.mrf.mxu2 }
 0x2f7   :  { %v4461_v17 = vpop.eup %4460  ;;  %v5397_v16 = vadd.f32 1e-05, %v1282_v6  ;;  %v1219_v34 = vmul.f32 %v5388_v20, %v5388_v20  ;;  %1795 = vrot.lane.b32.xlu0 %v1727_v1, %s4572_s12 }
 0x2f8   :  { %v1432_v43 = vmul.f32 %v4461_v17, %v5369_v58  ;;  %v1139_v59 = vpop.f32.mrf.mxu1  ;;  %v1426_v3 = vmul.f32 %v4459_v40, %v1425_v21  ;;  %vm1438_vm2 = vweird.f32 %v4461_v17 }
 0x2f9   :  { %4462 = vrsqrt.f32 %v5397_v16  ;;  %v1140_v63 = vadd.f32 %v1139_v59, %v1026_v50  ;;  %963 = vmatmul.f32.gmra.mxu3 %v746_v33  ;;  %vm1439_vm4 = vmor %vm1437_vm3, %vm1438_vm2  ;;  %vm1447_vm6 = vweird.f32 %v5397_v16 }
 0x2fa   :  { %v1433_v55 = vmul.f32 %v4461_v17, %v1432_v43  ;;  %v1430_v12 = vsel %vm1429_vm1, %v4459_v40, %v1426_v3  ;;  %v1029_v14 = vpop.f32.mrf.mxu0  ;;  %v748_v40 = vld [vmem:[%s7107_s5 + $0x1a8] sm:$0xff] }
 0x2fb   :  { %v1251_v62 = vsub.f32 %v1140_v63, %v1219_v34  ;;  %1186 = vmatmul.f32.gmra.mxu1 %v744_v36  ;;  %v1696_v5 = vmul.f32 %v1430_v12, %v1312_v41  ;;  %859 = vmatmul.f32.gmra.mxu2 %v5410_v38  ;;  %v5438_v63 = vld [vmem:[%s7107_s5 + $0x1d0] sm:$0xff] }
 0x2fc   :  { %v1434_v9 = vmul.f32 0.5, %v1433_v55  ;;  %v916_v6 = vpop.f32.mrf.mxu3 }
 0x2fd   :  { %v1283_v1 = vmax.f32 %v1251_v62, 0.0  ;;  %1942 = vperm.xlu1 %4399, %v1696_v5   ;;  %v5416_v21 = vadd.f32 %v916_v6, %v5336_v22  ;;  %v1728_v50 = vmul.f32 %v1696_v5, %v5297_v52  ;;  %1076 = vmatmul.f32.gmra.mxu0 %v5320_v39  ;;  %v1313_v39 = vld [vmem:[%s7108_s8 + $0x30] sm:$0xff] }
 0x2fe   :  { %v1435_v34 = vsub.f32 1.5, %v1434_v9  ;;  %v5423_v36 = vpop.f32.mrf.mxu2 }
 0x2ff   :  { %v4463_v43 = vpop.eup %4462  ;;  %v5425_v59 = vadd.f32 1e-05, %v1283_v1  ;;  %v1220_v41 = vmul.f32 %v5416_v21, %v5416_v21  ;;  %1797 = vrot.lane.b32.xlu2 %v1728_v50, %s4572_s12 }
 0x300   :  { %v1442_v52 = vmul.f32 %v4463_v43, %v5397_v16  ;;  %v1142_v22 = vpop.f32.mrf.mxu1  ;;  %v1436_v3 = vmul.f32 %v4461_v17, %v1435_v34  ;;  %vm1448_vm5 = vweird.f32 %v4463_v43 }
 0x301   :  { %4464 = vrsqrt.f32 %v5425_v59  ;;  %v1143_v55 = vadd.f32 %v1142_v22, %v1029_v14  ;;  %966 = vmatmul.f32.gmra.mxu3 %v748_v40  ;;  %vm1449_vm7 = vmor %vm1447_vm6, %vm1448_vm5  ;;  %vm1457_vm9 = vweird.f32 %v5425_v59 }
 0x302   :  { %v1443_v12 = vmul.f32 %v4463_v43, %v1442_v52  ;;  %v1440_v62 = vsel %vm1439_vm4, %v4461_v17, %v1436_v3  ;;  %v1032_v5 = vpop.f32.mrf.mxu0  ;;  %v750_v17 = vld [vmem:[%s7107_s5 + $0x1b8] sm:$0xff]  ;;  %v5468_v3 = vld [vmem:[%s7107_s5 + $0x1e0] sm:$0xff] }
 0x303   :  { %v1252_v9 = vsub.f32 %v1143_v55, %v1220_v41  ;;  %1189 = vmatmul.f32.gmra.mxu1 %v746_v33  ;;  %v1697_v6 = vmul.f32 %v1440_v62, %v1313_v39  ;;  %862 = vmatmul.f32.gmra.mxu2 %v5438_v63 }
 0x304   :  { %v1444_v58 = vmul.f32 0.5, %v1443_v12  ;;  %v919_v1 = vpop.f32.mrf.mxu3 }
 0x305   :  { %v1284_v50 = vmax.f32 %v1252_v9, 0.0  ;;  %v5444_v34 = vadd.f32 %v919_v1, %v5367_v28  ;;  %v1729_v11 = vmul.f32 %v1697_v6, %v5328_v60  ;;  %1079 = vmatmul.f32.gmra.mxu0 %v5351_v29  ;;  %v5462_v28 = vld [vmem:[%s7108_s8 + $0x38] sm:$0xff] }
 0x306   :  { %v1445_v14 = vsub.f32 1.5, %v1444_v58  ;;  %v5451_v33 = vpop.f32.mrf.mxu2 }
 0x307   :  { %v4465_v41 = vpop.eup %4464  ;;  %v5453_v52 = vadd.f32 1e-05, %v1284_v50  ;;  %v1221_v22 = vmul.f32 %v5444_v34, %v5444_v34  ;;  %1947 = vperm.xlu2 %4398, %v1697_v6   ;;  %1799 = vrot.lane.b32.xlu1 %v1729_v11, %s4572_s12 }
 0x308   :  { %v1452_v60 = vmul.f32 %v4465_v41, %v5425_v59  ;;  %v1145_v29 = vpop.f32.mrf.mxu1  ;;  %v1446_v39 = vmul.f32 %v4463_v43, %v1445_v14  ;;  %vm1458_vm8 = vweird.f32 %v4465_v41  ;;  %v754_v59 = vld [vmem:[%s7107_s5 + $0x1d8] sm:$0xff] }
 0x309   :  { %4466 = vrsqrt.f32 %v5453_v52  ;;  %v1146_v55 = vadd.f32 %v1145_v29, %v1032_v5  ;;  %969 = vmatmul.f32.gmra.mxu3 %v750_v17  ;;  %vm1459_vm10 = vmor %vm1457_vm9, %vm1458_vm8  ;;  %vm1467_vm12 = vweird.f32 %v5453_v52 }
 0x30a   :  { %v1453_v11 = vmul.f32 %v4465_v41, %v1452_v60  ;;  %v1450_v12 = vsel %vm1449_vm7, %v4463_v43, %v1446_v39  ;;  %v1035_v62 = vpop.f32.mrf.mxu0  ;;  %v752_v43 = vld [vmem:[%s7107_s5 + $0x1c8] sm:$0xff] }
 0x30b   :  { %v1253_v9 = vsub.f32 %v1146_v55, %v1221_v22  ;;  %1192 = vmatmul.f32.gmra.mxu1 %v748_v40  ;;  %v1698_v6 = vmul.f32 %v1450_v12, %v5462_v28  ;;  %865 = vmatmul.f32.gmra.mxu2 %v5468_v3 }
 0x30c   :  { %v1454_v16 = vmul.f32 0.5, %v1453_v11  ;;  %v922_v58 = vpop.f32.mrf.mxu3 }
 0x30d   :  { %v1285_v1 = vmax.f32 %v1253_v9, 0.0  ;;  %v5475_v50 = vadd.f32 %v922_v58, %v5395_v54  ;;  %v1730_v5 = vmul.f32 %v1698_v6, %v5359_v56  ;;  %1082 = vmatmul.f32.gmra.mxu0 %v5382_v31  ;;  %v5493_v54 = vld [vmem:[%s7108_s8 + $0x40] sm:$0xff] }
 0x30e   :  { %v1455_v14 = vsub.f32 1.5, %v1454_v16  ;;  %v5482_v40 = vpop.f32.mrf.mxu2 }
 0x30f   :  { %v4467_v22 = vpop.eup %4466  ;;  %v5484_v60 = vadd.f32 1e-05, %v1285_v1  ;;  %v1222_v29 = vmul.f32 %v5475_v50, %v5475_v50  ;;  %1952 = vperm.xlu1 %4399, %v1698_v6   ;;  %1801 = vrot.lane.b32.xlu0 %v1730_v5, %s4572_s12 }
 0x310   :  { %v1462_v56 = vmul.f32 %v4467_v22, %v5453_v52  ;;  %v1148_v31 = vpop.f32.mrf.mxu1  ;;  %v1456_v39 = vmul.f32 %v4465_v41, %v1455_v14  ;;  %vm1468_vm11 = vweird.f32 %v4467_v22 }
 0x311   :  { %4468 = vrsqrt.f32 %v5484_v60  ;;  %v1149_v55 = vadd.f32 %v1148_v31, %v1035_v62  ;;  %972 = vmatmul.f32.gmra.mxu3 %v752_v43  ;;  %vm1469_vm13 = vmor %vm1467_vm12, %vm1468_vm11  ;;  %vm1477_vm15 = vweird.f32 %v5484_v60 }
 0x312   :  { %v1463_v11 = vmul.f32 %v4467_v22, %v1462_v56  ;;  %v1460_v12 = vsel %vm1459_vm10, %v4465_v41, %v1456_v39  ;;  %v1038_v9 = vpop.f32.mrf.mxu0 }
 0x313   :  { %v1254_v6 = vsub.f32 %v1149_v55, %v1222_v29  ;;  %1195 = vmatmul.f32.gmra.mxu1 %v750_v17  ;;  %v1699_v16 = vmul.f32 %v1460_v12, %v5493_v54 }
 0x314   :  { %v1464_v58 = vmul.f32 0.5, %v1463_v11  ;;  %v925_v1 = vpop.f32.mrf.mxu3 }
 0x315   :  { %v1286_v5 = vmax.f32 %v1254_v6, 0.0  ;;  %1957 = vperm.xlu2 %4398, %v1699_v16   ;;  %v5500_v14 = vadd.f32 %v925_v1, %v5423_v36  ;;  %1085 = vmatmul.f32.gmra.mxu0 %v5410_v38  ;;  %v5516_v38 = vld [vmem:[%s7108_s8 + $0x48] sm:$0xff]  ;;  %v1731_v1 = vmul.f32 %v1699_v16, %v5388_v20 }
 0x316   :  { %v1465_v62 = vsub.f32 1.5, %v1464_v58  ;;  %v5506_v41 = vpop.f32.mrf.mxu2 }
 0x317   :  { %v4469_v17 = vpop.eup %4468  ;;  %v5508_v29 = vadd.f32 1e-05, %v1286_v5  ;;  %v1223_v56 = vmul.f32 %v5500_v14, %v5500_v14 }
 0x318   :  { %v1472_v31 = vmul.f32 %v4469_v17, %v5484_v60  ;;  %v1151_v36 = vpop.f32.mrf.mxu1  ;;  %v1466_v39 = vmul.f32 %v4467_v22, %v1465_v62  ;;  %vm1478_vm14 = vweird.f32 %v4469_v17 }
 0x319   :  { %4470 = vrsqrt.f32 %v5508_v29  ;;  %v1152_v55 = vadd.f32 %v1151_v36, %v1038_v9  ;;  %975 = vmatmul.f32.gmra.mxu3 %v754_v59  ;;  %v757_v9 = vld [vmem:[%s7107_s5 + $0x1f0] sm:$0xff]  ;;  %vm1479_vm0 = vmor %vm1477_vm15, %vm1478_vm14  ;;  %vm1487_vm2 = vweird.f32 %v5508_v29 }
 0x31a   :  { %v1473_v11 = vmul.f32 %v4469_v17, %v1472_v31  ;;  %v1470_v12 = vsel %vm1469_vm13, %v4467_v22, %v1466_v39  ;;  %v1041_v6 = vpop.f32.mrf.mxu0  ;;  %v756_v22 = vld [vmem:[%s7107_s5 + $0x1e8] sm:$0xff]  ;;  %868 = vmatmul.f32.gmra.mxu2 %v757_v9 }
 0x31b   :  { %v1255_v58 = vsub.f32 %v1152_v55, %v1223_v56  ;;  %1198 = vmatmul.f32.gmra.mxu1 %v752_v43  ;;  %v1700_v5 = vmul.f32 %v1470_v12, %v5516_v38 }
 0x31c   :  { %v1474_v8 = vmul.f32 0.5, %v1473_v11  ;;  %v928_v23 = vpop.f32.mrf.mxu3 }
 0x31d   :  { %v1287_v4 = vmax.f32 %v1255_v58, 0.0  ;;  %1803 = vrot.lane.b32.xlu2 %v1731_v1, %s4572_s12  ;;  %1962 = vperm.xlu1 %4399, %v1700_v5   ;;  %v5524_v52 = vadd.f32 %v928_v23, %v5451_v33  ;;  %v1732_v11 = vmul.f32 %v1700_v5, %v5416_v21  ;;  %v758_v21 = vld [vmem:[%s7107_s5 + $0x1f8] sm:$0xff]  ;;  %s4574_s5 = smov 127  }
 0x31e   :  { %1088 = vmatmul.f32.gmra.mxu0 %v5438_v63  ;;  %v1475_v43 = vsub.f32 1.5, %v1474_v8  ;;  %v5530_v20 = vpop.f32.mrf.mxu2  ;;  %v1317_v8 = vld [vmem:[%s7108_s8 + $0x50] sm:$0xff] }
 0x31f   :  { %v4471_v16 = vpop.eup %4470  ;;  %v5535_v62 = vadd.f32 1e-05, %v1287_v4  ;;  %v1224_v23 = vmul.f32 %v5524_v52, %v5524_v52 }
 0x320   :  { %v1482_v33 = vmul.f32 %v4471_v16, %v5508_v29  ;;  %v1154_v56 = vpop.f32.mrf.mxu1  ;;  %v1476_v63 = vmul.f32 %v4469_v17, %v1475_v43  ;;  %vm1488_vm1 = vweird.f32 %v4471_v16 }
 0x321   :  { %4472 = vrsqrt.f32 %v5535_v62  ;;  %v1155_v31 = vadd.f32 %v1154_v56, %v1041_v6  ;;  %978 = vmatmul.f32.gmra.mxu3 %v756_v22  ;;  %vm1489_vm3 = vmor %vm1487_vm2, %vm1488_vm1  ;;  %vm1497_vm5 = vweird.f32 %v5535_v62 }
 0x322   :  { %v1483_v4 = vmul.f32 %v4471_v16, %v1482_v33  ;;  %v1480_v36 = vsel %vm1479_vm0, %v4469_v17, %v1476_v63  ;;  %v1044_v39 = vpop.f32.mrf.mxu0 }
 0x323   :  { %v1256_v55 = vsub.f32 %v1155_v31, %v1224_v23  ;;  %1201 = vmatmul.f32.gmra.mxu1 %v754_v59  ;;  %v1701_v12 = vmul.f32 %v1480_v36, %v1317_v8 }
 0x324   :  { %v1484_v58 = vmul.f32 0.5, %v1483_v4  ;;  %v931_v1 = vpop.f32.mrf.mxu3 }
 0x325   :  { %v1288_v0 = vmax.f32 %v1256_v55, 0.0  ;;  %1805 = vrot.lane.b32.xlu1 %v1732_v11, %s4572_s12  ;;  %1967 = vperm.xlu2 %4398, %v1701_v12   ;;  %v5549_v60 = vadd.f32 %v931_v1, %v5482_v40  ;;  %v1733_v6 = vmul.f32 %v1701_v12, %v5444_v34 }
 0x326   :  { %1091 = vmatmul.f32.gmra.mxu0 %v5468_v3  ;;  %v1485_v17 = vsub.f32 1.5, %v1484_v58  ;;  %v5553_v43 = vpop.f32.mrf.mxu2  ;;  %v5567_v3 = vld [vmem:[%s7108_s8 + $0x58] sm:$0xff] }
 0x327   :  { %v4473_v59 = vpop.eup %4472  ;;  %v5558_v5 = vadd.f32 1e-05, %v1288_v0  ;;  %v1225_v23 = vmul.f32 %v5549_v60, %v5549_v60  ;;  %1807 = vrot.lane.b32.xlu0 %v1733_v6, %s4572_s12 }
 0x328   :  { %v1492_v34 = vmul.f32 %v4473_v59, %v5535_v62  ;;  %v1157_v40 = vpop.f32.mrf.mxu1  ;;  %v1486_v33 = vmul.f32 %v4471_v16, %v1485_v17  ;;  %vm1498_vm4 = vweird.f32 %v4473_v59 }
 0x329   :  { %4474 = vrsqrt.f32 %v5558_v5  ;;  %v1158_v0 = vadd.f32 %v1157_v40, %v1044_v39  ;;  %981 = vmatmul.f32.gmra.mxu3 %v758_v21  ;;  %vm1499_vm6 = vmor %vm1497_vm5, %vm1498_vm4  ;;  %vm1507_vm8 = vweird.f32 %v5558_v5 }
 0x32a   :  { %v1493_v56 = vmul.f32 %v4473_v59, %v1492_v34  ;;  %v1490_v8 = vsel %vm1489_vm3, %v4471_v16, %v1486_v33  ;;  %v1047_v63 = vpop.f32.mrf.mxu0 }
 0x32b   :  { %v1257_v31 = vsub.f32 %v1158_v0, %v1225_v23  ;;  %1204 = vmatmul.f32.gmra.mxu1 %v756_v22  ;;  %v1702_v4 = vmul.f32 %v1490_v8, %v5567_v3 }
 0x32c   :  { %v1494_v36 = vmul.f32 0.5, %v1493_v56  ;;  %v934_v55 = vpop.f32.mrf.mxu3 }
 0x32d   :  { %v1289_v11 = vmax.f32 %v1257_v31, 0.0  ;;  %1972 = vperm.xlu1 %4399, %v1702_v4   ;;  %v5573_v12 = vadd.f32 %v934_v55, %v5506_v41  ;;  %v1734_v29 = vmul.f32 %v1702_v4, %v5475_v50  ;;  %v5587_v50 = vld [vmem:[%s7108_s8 + $0x60] sm:$0xff] }
 0x32e   :  { %v1495_v58 = vsub.f32 1.5, %v1494_v36  ;;  %v5576_v39 = vpop.f32.mrf.mxu2  ;;  %1094 = vmatmul.f32.gmra.mxu0 %v757_v9 }
 0x32f   :  { %v4475_v16 = vpop.eup %4474  ;;  %v5578_v1 = vadd.f32 1e-05, %v1289_v11  ;;  %v1226_v22 = vmul.f32 %v5573_v12, %v5573_v12  ;;  %1809 = vrot.lane.b32.xlu2 %v1734_v29, %s4572_s12 }
 0x330   :  { %v1502_v6 = vmul.f32 %v4475_v16, %v5558_v5  ;;  %v1160_v17 = vpop.f32.mrf.mxu1  ;;  %v1496_v41 = vmul.f32 %v4473_v59, %v1495_v58  ;;  %vm1508_vm7 = vweird.f32 %v4475_v16 }
 0x331   :  { %4476 = vrsqrt.f32 %v5578_v1  ;;  %v1161_v9 = vadd.f32 %v1160_v17, %v1047_v63  ;;  %vm1509_vm9 = vmor %vm1507_vm8, %vm1508_vm7  ;;  %vm1517_vm11 = vweird.f32 %v5578_v1 }
 0x332   :  { %v1503_v23 = vmul.f32 %v4475_v16, %v1502_v6  ;;  %v1500_v34 = vsel %vm1499_vm6, %v4473_v59, %v1496_v41  ;;  %v1050_v40 = vpop.f32.mrf.mxu0 }
 0x333   :  { %v1258_v33 = vsub.f32 %v1161_v9, %v1226_v22  ;;  %v1703_v0 = vmul.f32 %v1500_v34, %v5587_v50  ;;  %1207 = vmatmul.f32.gmra.mxu1 %v758_v21 }
 0x334   :  { %v1504_v56 = vmul.f32 0.5, %v1503_v23  ;;  %v937_v8 = vpop.f32.mrf.mxu3 }
 0x335   :  { %v1290_v31 = vmax.f32 %v1258_v33, 0.0  ;;  %v5593_v4 = vadd.f32 %v937_v8, %v5530_v20  ;;  %v1735_v36 = vmul.f32 %v1703_v0, %v5500_v14  ;;  %v5607_v14 = vld [vmem:[%s7108_s8 + $0x68] sm:$0xff] }
 0x336   :  { %v1505_v62 = vsub.f32 1.5, %v1504_v56  ;;  %v5596_v55 = vpop.f32.mrf.mxu2 }
 0x337   :  { %v4477_v63 = vpop.eup %4476  ;;  %v5598_v11 = vadd.f32 1e-05, %v1290_v31  ;;  %v1227_v59 = vmul.f32 %v5593_v4, %v5593_v4  ;;  %1977 = vperm.xlu2 %4398, %v1703_v0   ;;  %1811 = vrot.lane.b32.xlu1 %v1735_v36, %s4572_s12 }
 0x338   :  { %v1512_v21 = vmul.f32 %v4477_v63, %v5578_v1  ;;  %v1163_v29 = vpop.f32.mrf.mxu1  ;;  %v1506_v20 = vmul.f32 %v4475_v16, %v1505_v62  ;;  %vm1518_vm10 = vweird.f32 %v4477_v63 }
 0x339   :  { %4478 = vrsqrt.f32 %v5598_v11  ;;  %v1164_v58 = vadd.f32 %v1163_v29, %v1050_v40  ;;  %vm1519_vm12 = vmor %vm1517_vm11, %vm1518_vm10  ;;  %vm1527_vm14 = vweird.f32 %v5598_v11 }
 0x33a   :  { %v1513_v22 = vmul.f32 %v4477_v63, %v1512_v21  ;;  %v1510_v6 = vsel %vm1509_vm9, %v4475_v16, %v1506_v20  ;;  %v1053_v17 = vpop.f32.mrf.mxu0 }
 0x33b   :  { %v1259_v41 = vsub.f32 %v1164_v58, %v1227_v59  ;;  %v1704_v9 = vmul.f32 %v1510_v6, %v5607_v14 }
 0x33c   :  { %v1514_v23 = vmul.f32 0.5, %v1513_v22  ;;  %v940_v34 = vpop.f32.mrf.mxu3 }
 0x33d   :  { %v1291_v33 = vmax.f32 %v1259_v41, 0.0  ;;  %v5613_v0 = vadd.f32 %v940_v34, %v5553_v43  ;;  %v1736_v56 = vmul.f32 %v1704_v9, %v5524_v52  ;;  %v5627_v52 = vld [vmem:[%s7108_s8 + $0x70] sm:$0xff] }
 0x33e   :  { %v1515_v8 = vsub.f32 1.5, %v1514_v23  ;;  %v5616_v5 = vpop.f32.mrf.mxu2 }
 0x33f   :  { %v4479_v40 = vpop.eup %4478  ;;  %v5618_v31 = vadd.f32 1e-05, %v1291_v33  ;;  %v1228_v16 = vmul.f32 %v5613_v0, %v5613_v0  ;;  %1982 = vperm.xlu1 %4399, %v1704_v9   ;;  %1813 = vrot.lane.b32.xlu0 %v1736_v56, %s4572_s12 }
 0x340   :  { %v1522_v36 = vmul.f32 %v4479_v40, %v5598_v11  ;;  %v1166_v62 = vpop.f32.mrf.mxu1  ;;  %v1516_v43 = vmul.f32 %v4477_v63, %v1515_v8  ;;  %vm1528_vm13 = vweird.f32 %v4479_v40 }
 0x341   :  { %4480 = vrsqrt.f32 %v5618_v31  ;;  %v1167_v59 = vadd.f32 %v1166_v62, %v1053_v17  ;;  %vm1529_vm15 = vmor %vm1527_vm14, %vm1528_vm13  ;;  %vm1537_vm1 = vweird.f32 %v5618_v31 }
 0x342   :  { %v1523_v21 = vmul.f32 %v4479_v40, %v1522_v36  ;;  %v1520_v29 = vsel %vm1519_vm12, %v4477_v63, %v1516_v43  ;;  %v1056_v20 = vpop.f32.mrf.mxu0 }
 0x343   :  { %v1260_v58 = vsub.f32 %v1167_v59, %v1228_v16  ;;  %v1705_v22 = vmul.f32 %v1520_v29, %v5627_v52 }
 0x344   :  { %v1524_v6 = vmul.f32 0.5, %v1523_v21  ;;  %v943_v41 = vpop.f32.mrf.mxu3 }
 0x345   :  { %v1292_v9 = vmax.f32 %v1260_v58, 0.0  ;;  %v5633_v23 = vadd.f32 %v943_v41, %v5576_v39  ;;  %v1737_v34 = vmul.f32 %v1705_v22, %v5549_v60  ;;  %v5643_v39 = vld [vmem:[%s7108_s8 + $0x78] sm:$0xff] }
 0x346   :  { %v1525_v33 = vsub.f32 1.5, %v1524_v6  ;;  %v5646_v60 = vpop.f32.mrf.mxu2 }
 0x347   :  { %v4481_v1 = vpop.eup %4480  ;;  %v1356_v56 = vadd.f32 1e-05, %v1292_v9  ;;  %v1229_v17 = vmul.f32 %v5633_v23, %v5633_v23  ;;  %1987 = vperm.xlu0 %4400, %v1705_v22   ;;  %1815 = vrot.lane.b32.xlu1 %v1737_v34, %s4572_s12  ;;  %v5652_v34 = vpop.permute.xlu2 %1791 }
 0x348   :  { %v1532_v63 = vmul.f32 %v4481_v1, %v5618_v31  ;;  %v1169_v8 = vpop.f32.mrf.mxu1  ;;  %v1526_v16 = vmul.f32 %v4479_v40, %v1525_v33  ;;  %7179 = vst [vmem:[#allocation30_spill] sm:$0xff] %v5652_v34  ;;  %vm1538_vm0 = vweird.f32 %v4481_v1 }
 0x349   :  { %4482 = vrsqrt.f32 %v1356_v56  ;;  %v1170_v36 = vadd.f32 %v1169_v8, %v1056_v20  ;;  %vm5662_vm2 = vmor %vm1537_vm1, %vm1538_vm0  ;;  %vm1547_vm4 = vweird.f32 %v1356_v56 }
 0x34a   :  { %v1533_v62 = vmul.f32 %v4481_v1, %v1532_v63  ;;  %v1530_v43 = vsel %vm1529_vm15, %v4479_v40, %v1526_v16  ;;  %v1059_v59 = vpop.f32.mrf.mxu0 }
 0x34b   :  { %v1261_v21 = vsub.f32 %v1170_v36, %v1229_v17  ;;  %v1706_v29 = vmul.f32 %v1530_v43, %v5643_v39 }
 0x34c   :  { %v1534_v58 = vmul.f32 0.5, %v1533_v62  ;;  %v946_v22 = vpop.f32.mrf.mxu3 }
 0x34d   :  { %v1293_v6 = vmax.f32 %v1261_v21, 0.0  ;;  %1992 = vperm.xlu2 %4398, %v1706_v29   ;;  %v5650_v41 = vadd.f32 %v946_v22, %v5596_v55  ;;  %v1738_v21 = vmul.f32 %v1706_v29, %v5573_v12 }
 0x34e   :  { %v1535_v9 = vsub.f32 1.5, %v1534_v58  ;;  %v5660_v36 = vpop.f32.mrf.mxu2 }
 0x34f   :  { %v4483_v11 = vpop.eup %4482  ;;  %v5654_v33 = vadd.f32 1e-05, %v1293_v6  ;;  %v1230_v40 = vmul.f32 %v5650_v41, %v5650_v41  ;;  %v1323_v6 = vld [vmem:[%s7108_s8 + $0x80] sm:$0xff] }
 0x350   :  { %v1542_v20 = vmul.f32 %v4483_v11, %v1356_v56  ;;  %v1172_v17 = vpop.f32.mrf.mxu1  ;;  %v1536_v63 = vmul.f32 %v4481_v1, %v1535_v9  ;;  %vm1548_vm3 = vweird.f32 %v4483_v11 }
 0x351   :  { %4484 = vrsqrt.f32 %v5654_v33  ;;  %v1173_v8 = vadd.f32 %v1172_v17, %v1059_v59  ;;  %v5676_v17 = vpop.permute.xlu2 %1937  ;;  %vm1549_vm5 = vmor %vm1547_vm4, %vm1548_vm3  ;;  %vm1557_vm7 = vweird.f32 %v5654_v33 }
 0x352   :  { %v1543_v55 = vmul.f32 %v4483_v11, %v1542_v20  ;;  %v1062_v16 = vpop.f32.mrf.mxu0  ;;  %v1540_v31 = vsel %vm5662_vm2, %v4481_v1, %v1536_v63  ;;  %7182 = vst [vmem:[#allocation31_spill] sm:$0xff] %v5676_v17 }
 0x353   :  { %v1262_v43 = vsub.f32 %v1173_v8, %v1230_v40  ;;  %v5682_v8 = vmul.f32 %v1540_v31, %v1323_v6 }
 0x354   :  { %v1544_v58 = vmul.f32 0.5, %v1543_v55  ;;  %v949_v22 = vpop.f32.mrf.mxu3 }
 0x355   :  { %v1294_v59 = vmax.f32 %v1262_v43, 0.0  ;;  %1817 = vrot.lane.b32.xlu2 %v1738_v21, %s4572_s12  ;;  %v5674_v9 = vadd.f32 %v949_v22, %v5616_v5  ;;  %v1324_v5 = vld [vmem:[%s7108_s8 + $0x88] sm:$0xff]  ;;  %v1739_v6 = vmul.f32 %v5682_v8, %v5593_v4 }
 0x356   :  { %v1545_v20 = vsub.f32 1.5, %v1544_v58  ;;  %v845_v18 = vpop.f32.mrf.mxu2 }
 0x357   :  { %v4485_v40 = vpop.eup %4484  ;;  %v5678_v12 = vadd.f32 1e-05, %v1294_v59  ;;  %v1231_v29 = vmul.f32 %v5674_v9, %v5674_v9 }
 0x358   :  { %v1552_v1 = vmul.f32 %v4485_v40, %v5654_v33  ;;  %v1175_v63 = vpop.f32.mrf.mxu1  ;;  %v1546_v55 = vmul.f32 %v4483_v11, %v1545_v20  ;;  %vm1558_vm6 = vweird.f32 %v4485_v40 }
 0x359   :  { %4486 = vrsqrt.f32 %v5678_v12  ;;  %v1176_v62 = vadd.f32 %v1175_v63, %v1062_v16  ;;  %v5701_v4 = vpop.permute.xlu2 %1797  ;;  %vm1559_vm8 = vmor %vm1557_vm7, %vm1558_vm6  ;;  %vm1567_vm10 = vweird.f32 %v5678_v12 }
 0x35a   :  { %v1553_v43 = vmul.f32 %v4485_v40, %v1552_v1  ;;  %v1550_v21 = vsel %vm1549_vm5, %v4483_v11, %v1546_v55  ;;  %v1065_v58 = vpop.f32.mrf.mxu0 }
 0x35b   :  { %v1263_v22 = vsub.f32 %v1176_v62, %v1231_v29  ;;  %v5691_v56 = vmul.f32 %v1550_v21, %v1324_v5  ;;  %v7131_v5 = vmov 1  }
 0x35c   :  { %v1554_v31 = vmul.f32 0.5, %v1553_v43  ;;  %v952_v59 = vpop.f32.mrf.mxu3  ;;  %4401 = vset.pattern.permute.xlu2 %v7131_v5  ;;  %4403 = vset.pattern.permute.xlu1 %v7131_v5 }
 0x35d   :  { %v1295_v10 = vmax.f32 %v1263_v22, 0.0  ;;  %1819 = vrot.lane.b32.xlu2 %v1739_v6, %s4572_s12  ;;  %v5695_v20 = vadd.f32 %v952_v59, %v5646_v60  ;;  %v1740_v16 = vmul.f32 %v5691_v56, %v5613_v0 }
 0x35e   :  { %v1555_v11 = vsub.f32 1.5, %v1554_v31 }
 0x35f   :  { %v4487_v29 = vpop.eup %4486  ;;  %v5699_v1 = vadd.f32 1e-05, %v1295_v10  ;;  %v1232_v63 = vmul.f32 %v5695_v20, %v5695_v20  ;;  %1821 = vrot.lane.b32.xlu1 %v1740_v16, %s4572_s12  ;;  %v5712_v10 = vld [vmem:[%s7108_s8 + $0x90] sm:$0xff]  ;;  %v5719_v16 = vpop.permute.xlu1 %1787 }
 0x360   :  { %v1562_v60 = vmul.f32 %v4487_v29, %v5678_v12  ;;  %v1178_v0 = vpop.f32.mrf.mxu1  ;;  %v1556_v55 = vmul.f32 %v4485_v40, %v1555_v11  ;;  %7183 = vst [vmem:[#allocation32_spill] sm:$0xff] %v5719_v16  ;;  %vm1568_vm9 = vweird.f32 %v4487_v29 }
 0x361   :  { %4488 = vrsqrt.f32 %v5699_v1  ;;  %v1179_v62 = vadd.f32 %v1178_v0, %v1065_v58  ;;  %v848_v58 = vpop.f32.mrf.mxu2  ;;  %vm1569_vm11 = vmor %vm1567_vm10, %vm1568_vm9  ;;  %vm1577_vm13 = vweird.f32 %v5699_v1 }
 0x362   :  { %v1563_v43 = vmul.f32 %v4487_v29, %v1562_v60  ;;  %v1560_v21 = vsel %vm1559_vm8, %v4485_v40, %v1556_v55  ;;  %v1068_v22 = vpop.f32.mrf.mxu0 }
 0x363   :  { %v1264_v6 = vsub.f32 %v1179_v62, %v1232_v63  ;;  %v5717_v33 = vmul.f32 %v1560_v21, %v5712_v10 }
 0x364   :  { %v1564_v31 = vmul.f32 0.5, %v1563_v43  ;;  %v955_v59 = vpop.f32.mrf.mxu3 }
 0x365   :  { %v1296_v44 = vmax.f32 %v1264_v6, 0.0  ;;  %v5722_v11 = vadd.f32 %v955_v59, %v5660_v36  ;;  %v1741_v5 = vmul.f32 %v5717_v33, %v5633_v23  ;;  %v5736_v23 = vld [vmem:[%s7108_s8 + $0x98] sm:$0xff] }
 0x366   :  { %v1565_v17 = vsub.f32 1.5, %v1564_v31  ;;  %7184 = vst [vmem:[#allocation33_spill] sm:$0xff] %v5736_v23 }
 0x367   :  { %v4489_v40 = vpop.eup %4488  ;;  %v5726_v60 = vadd.f32 1e-05, %v1296_v44  ;;  %v1233_v63 = vmul.f32 %v5722_v11, %v5722_v11  ;;  %1823 = vrot.lane.b32.xlu0 %v1741_v5, %s4572_s12  ;;  %v5739_v44 = vpop.permute.xlu2 %1947 }
 0x368   :  { %v1572_v0 = vmul.f32 %v4489_v40, %v5699_v1  ;;  %v1181_v36 = vpop.f32.mrf.mxu1  ;;  %v1566_v55 = vmul.f32 %v4487_v29, %v1565_v17  ;;  %7185 = vst [vmem:[#allocation34_spill] sm:$0xff] %v5739_v44  ;;  %v5744_v32 = vpop.permute.xlu1 %1793  ;;  %vm1578_vm12 = vweird.f32 %v4489_v40 }
 0x369   :  { %4490 = vrsqrt.f32 %v5726_v60  ;;  %v1182_v62 = vadd.f32 %v1181_v36, %v1068_v22  ;;  %v851_v36 = vpop.f32.mrf.mxu2  ;;  %vm1579_vm14 = vmor %vm1577_vm13, %vm1578_vm12  ;;  %vm1587_vm0 = vweird.f32 %v5726_v60 }
 0x36a   :  { %v1573_v43 = vmul.f32 %v4489_v40, %v1572_v0  ;;  %v1570_v21 = vsel %vm1569_vm11, %v4487_v29, %v1566_v55  ;;  %v1071_v5 = vpop.f32.mrf.mxu0  ;;  %v5756_v55 = vpop.permute.xlu0 %1789 }
 0x36b   :  { %v1265_v6 = vsub.f32 %v1182_v62, %v1233_v63  ;;  %v5742_v12 = vmul.f32 %v1570_v21, %v5736_v23 }
 0x36c   :  { %v1574_v31 = vmul.f32 0.5, %v1573_v43  ;;  %v958_v59 = vpop.f32.mrf.mxu3 }
 0x36d   :  { %v1297_v35 = vmax.f32 %v1265_v6, 0.0  ;;  %v5746_v47 = vadd.f32 %v958_v59, %v845_v18  ;;  %v1742_v17 = vmul.f32 %v5742_v12, %v5650_v41  ;;  %v5765_v41 = vld [vmem:[%s7108_s8 + $0xa0] sm:$0xff] }
 0x36e   :  { %v1575_v37 = vsub.f32 1.5, %v1574_v31 }
 0x36f   :  { %v4491_v44 = vpop.eup %4490  ;;  %v5750_v22 = vadd.f32 1e-05, %v1297_v35  ;;  %v1234_v29 = vmul.f32 %v5746_v47, %v5746_v47  ;;  %1825 = vrot.lane.b32.xlu2 %v1742_v17, %s4572_s12  ;;  %v5760_v18 = vpop.permute.xlu2 %1957 }
 0x370   :  { %v1582_v63 = vmul.f32 %v4491_v44, %v5726_v60  ;;  %v1184_v0 = vpop.f32.mrf.mxu1  ;;  %7186 = vst [vmem:[#allocation35_spill] sm:$0xff] %v5760_v18  ;;  %v1576_v62 = vmul.f32 %v4489_v40, %v1575_v37  ;;  %v5768_v27 = vpop.permute.xlu1 %1942  ;;  %vm1588_vm15 = vweird.f32 %v4491_v44 }
 0x371   :  { %4492 = vrsqrt.f32 %v5750_v22  ;;  %v1185_v35 = vadd.f32 %v1184_v0, %v1071_v5  ;;  %7187 = vst [vmem:[#allocation36_spill] sm:$0xff] %v5768_v27  ;;  %vm1589_vm1 = vmor %vm1587_vm0, %vm1588_vm15  ;;  %vm1597_vm3 = vweird.f32 %v5750_v22 }
 0x372   :  { %v1583_v43 = vmul.f32 %v4491_v44, %v1582_v63  ;;  %v1074_v21 = vpop.f32.mrf.mxu0  ;;  %v1580_v31 = vsel %vm1579_vm14, %v4489_v40, %v1576_v62 }
 0x373   :  { %v1266_v6 = vsub.f32 %v1185_v35, %v1234_v29  ;;  %v1711_v17 = vmul.f32 %v1580_v31, %v5765_v41  ;;  %v5786_v35 = vld [vmem:[%s7108_s8 + $0xa8] sm:$0xff]  ;;  %v854_v31 = vpop.f32.mrf.mxu2 }
 0x374   :  { %v1584_v59 = vmul.f32 0.5, %v1583_v43  ;;  %v961_v1 = vpop.f32.mrf.mxu3  ;;  %7188 = vst [vmem:[#allocation37_spill] sm:$0xff] %v5786_v35 }
 0x375   :  { %v1298_v2 = vmax.f32 %v1266_v6, 0.0  ;;  %v5770_v46 = vadd.f32 %v961_v1, %v848_v58  ;;  %2017 = vperm.xlu0 %4400, %v1711_v17   ;;  %v1743_v0 = vmul.f32 %v1711_v17, %v5674_v9 }
 0x376   :  { %v1585_v5 = vsub.f32 1.5, %v1584_v59 }
 0x377   :  { %v5773_v37 = vpop.eup %4492  ;;  %v5775_v63 = vadd.f32 1e-05, %v1298_v2  ;;  %v1235_v40 = vmul.f32 %v5770_v46, %v5770_v46  ;;  %1827 = vrot.lane.b32.xlu1 %v1743_v0, %s4572_s12  ;;  %v5788_v2 = vpop.permute.xlu0 %1795 }
 0x378   :  { %v1592_v29 = vmul.f32 %v5773_v37, %v5750_v22  ;;  %v1187_v58 = vpop.f32.mrf.mxu1  ;;  %v1586_v9 = vmul.f32 %v4491_v44, %v1585_v5  ;;  %v1804_v59 = vpop.permute.xlu2 %1803  ;;  %vm1598_vm2 = vweird.f32 %v5773_v37  ;;  %v7192_v22 = vmov 0  }
 0x379   :  { %4494 = vrsqrt.f32 %v5775_v63  ;;  %v1188_v62 = vadd.f32 %v1187_v58, %v1074_v21  ;;  %v5795_v5 = vpop.permute.xlu1 %1799  ;;  %vm5821_vm5 = vmor %vm1597_vm3, %vm1598_vm2  ;;  %vm1607_vm6 = vweird.f32 %v5775_v63 }
 0x37a   :  { %v1593_v60 = vmul.f32 %v5773_v37, %v1592_v29  ;;  %v1590_v43 = vsel %vm1589_vm1, %v4491_v44, %v1586_v9  ;;  %v1077_v6 = vpop.f32.mrf.mxu0  ;;  %v1891_v29 = vsub.f32 %v5493_v54, %v1804_v59 }
 0x37b   :  { %v1267_v17 = vsub.f32 %v1188_v62, %v1235_v40  ;;  %v5793_v1 = vmul.f32 %v1590_v43, %v5786_v35 }
 0x37c   :  { %v1594_v0 = vmul.f32 0.5, %v1593_v60  ;;  %v964_v27 = vpop.f32.mrf.mxu3 }
 0x37d   :  { %v1299_v7 = vmax.f32 %v1267_v17, 0.0  ;;  %v5797_v49 = vadd.f32 %v964_v27, %v851_v36  ;;  %v1744_v21 = vmul.f32 %v5793_v1, %v5695_v20 }
 0x37e   :  { %v1595_v9 = vsub.f32 1.5, %v1594_v0  ;;  %v857_v0 = vpop.f32.mrf.mxu2 }
 0x37f   :  { %v4495_v44 = vpop.eup %4494  ;;  %v5802_v58 = vadd.f32 1e-05, %v1299_v7  ;;  %v1236_v40 = vmul.f32 %v5797_v49, %v5797_v49  ;;  %1829 = vrot.lane.b32.xlu0 %v1744_v21, %s4572_s12  ;;  %2149 = vperm.xlu1 %4403, %v1891_v29  }
 0x380   :  { %v1602_v62 = vmul.f32 %v4495_v44, %v5775_v63  ;;  %v1190_v60 = vpop.f32.mrf.mxu1  ;;  %v1596_v19 = vmul.f32 %v5773_v37, %v1595_v9  ;;  %vm1608_vm4 = vweird.f32 %v4495_v44 }
 0x381   :  { %4496 = vrsqrt.f32 %v5802_v58  ;;  %v1191_v27 = vadd.f32 %v1190_v60, %v1077_v6  ;;  %v1802_v36 = vpop.permute.xlu0 %1801  ;;  %vm1609_vm7 = vmor %vm1607_vm6, %vm1608_vm4  ;;  %vm1617_vm9 = vweird.f32 %v5802_v58 }
 0x382   :  { %v1603_v20 = vmul.f32 %v4495_v44, %v1602_v62  ;;  %v1890_v54 = vsub.f32 %v5462_v28, %v1802_v36  ;;  %v1080_v43 = vpop.f32.mrf.mxu0  ;;  %v5817_v28 = vpop.permute.xlu1 %1952  ;;  %v5831_v36 = vld [vmem:[%s7108_s8 + $0xb0] sm:$0xff] }
 0x383   :  { %v1268_v7 = vsub.f32 %v1191_v27, %v1236_v40  ;;  %7189 = vst [vmem:[#allocation38_spill] sm:$0xff] %v5817_v28 }
 0x384   :  { %v1604_v59 = vmul.f32 0.5, %v1603_v20  ;;  %2144 = vperm.xlu2 %4401, %v1890_v54   ;;  %v967_v17 = vpop.f32.mrf.mxu3  ;;  %v1600_v20 = vsel %vm5821_vm5, %v5773_v37, %v1596_v19  ;;  %v5839_v54 = vld [vmem:[%s7108_s8 + $0xb8] sm:$0xff] }
 0x385   :  { %v1300_v21 = vmax.f32 %v1268_v7, 0.0  ;;  %v5812_v29 = vadd.f32 %v967_v17, %v854_v31  ;;  %7193 = vst [vmem:[#allocation39_spill] sm:$0xff] %v5839_v54  ;;  %v1713_v45 = vmul.f32 %v1600_v20, %v5831_v36 }
 0x386   :  { %v1605_v6 = vsub.f32 1.5, %v1604_v59 }
 0x387   :  { %v4497_v62 = vpop.eup %4496  ;;  %v5815_v60 = vadd.f32 1e-05, %v1300_v21  ;;  %v1237_v40 = vmul.f32 %v5812_v29, %v5812_v29  ;;  %4404 = vset.pattern.permute.xlu1 %v7192_v22 }
 0x388   :  { %v1612_v31 = vmul.f32 %v4497_v62, %v5802_v58  ;;  %v1193_v27 = vpop.f32.mrf.mxu1  ;;  %v1606_v63 = vmul.f32 %v4495_v44, %v1605_v6  ;;  %vm1618_vm8 = vweird.f32 %v4497_v62  ;;  %v1745_v58 = vmul.f32 %v1713_v45, %v5722_v11 }
 0x389   :  { %4498 = vrsqrt.f32 %v5815_v60  ;;  %v1194_v7 = vadd.f32 %v1193_v27, %v1080_v43  ;;  %v860_v27 = vpop.f32.mrf.mxu2  ;;  %vm1619_vm10 = vmor %vm1617_vm9, %vm1618_vm8  ;;  %vm1627_vm13 = vweird.f32 %v5815_v60 }
 0x38a   :  { %v1613_v59 = vmul.f32 %v4497_v62, %v1612_v31  ;;  %v1610_v17 = vsel %vm1609_vm7, %v4495_v44, %v1606_v63  ;;  %v1083_v21 = vpop.f32.mrf.mxu0 }
 0x38b   :  { %v1269_v28 = vsub.f32 %v1194_v7, %v1237_v40  ;;  %v1714_v9 = vmul.f32 %v1610_v17, %v5839_v54 }
 0x38c   :  { %v1614_v19 = vmul.f32 0.5, %v1613_v59  ;;  %4402 = vset.pattern.permute.xlu2 %v7192_v22  ;;  %v970_v37 = vpop.f32.mrf.mxu3 }
 0x38d   :  { %v1301_v61 = vmax.f32 %v1269_v28, 0.0  ;;  %2027 = vperm.xlu2 %4402, %v1713_v45   ;;  %2032 = vperm.xlu1 %4404, %v1714_v9   ;;  %v5846_v6 = vadd.f32 %v970_v37, %v857_v0  ;;  %v5862_v0 = vld [vmem:[%s7108_s8 + $0xc0] sm:$0xff] }
 0x38e   :  { %v1615_v43 = vsub.f32 1.5, %v1614_v19 }
 0x38f   :  { %v5848_v31 = vpop.eup %4498  ;;  %v5850_v44 = vadd.f32 1e-05, %v1301_v61  ;;  %v1238_v40 = vmul.f32 %v5846_v6, %v5846_v6  ;;  %v5854_v20 = vpop.permute.xlu1 %1962 }
 0x390   :  { %7194 = vst [vmem:[#allocation40_spill] sm:$0xff] %v5854_v20  ;;  %v1622_v28 = vmul.f32 %v5848_v31, %v5815_v60  ;;  %v1196_v63 = vpop.f32.mrf.mxu1  ;;  %v1616_v7 = vmul.f32 %v4497_v62, %v1615_v43  ;;  %v1746_v20 = vmul.f32 %v1714_v9, %v5746_v47  ;;  %v7195_v43 = vmov 1   ;;  %v5904_v60 = vld [vmem:[%s7108_s8 + $0xd0] sm:$0xff] }
 0x391   :  { %4500 = vrsqrt.f32 %v5850_v44  ;;  %v1197_v61 = vadd.f32 %v1196_v63, %v1083_v21  ;;  %vm1628_vm11 = vweird.f32 %v5848_v31  ;;  %vm1637_vm14 = vweird.f32 %v5850_v44 }
 0x392   :  { %v1623_v59 = vmul.f32 %v5848_v31, %v1622_v28  ;;  %v1620_v17 = vsel %vm1619_vm10, %v4497_v62, %v1616_v7  ;;  %v1086_v19 = vpop.f32.mrf.mxu0  ;;  %v863_v28 = vpop.f32.mrf.mxu2  ;;  %vm5897_vm15 = vmor %vm1627_vm13, %vm1628_vm11 }
 0x393   :  { %v1270_v37 = vsub.f32 %v1197_v61, %v1238_v40  ;;  %v1715_v18 = vmul.f32 %v1620_v17, %v5862_v0 }
 0x394   :  { %v973_v57 = vpop.f32.mrf.mxu3  ;;  %v1624_v24 = vmul.f32 0.5, %v1623_v59 }
 0x395   :  { %v1302_v13 = vmax.f32 %v1270_v37, 0.0  ;;  %1831 = vrot.lane.b32.xlu2 %v1745_v58, %s4572_s12  ;;  %1833 = vrot.lane.b32.xlu1 %v1746_v20, %s4572_s12  ;;  %v5871_v21 = vadd.f32 %v973_v57, %v860_v27  ;;  %v1747_v61 = vmul.f32 %v1715_v18, %v5770_v46 }
 0x396   :  { %2037 = vperm.xlu0 %4400, %v1715_v18   ;;  %4405 = vset.pattern.permute.xlu2 %v7195_v43  ;;  %v1625_v63 = vsub.f32 1.5, %v1624_v24  ;;  %v5893_v18 = vpop.permute.xlu2 %1967 }
 0x397   :  { %v4501_v62 = vpop.eup %4500  ;;  %v5874_v40 = vadd.f32 1e-05, %v1302_v13  ;;  %v1239_v47 = vmul.f32 %v5871_v21, %v5871_v21  ;;  %v1806_v45 = vpop.permute.xlu1 %1805  ;;  %4409 = vset.pattern.permute.xlu1 %v7195_v43  ;;  %7196 = vst [vmem:[#allocation41_spill] sm:$0xff] %v5893_v18 }
 0x398   :  { %v1632_v11 = vmul.f32 %v4501_v62, %v5850_v44  ;;  %v1199_v9 = vpop.f32.mrf.mxu1  ;;  %v1892_v20 = vsub.f32 %v5516_v38, %v1806_v45  ;;  %v1626_v23 = vmul.f32 %v5848_v31, %v1625_v63  ;;  %vm1638_vm12 = vweird.f32 %v4501_v62  ;;  %v5912_v44 = vld [vmem:[%s7108_s8 + $0xc8] sm:$0xff] }
 0x399   :  { %4502 = vrsqrt.f32 %v5874_v40  ;;  %v1200_v57 = vadd.f32 %v1199_v9, %v1086_v19  ;;  %vm1639_vm0 = vmor %vm1637_vm14, %vm1638_vm12  ;;  %vm1647_vm1 = vweird.f32 %v5874_v40 }
 0x39a   :  { %v1633_v27 = vmul.f32 %v4501_v62, %v1632_v11 }
 0x39b   :  { %v1271_v7 = vsub.f32 %v1200_v57, %v1239_v47  ;;  %v1089_v17 = vpop.f32.mrf.mxu0  ;;  %v1630_v57 = vsel %vm5897_vm15, %v5848_v31, %v1626_v23 }
 0x39c   :  { %v1634_v13 = vmul.f32 0.5, %v1633_v27  ;;  %v976_v59 = vpop.f32.mrf.mxu3 }
 0x39d   :  { %v1303_v37 = vmax.f32 %v1271_v7, 0.0  ;;  %2154 = vperm.xlu2 %4405, %v1892_v20   ;;  %v5883_v58 = vadd.f32 %v976_v59, %v863_v28  ;;  %v866_v20 = vpop.f32.mrf.mxu2 }
 0x39e   :  { %v1635_v24 = vsub.f32 1.5, %v1634_v13  ;;  %1835 = vrot.lane.b32.xlu0 %v1747_v61, %s4572_s12 }
 0x39f   :  { %v4503_v19 = vpop.eup %4502  ;;  %v5889_v38 = vadd.f32 1e-05, %v1303_v37  ;;  %v1240_v46 = vmul.f32 %v5883_v58, %v5883_v58  ;;  %v5907_v28 = vpop.permute.xlu1 %1972 }
 0x3a0   :  { %v1642_v47 = vmul.f32 %v4503_v19, %v5874_v40  ;;  %v1202_v45 = vpop.f32.mrf.mxu1  ;;  %v1636_v9 = vmul.f32 %v4501_v62, %v1635_v24  ;;  %7199 = vst [vmem:[#allocation42_spill] sm:$0xff] %v5907_v28  ;;  %vm1648_vm2 = vweird.f32 %v4503_v19 }
 0x3a1   :  { %4504 = vrsqrt.f32 %v5889_v38  ;;  %v1203_v63 = vadd.f32 %v1202_v45, %v1089_v17  ;;  %v1716_v17 = vmul.f32 %v1630_v57, %v5912_v44  ;;  %vm1649_vm3 = vmor %vm1647_vm1, %vm1648_vm2  ;;  %vm1657_vm4 = vweird.f32 %v5889_v38 }
 0x3a2   :  { %v1643_v27 = vmul.f32 %v4503_v19, %v1642_v47  ;;  %v1640_v7 = vsel %vm1639_vm0, %v4501_v62, %v1636_v9  ;;  %v1810_v9 = vpop.permute.xlu2 %1809 }
 0x3a3   :  { %v1272_v13 = vsub.f32 %v1203_v63, %v1240_v46  ;;  %v5918_v61 = vmul.f32 %v1640_v7, %v5904_v60  ;;  %v1092_v31 = vpop.f32.mrf.mxu0  ;;  %v1748_v18 = vmul.f32 %v1716_v17, %v5797_v49 }
 0x3a4   :  { %v1644_v59 = vmul.f32 0.5, %v1643_v27  ;;  %v979_v37 = vpop.f32.mrf.mxu3 }
 0x3a5   :  { %v1304_v24 = vmax.f32 %v1272_v13, 0.0  ;;  %4406 = vset.pattern.permute.xlu2 %v7192_v22  ;;  %v5922_v45 = vadd.f32 %v979_v37, %v866_v20  ;;  %v1749_v11 = vmul.f32 %v5918_v61, %v5812_v29  ;;  %v5936_v29 = vld [vmem:[%s7108_s8 + $0xd8] sm:$0xff] }
 0x3a6   :  { %v1645_v23 = vsub.f32 1.5, %v1644_v59  ;;  %2042 = vperm.xlu2 %4406, %v1716_v17   ;;  %v869_v59 = vpop.f32.mrf.mxu2 }
 0x3a7   :  { %v4505_v62 = vpop.eup %4504  ;;  %v5927_v46 = vadd.f32 1e-05, %v1304_v24  ;;  %v1241_v47 = vmul.f32 %v5922_v45, %v5922_v45  ;;  %1839 = vrot.lane.b32.xlu1 %v1749_v11, %s4572_s12 }
 0x3a8   :  { %v1652_v63 = vmul.f32 %v4505_v62, %v5889_v38  ;;  %v1205_v57 = vpop.f32.mrf.mxu1  ;;  %v1646_v40 = vmul.f32 %v4503_v19, %v1645_v23  ;;  %vm1658_vm5 = vweird.f32 %v4505_v62 }
 0x3a9   :  { %4506 = vrsqrt.f32 %v5927_v46  ;;  %v1206_v27 = vadd.f32 %v1205_v57, %v1092_v31  ;;  %v1812_v20 = vpop.permute.xlu1 %1811  ;;  %vm1659_vm6 = vmor %vm1657_vm4, %vm1658_vm5  ;;  %vm1667_vm7 = vweird.f32 %v5927_v46 }
 0x3aa   :  { %v1653_v7 = vmul.f32 %v4505_v62, %v1652_v63  ;;  %v1650_v13 = vsel %vm1649_vm3, %v4503_v19, %v1646_v40  ;;  %v1895_v35 = vsub.f32 %v5587_v50, %v1812_v20  ;;  %v1894_v40 = vsub.f32 %v5567_v3, %v1810_v9 }
 0x3ab   :  { %v1273_v37 = vsub.f32 %v1206_v27, %v1241_v47  ;;  %v1718_v24 = vmul.f32 %v1650_v13, %v5936_v29  ;;  %v1095_v19 = vpop.f32.mrf.mxu0 }
 0x3ac   :  { %v1654_v11 = vmul.f32 0.5, %v1653_v7  ;;  %v982_v28 = vpop.f32.mrf.mxu3 }
 0x3ad   :  { %v1305_v34 = vmax.f32 %v1273_v37, 0.0  ;;  %v1750_v23 = vmul.f32 %v1718_v24, %v5846_v6  ;;  %v5943_v54 = vadd.f32 %v982_v28, %v869_v59 }
 0x3ae   :  { %v1655_v16 = vsub.f32 1.5, %v1654_v11  ;;  %1837 = vrot.lane.b32.xlu2 %v1748_v18, %s4572_s12  ;;  %v5952_v18 = vpop.permute.xlu2 %1977 }
 0x3af   :  { %v4507_v31 = vpop.eup %4506  ;;  %v1369_v47 = vadd.f32 1e-05, %v1305_v34  ;;  %2169 = vperm.xlu1 %4409, %v1895_v35   ;;  %1841 = vrot.lane.b32.xlu0 %v1750_v23, %s4572_s12  ;;  %v1242_v49 = vmul.f32 %v5943_v54, %v5943_v54  ;;  %v5959_v34 = vld [vmem:[%s7108_s8 + $0xe0] sm:$0xff] }
 0x3b0   :  { %v1662_v50 = vmul.f32 %v4507_v31, %v5927_v46  ;;  %4407 = vset.pattern.permute.xlu2 %v7195_v43  ;;  %v1656_v6 = vmul.f32 %v4505_v62, %v1655_v16  ;;  %v1208_v28 = vpop.f32.mrf.mxu1  ;;  %vm1668_vm8 = vweird.f32 %v4507_v31  ;;  %v5980_v46 = vld [vmem:[%s7108_s8 + $0xf0] sm:$0xff] }
 0x3b1   :  { %4508 = vrsqrt.f32 %v1369_v47  ;;  %v1209_v38 = vadd.f32 %v1208_v28, %v1095_v19  ;;  %v5954_v63 = vpop.permute.xlu1 %1982  ;;  %vm1677_vm9 = vweird.f32 %v1369_v47  ;;  %vm5969_vm11 = vmor %vm1667_vm7, %vm1668_vm8 }
 0x3b2   :  { %v1663_v17 = vmul.f32 %v4507_v31, %v1662_v50  ;;  %v1660_v35 = vsel %vm1659_vm6, %v4505_v62, %v1656_v6  ;;  %v5966_v62 = vpop.permute.xlu0 %1807  ;;  %v5985_v6 = vld [vmem:[%s7108_s8 + $0xe8] sm:$0xff] }
 0x3b3   :  { %v1274_v57 = vsub.f32 %v1209_v38, %v1242_v49  ;;  %v1719_v16 = vmul.f32 %v1660_v35, %v5959_v34 }
 0x3b4   :  { %v1664_v27 = vmul.f32 0.5, %v1663_v17 }
 0x3b5   :  { %v1306_v20 = vmax.f32 %v1274_v57, 0.0 }
 0x3b6   :  { %2164 = vperm.xlu2 %4407, %v1894_v40   ;;  %v1665_v13 = vsub.f32 1.5, %v1664_v27  ;;  %v5964_v11 = vpop.permute.xlu2 %1992 }
 0x3b7   :  { %v4509_v7 = vpop.eup %4508  ;;  %4410 = vset.pattern.permute.xlu1 %v7192_v22  ;;  %2057 = vperm.xlu0 %4400, %v1719_v16   ;;  %v1370_v37 = vadd.f32 1e-05, %v1306_v20 }
 0x3b8   :  { %v1672_v59 = vmul.f32 %v4509_v7, %v1369_v47  ;;  %2052 = vperm.xlu1 %4410, %v1718_v24   ;;  %vm1678_vm10 = vweird.f32 %v4509_v7  ;;  %v1666_v19 = vmul.f32 %v4507_v31, %v1665_v13 }
 0x3b9   :  { %v1816_v9 = vpop.permute.xlu1 %1815  ;;  %4510 = vrsqrt.f32 %v1370_v37  ;;  %vm1679_vm12 = vmor %vm1677_vm9, %vm1678_vm10  ;;  %vm1687_vm13 = vweird.f32 %v1370_v37 }
 0x3ba   :  { %v1673_v23 = vmul.f32 %v4509_v7, %v1672_v59  ;;  %v1897_v50 = vsub.f32 %v5627_v52, %v1816_v9  ;;  %v1670_v28 = vsel %vm5969_vm11, %v4507_v31, %v1666_v19 }
 0x3bb   :  { %v1720_v35 = vmul.f32 %v1670_v28, %v5985_v6 }
 0x3bc   :  { %v1674_v3 = vmul.f32 0.5, %v1673_v23  ;;  %v1751_v23 = vmul.f32 %v1719_v16, %v5871_v21  ;;  %v6016_v16 = vld [vmem:[%s7108_s8 + $0xf8] sm:$0xff] }
 0x3bd   :  { %v1752_v31 = vmul.f32 %v1720_v35, %v5883_v58 }
 0x3be   :  { %v1675_v24 = vsub.f32 1.5, %v1674_v3  ;;  %4408 = vset.pattern.permute.xlu2 %v7192_v22  ;;  %v1818_v57 = vpop.permute.xlu2 %1817 }
 0x3bf   :  { %2047 = vperm.xlu2 %4408, %v5918_v61   ;;  %v4511_v52 = vpop.eup %4510  ;;  %v1814_v61 = vpop.permute.xlu0 %1813 }
 0x3c0   :  { %4412 = vset.pattern.permute.xlu1 %v7195_v43  ;;  %v1676_v47 = vmul.f32 %v4509_v7, %v1675_v24  ;;  %v1682_v40 = vmul.f32 %v4511_v52, %v1370_v37  ;;  %v1896_v20 = vsub.f32 %v5607_v14, %v1814_v61  ;;  %vm1688_vm14 = vweird.f32 %v4511_v52 }
 0x3c1   :  { %2179 = vperm.xlu1 %4412, %v1897_v50   ;;  %vm1689_vm15 = vmor %vm1687_vm13, %vm1688_vm14 }
 0x3c2   :  { %v1680_v38 = vsel %vm1679_vm12, %v4509_v7, %v1676_v47  ;;  %v1683_v13 = vmul.f32 %v4511_v52, %v1682_v40 }
 0x3c3   :  { %v1721_v17 = vmul.f32 %v1680_v38, %v5980_v46 }
 0x3c4   :  { %v1684_v7 = vmul.f32 0.5, %v1683_v13 }
 0x3c5   :  { %v1753_v27 = vmul.f32 %v1721_v17, %v5922_v45  ;;  %v1898_v45 = vsub.f32 %v5643_v39, %v1818_v57 }
 0x3c6   :  { %v5998_v59 = vpop.permute.xlu2 %1819  ;;  %v1685_v14 = vsub.f32 1.5, %v1684_v7 }
 0x3c7   :  { %4411 = vset.pattern.permute.xlu2 %v7195_v43  ;;  %1847 = vrot.lane.b32.xlu0 %v1753_v27, %s4572_s12  ;;  %v1988_v24 = vpop.permute.xlu0 %1987 }
 0x3c8   :  { %2174 = vperm.xlu2 %4411, %v1896_v20   ;;  %v1686_v58 = vmul.f32 %v4511_v52, %v1685_v14 }
 0x3c9   :  { %1845 = vrot.lane.b32.xlu1 %v1752_v31, %s4572_s12 }
 0x3ca   :  { %4414 = vset.pattern.permute.xlu1 %v7192_v22  ;;  %v1690_v39 = vsel %vm1689_vm15, %v4511_v52, %v1686_v58 }
 0x3cb   :  { %v1722_v37 = vmul.f32 %v1690_v39, %v6016_v16 }
 0x3ce   :  { %v6005_v3 = vpop.permute.xlu2 %1825 }
 0x3cf   :  { %1997 = vperm.xlu0 %4400, %v5682_v8   ;;  %v4560_v8 = vld [vmem:[%s7108_s8 + $0x20] sm:$0xff] }
 0x3d0   :  { %1843 = vrot.lane.b32.xlu2 %v1751_v23, %s4572_s12  ;;  %v1887_v21 = vsub.f32 %v4560_v8, %v5788_v2  ;;  %v1754_v2 = vmul.f32 %v1722_v37, %v5943_v54 }
 0x3d1   :  { %2067 = vperm.xlu1 %4414, %v1721_v17   ;;  %4413 = vset.pattern.permute.xlu2 %v7192_v22  ;;  %v6024_v19 = vpop.permute.xlu1 %1821 }
 0x3d7   :  { %4423 = vset.pattern.permute.xlu0 %v7195_v43 }
 0x3d8   :  { %2062 = vperm.xlu2 %4413, %v1720_v35   ;;  %2184 = vperm.xlu0 %4423, %v1898_v45  }
 0x3d9   :  { %4415 = vset.pattern.permute.xlu1 %v7195_v43  ;;  %v6030_v28 = vpop.permute.xlu0 %1823 }
 0x3da   :  { %2129 = vperm.xlu1 %4415, %v1887_v21  }
 0x3de   :  { %v6019_v9 = vpop.permute.xlu2 %2144 }
 0x3e0   :  { %2072 = vperm.xlu2 %4413, %v1722_v37  }
 0x3e2   :  { %4418 = vset.pattern.permute.xlu1 %v7192_v22 }
 0x3e3   :  { %1932 = vperm.xlu1 %4418, %v5355_v53   ;;  %v4561_v53 = vld [vmem:[%s7108_s8 + $0x28] sm:$0xff] }
 0x3e4   :  { %v1888_v54 = vsub.f32 %v4561_v53, %v5701_v4 }
 0x3e7   :  { %v6026_v49 = vpop.permute.xlu2 %2027 }
 0x3e8   :  { %1849 = vrot.lane.b32.xlu2 %v1754_v2, %s4572_s12 }
 0x3e9   :  { %v1828_v50 = vpop.permute.xlu1 %1827 }
 0x3ea   :  { %v1903_v52 = vsub.f32 %v5765_v41, %v1828_v50 }
 0x3eb   :  { %2012 = vperm.xlu1 %4418, %v5742_v12   ;;  %v6041_v12 = vpop.permute.xlu0 %2017 }
 0x3ef   :  { %v1832_v47 = vpop.permute.xlu2 %1831 }
 0x3f0   :  { %2022 = vperm.xlu2 %4413, %v5793_v1   ;;  %v1905_v1 = vsub.f32 %v5831_v36, %v1832_v47 }
 0x3f1   :  { %v6045_v41 = vpop.permute.xlu1 %2149 }
 0x3f3   :  { %4419 = vset.pattern.permute.xlu1 %v7195_v43  ;;  %v6047_v61 = vpop.permute.xlu0 %1829 }
 0x3f4   :  { %2209 = vperm.xlu1 %4419, %v1903_v52  }
 0x3f7   :  { %v6039_v38 = vpop.permute.xlu2 %2154 }
 0x3f8   :  { %4416 = vset.pattern.permute.xlu2 %v7195_v43 }
 0x3f9   :  { %2134 = vperm.xlu2 %4416, %v1888_v54   ;;  %v2089_v54 = vmul.f32 %v1988_v24, %v4927_v42 }
 0x3fc   :  { %2219 = vperm.xlu1 %4419, %v1905_v1   ;;  %v4563_v1 = vld [vmem:[%s7108_s8 + $0x50] sm:$0xff] }
 0x3ff   :  { %v6053_v4 = vpop.permute.xlu1 %2032 }
 0x400   :  { %v6049_v17 = vpop.permute.xlu2 %2042 }
 0x401   :  { %4417 = vset.pattern.permute.xlu2 %v7192_v22 }
 0x402   :  { %1927 = vperm.xlu2 %4417, %v5324_v51  }
 0x407   :  { %v6062_v27 = vpop.permute.xlu1 %1833 }
 0x408   :  { %v6055_v35 = vpop.permute.xlu0 %2037  ;;  %v6057_v57 = vpop.permute.xlu2 %1837 }
 0x40a   :  { %2007 = vperm.xlu2 %4417, %v5717_v33  }
 0x410   :  { %v1836_v36 = vpop.permute.xlu0 %1835  ;;  %v6060_v40 = vpop.permute.xlu2 %2164 }
 0x411   :  { %v1907_v20 = vsub.f32 %v5862_v0, %v1836_v36  ;;  %v2087_v36 = vmul.f32 %v5952_v18, %v4903_v25 }
 0x412   :  { %4420 = vset.pattern.permute.xlu2 %v7195_v43 }
 0x413   :  { %2229 = vperm.xlu1 %4419, %v1907_v20   ;;  %v2088_v20 = vmul.f32 %v5954_v63, %v4910_v30 }
 0x419   :  { %v6066_v31 = vpop.permute.xlu2 %2047  ;;  %v1840_v51 = vpop.permute.xlu1 %1839 }
 0x41a   :  { %v1909_v13 = vsub.f32 %v5904_v60, %v1840_v51 }
 0x41c   :  { %2239 = vperm.xlu1 %4419, %v1909_v13  }
 0x421   :  { %v2170_v7 = vpop.permute.xlu1 %2169  ;;  %v1842_v14 = vpop.permute.xlu0 %1841 }
 0x422   :  { %v2175_v23 = vpop.permute.xlu2 %2174  ;;  %v1910_v30 = vsub.f32 %v5936_v29, %v1842_v14 }
 0x423   :  { %v2280_v42 = vadd.f32 %v2175_v23, %v2088_v20  ;;  %v7206_v20 = vld [vmem:[#allocation33_spill] sm:$0xff] }
 0x425   :  { %vm2312_vm2 = vcmp.ge.f32.partialorder %v2280_v42, 0.0 }
 0x429   :  { %v6072_v8 = vpop.permute.xlu0 %2057 }
 0x42a   :  { %v6069_v33 = vpop.permute.xlu1 %2052  ;;  %v1844_v58 = vpop.permute.xlu2 %1843 }
 0x42b   :  { %v1911_v45 = vsub.f32 %v5959_v34, %v1844_v58  ;;  %v4562_v34 = vld [vmem:[%s7108_s8 + $0x18] sm:$0xff] }
 0x42c   :  { %v1886_v52 = vsub.f32 %v4562_v34, %v5744_v32  ;;  %v2279_v32 = vadd.f32 %v2170_v7, %v2087_v36 }
 0x42d   :  { %2249 = vperm.xlu1 %4419, %v1911_v45   ;;  %v2344_v45 = vmul.f32 0.2, %v2280_v42 }
 0x42e   :  { %v2343_v58 = vmul.f32 0.2, %v2279_v32  ;;  %vm2311_vm1 = vcmp.ge.f32.partialorder %v2279_v32, 0.0 }
 0x432   :  { %v6074_v0 = vpop.permute.xlu2 %2062 }
 0x433   :  { %v2180_v21 = vpop.permute.xlu1 %2179 }
 0x434   :  { %v2281_v51 = vadd.f32 %v2180_v21, %v2089_v54  ;;  %v1908_v21 = vsub.f32 %v5912_v44, %v6057_v57  ;;  %v4565_v44 = vld [vmem:[%s7108_s8 + $0x30] sm:$0xff]  ;;  %v7204_v54 = vld [vmem:[#allocation37_spill] sm:$0xff] }
 0x435   :  { %v1889_v57 = vsub.f32 %v4565_v44, %v5795_v5  ;;  %v4567_v5 = vld [vmem:[%s7108_s8 + $0x80] sm:$0xff] }
 0x436   :  { %v2345_v24 = vmul.f32 0.2, %v2281_v51  ;;  %vm2313_vm0 = vcmp.ge.f32.partialorder %v2281_v51, 0.0 }
 0x439   :  { %v1848_v39 = vpop.permute.xlu0 %1847 }
 0x43a   :  { %v1913_v37 = vsub.f32 %v5980_v46, %v1848_v39  ;;  %v6077_v2 = vpop.permute.xlu2 %2072 }
 0x43b   :  { %v1846_v60 = vpop.permute.xlu1 %1845 }
 0x43c   :  { %v1912_v50 = vsub.f32 %v5985_v6, %v1846_v60  ;;  %2259 = vperm.xlu2 %4420, %v1913_v37   ;;  %v1893_v6 = vsub.f32 %v4563_v1, %v5966_v62  ;;  %v1901_v62 = vsub.f32 %v5712_v10, %v6030_v28  ;;  %v6106_v10 = vld [vmem:[%s7109_s9] ss:$0 sm:$0xff]  ;;  %v2376_v28 = vsel %vm2312_vm2, %v2280_v42, %v2344_v45  ;;  %v4564_v37 = vld [vmem:[%s7108_s8 + $0x8] sm:$0xff] }
 0x43d   :  { %v1884_v60 = vsub.f32 %v4564_v37, %v5756_v55  ;;  %v7203_v55 = vld [vmem:[#allocation39_spill] sm:$0xff] }
 0x43e   :  { %2254 = vperm.xlu0 %4423, %v1912_v50   ;;  %v1906_v34 = vsub.f32 %v7203_v55, %v6062_v27  ;;  %v4568_v27 = vld [vmem:[%s7108_s8 + $0x10] sm:$0xff] }
 0x441   :  { %v6080_v47 = vpop.permute.xlu0 %1997 }
 0x442   :  { %v1850_v53 = vpop.permute.xlu2 %1849 }
 0x443   :  { %v1914_v46 = vsub.f32 %v6016_v16, %v1850_v53  ;;  %v2090_v16 = vmul.f32 %v5964_v11, %v4932_v48  ;;  %v2377_v48 = vsel %vm2313_vm0, %v2281_v51, %v2345_v24  ;;  %v2375_v11 = vsel %vm2311_vm1, %v2279_v32, %v2343_v58 }
 0x444   :  { %2124 = vperm.xlu2 %4420, %v1886_v52   ;;  %v2412_v29 = vmul.f32 %v6106_v10, %v2377_v48  ;;  %v2410_v14 = vmul.f32 %v6106_v10, %v2375_v11  ;;  %v2068_v52 = vpop.permute.xlu1 %2067  ;;  %v1899_v53 = vsub.f32 %v4567_v5, %v5998_v59  ;;  %v1902_v51 = vsub.f32 %v7206_v20, %v6005_v3  ;;  %v7209_v11 = vld [vmem:[#allocation26_spill] sm:$0xff]  ;;  %v7216_v5 = vld [vmem:[#allocation27_spill] sm:$0xff] }
 0x445   :  { %2264 = vperm.xlu1 %4419, %v1914_v46   ;;  %v1904_v46 = vsub.f32 %v7204_v54, %v6047_v61  ;;  %v4569_v61 = vld [vmem:[%s7108_s8 + $0x88] sm:$0xff] }
 0x446   :  { %2159 = vperm.xlu0 %4423, %v1893_v6   ;;  %v7205_v6 = vld [vmem:[#allocation30_spill] sm:$0xff]  ;;  %v1900_v42 = vsub.f32 %v4569_v61, %v6024_v19 }
 0x447   :  { %v1885_v36 = vsub.f32 %v4568_v27, %v7205_v6  ;;  %v7208_v19 = vld [vmem:[#allocation42_spill] sm:$0xff]  ;;  %v7218_v27 = vld [vmem:[#allocation41_spill] sm:$0xff] }
 0x44a   :  { %v2185_v13 = vpop.permute.xlu0 %2184 }
 0x44b   :  { %v2282_v25 = vadd.f32 %v2185_v13, %v2090_v16  ;;  %v6157_v16 = vpop.permute.xlu2 %2022 }
 0x44c   :  { %4421 = vset.pattern.permute.xlu2 %v7192_v22  ;;  %v6140_v1 = vpop.permute.xlu1 %2129 }
 0x44d   :  { %vm2314_vm3 = vcmp.ge.f32.partialorder %v2282_v25, 0.0  ;;  %v2346_v18 = vmul.f32 0.2, %v2282_v25  ;;  %1917 = vperm.xlu2 %4421, %v5259_v15   ;;  %2199 = vperm.xlu1 %4419, %v1901_v62   ;;  %v2411_v15 = vmul.f32 %v6106_v10, %v2376_v28  ;;  %v2105_v28 = vmul.f32 %v2068_v52, %v7209_v11 }
 0x44e   :  { %2244 = vperm.xlu0 %4423, %v1910_v30   ;;  %v7207_v30 = vld [vmem:[#allocation13_spill] sm:$0xff] }
 0x44f   :  { %v2378_v63 = vsel %vm2314_vm3, %v2282_v25, %v2346_v18  ;;  %v2436_v39 = vpack.c.bf16 %v2411_v15, %v2410_v14  ;;  %v2086_v18 = vmul.f32 %v7208_v19, %v7207_v30 }
 0x450   :  { %v2413_v7 = vmul.f32 %v6106_v10, %v2378_v63 }
 0x451   :  { %v2278_v15 = vadd.f32 %v6060_v40, %v2086_v18  ;;  %v2106_v40 = vmul.f32 %v6077_v2, %v7216_v5 }
 0x452   :  { %v2437_v23 = vpack.c.bf16 %v2413_v7, %v2412_v29  ;;  %v7210_v7 = vld [vmem:[#allocation10_spill] sm:$0xff] }
 0x453   :  { %v6162_v13 = vpop.permute.xlu2 %2134  ;;  %v2342_v52 = vmul.f32 0.2, %v2278_v15  ;;  %vm2310_vm4 = vcmp.ge.f32.partialorder %v2278_v15, 0.0 }
 0x454   :  { %2542 = vmatpush.bf16.msrb.mxu2 %v2437_v23  ;;  %v7211_v23 = vld [vmem:[#allocation35_spill] sm:$0xff] }
 0x455   :  { %2002 = vperm.xlu2 %4421, %v5691_v56   ;;  %4422 = vset.pattern.permute.xlu1 %v7192_v22  ;;  %v7202_v56 = vld [vmem:[#allocation32_spill] sm:$0xff]  ;;  %v6147_v59 = vpop.permute.xlu1 %1932  ;;  %v2083_v14 = vmul.f32 %v7211_v23, %v7210_v7  ;;  %v2374_v2 = vsel %vm2310_vm4, %v2278_v15, %v2342_v52 }
 0x456   :  { %2234 = vperm.xlu0 %4423, %v1908_v21   ;;  %1922 = vperm.xlu1 %4422, %v5293_v26   ;;  %v4566_v26 = vld [vmem:[%s7108_s8] sm:$0xff]  ;;  %v7212_v21 = vld [vmem:[#allocation11_spill] sm:$0xff]  ;;  %v2409_v15 = vmul.f32 %v6106_v10, %v2374_v2 }
 0x457   :  { %v1883_v50 = vsub.f32 %v4566_v26, %v7202_v56  ;;  %v2275_v26 = vadd.f32 %v6045_v41, %v2083_v14 }
 0x458   :  { %2543 = vmatpush.bf16.msrb.mxu2 %v2436_v39  ;;  %v7213_v39 = vld [vmem:[#allocation40_spill] sm:$0xff] }
 0x459   :  { %v2084_v37 = vmul.f32 %v7213_v39, %v7212_v21  ;;  %vm2307_vm5 = vcmp.ge.f32.partialorder %v2275_v26, 0.0 }
 0x45b   :  { %v2276_v56 = vadd.f32 %v6039_v38, %v2084_v37 }
 0x45c   :  { %v6166_v3 = vpop.permute.xlu2 %1927 }
 0x45d   :  { %4425 = vset.pattern.permute.xlu2 %v7195_v43  ;;  %v6151_v32 = vpop.permute.xlu1 %2012  ;;  %vm2308_vm7 = vcmp.ge.f32.partialorder %v2276_v56, 0.0  ;;  %v2340_v38 = vmul.f32 0.2, %v2276_v56 }
 0x45e   :  { %2139 = vperm.xlu0 %4423, %v1889_v57   ;;  %2114 = vperm.xlu2 %4425, %v1884_v60   ;;  %v7214_v60 = vld [vmem:[#allocation25_spill] sm:$0xff] }
 0x45f   :  { %4424 = vset.pattern.permute.xlu1 %v7195_v43  ;;  %v2104_v44 = vmul.f32 %v6074_v0, %v7214_v60  ;;  %v2339_v0 = vmul.f32 0.2, %v2275_v26 }
 0x460   :  { %2109 = vperm.xlu1 %4424, %v1883_v50   ;;  %v7215_v50 = vld [vmem:[#allocation24_spill] sm:$0xff] }
 0x461   :  { %v2103_v55 = vmul.f32 %v6072_v8, %v7215_v50  ;;  %v2371_v39 = vsel %vm2307_vm5, %v2275_v26, %v2339_v0  ;;  %v7221_v50 = vld [vmem:[#allocation20_spill] sm:$0xff] }
 0x464   :  { %v6170_v45 = vpop.permute.xlu2 %2007 }
 0x466   :  { %2224 = vperm.xlu0 %4423, %v1906_v34   ;;  %4428 = vset.pattern.permute.xlu2 %v7192_v22  ;;  %v6159_v24 = vpop.permute.xlu1 %2209 }
 0x468   :  { %2189 = vperm.xlu1 %4424, %v1899_v53  }
 0x46e   :  { %2214 = vperm.xlu0 %4423, %v1904_v46   ;;  %v6164_v62 = vpop.permute.xlu1 %2219  ;;  %v7217_v46 = vld [vmem:[#allocation12_spill] sm:$0xff] }
 0x46f   :  { %v2085_v6 = vmul.f32 %v7218_v27, %v7217_v46 }
 0x470   :  { %4427 = vset.pattern.permute.xlu1 %v7192_v22 }
 0x476   :  { %2119 = vperm.xlu0 %4423, %v1885_v36  }
 0x47e   :  { %2204 = vperm.xlu0 %4423, %v1902_v51   ;;  %v7219_v51 = vld [vmem:[#allocation22_spill] sm:$0xff] }
 0x47f   :  { %v2101_v61 = vmul.f32 %v6066_v31, %v7219_v51  ;;  %v2372_v31 = vsel %vm2308_vm7, %v2276_v56, %v2340_v38 }
 0x480   :  { %v2407_v52 = vmul.f32 %v6106_v10, %v2372_v31 }
 0x485   :  { %v6168_v58 = vpop.permute.xlu1 %2229 }
 0x486   :  { %2194 = vperm.xlu0 %4423, %v1900_v42  }
 0x48e   :  { %4426 = vset.pattern.permute.xlu0 %v7192_v22  ;;  %v2240_v25 = vpop.permute.xlu1 %2239 }
 0x496   :  { %v2260_v48 = vpop.permute.xlu2 %2259 }
 0x497   :  { %v2297_v57 = vadd.f32 %v2260_v48, %v2105_v28  ;;  %v2293_v48 = vadd.f32 %v2240_v25, %v2101_v61  ;;  %v7220_v25 = vld [vmem:[#allocation23_spill] sm:$0xff] }
 0x498   :  { %v2102_v37 = vmul.f32 %v6069_v33, %v7220_v25  ;;  %v2406_v33 = vmul.f32 %v6106_v10, %v2371_v39  ;;  %v7230_v39 = vld [vmem:[#allocation34_spill] sm:$0xff] }
 0x499   :  { %v2361_v53 = vmul.f32 0.2, %v2297_v57  ;;  %vm2329_vm6 = vcmp.ge.f32.partialorder %v2297_v57, 0.0  ;;  %v2357_v60 = vmul.f32 0.2, %v2293_v48  ;;  %vm2325_vm12 = vcmp.ge.f32.partialorder %v2293_v48, 0.0 }
 0x49a   :  { %v2434_v27 = vpack.c.bf16 %v2407_v52, %v2406_v33 }
 0x49b   :  { %v2393_v18 = vsel %vm2329_vm6, %v2297_v57, %v2361_v53  ;;  %v2389_v46 = vsel %vm2325_vm12, %v2293_v48, %v2357_v60 }
 0x49e   :  { %v6214_v51 = vpop.permute.xlu2 %2124 }
 0x49f   :  { %v2250_v63 = vpop.permute.xlu1 %2249 }
 0x4a0   :  { %v2295_v54 = vadd.f32 %v2250_v63, %v2103_v55  ;;  %v2099_v55 = vmul.f32 %v6055_v35, %v7221_v50 }
 0x4a2   :  { %v2359_v30 = vmul.f32 0.2, %v2295_v54  ;;  %vm2327_vm10 = vcmp.ge.f32.partialorder %v2295_v54, 0.0  ;;  %v2291_v26 = vadd.f32 %v6168_v58, %v2099_v55  ;;  %v7223_v58 = vld [vmem:[#allocation9_spill] sm:$0xff] }
 0x4a4   :  { %v2391_v21 = vsel %vm2327_vm10, %v2295_v54, %v2359_v30  ;;  %vm2323_vm14 = vcmp.ge.f32.partialorder %v2291_v26, 0.0 }
 0x4b0   :  { %v2255_v29 = vpop.permute.xlu0 %2254 }
 0x4b1   :  { %v2296_v34 = vadd.f32 %v2255_v29, %v2104_v44  ;;  %v2428_v29 = vmul.f32 %v6106_v10, %v2393_v18  ;;  %v7226_v18 = vld [vmem:[#allocation36_spill] sm:$0xff] }
 0x4b3   :  { %v2360_v36 = vmul.f32 0.2, %v2296_v34  ;;  %vm2328_vm8 = vcmp.ge.f32.partialorder %v2296_v34, 0.0 }
 0x4b5   :  { %v2392_v28 = vsel %vm2328_vm8, %v2296_v34, %v2360_v36  ;;  %v2355_v36 = vmul.f32 0.2, %v2291_v26 }
 0x4b6   :  { %v2427_v57 = vmul.f32 %v6106_v10, %v2392_v28  ;;  %v7228_v28 = vld [vmem:[#allocation31_spill] sm:$0xff] }
 0x4b7   :  { %v2265_v41 = vpop.permute.xlu1 %2264 }
 0x4b8   :  { %v2298_v20 = vadd.f32 %v2265_v41, %v2106_v40  ;;  %v2160_v8 = vpop.permute.xlu0 %2159  ;;  %v2426_v40 = vmul.f32 %v6106_v10, %v2391_v21  ;;  %v7222_v41 = vld [vmem:[#allocation21_spill] sm:$0xff]  ;;  %v7229_v21 = vld [vmem:[#allocation8_spill] sm:$0xff] }
 0x4b9   :  { %v2277_v42 = vadd.f32 %v2160_v8, %v2085_v6  ;;  %v2424_v6 = vmul.f32 %v6106_v10, %v2389_v46  ;;  %v2100_v38 = vmul.f32 %v6049_v17, %v7222_v41  ;;  %v7227_v17 = vld [vmem:[#allocation6_spill] sm:$0xff]  ;;  %v2081_v25 = vmul.f32 %v7230_v39, %v7229_v21 }
 0x4ba   :  { %vm2330_vm9 = vcmp.ge.f32.partialorder %v2298_v20, 0.0  ;;  %v2362_v19 = vmul.f32 0.2, %v2298_v20  ;;  %v2444_v54 = vpack.c.bf16 %v2427_v57, %v2426_v40  ;;  %v7231_v57 = vld [vmem:[#allocation18_spill] sm:$0xff] }
 0x4bb   :  { %vm2309_vm11 = vcmp.ge.f32.partialorder %v2277_v42, 0.0  ;;  %v2341_v63 = vmul.f32 0.2, %v2277_v42  ;;  %v2097_v50 = vmul.f32 %v6026_v49, %v7231_v57  ;;  %v7238_v57 = vld [vmem:[#allocation4_spill] sm:$0xff] }
 0x4bc   :  { %v2394_v11 = vsel %vm2330_vm9, %v2298_v20, %v2362_v19  ;;  %v7224_v20 = vld [vmem:[#allocation38_spill] sm:$0xff]  ;;  %v7225_v19 = vld [vmem:[#allocation7_spill] sm:$0xff] }
 0x4bd   :  { %v2429_v7 = vmul.f32 %v6106_v10, %v2394_v11  ;;  %v2373_v23 = vsel %vm2309_vm11, %v2277_v42, %v2341_v63  ;;  %v2082_v8 = vmul.f32 %v7224_v20, %v7223_v58  ;;  %v2080_v48 = vmul.f32 %v7226_v18, %v7225_v19  ;;  %v7234_v18 = vld [vmem:[#allocation17_spill] sm:$0xff] }
 0x4be   :  { %v2408_v14 = vmul.f32 %v6106_v10, %v2373_v23  ;;  %v2387_v11 = vsel %vm2323_vm14, %v2291_v26, %v2355_v36 }
 0x4bf   :  { %v2445_v44 = vpack.c.bf16 %v2429_v7, %v2428_v29  ;;  %v2274_v30 = vadd.f32 %v6019_v9, %v2082_v8  ;;  %v2079_v29 = vmul.f32 %v7228_v28, %v7227_v17  ;;  %v2272_v7 = vadd.f32 %v6162_v13, %v2080_v48 }
 0x4c0   :  { %v2245_v34 = vpop.permute.xlu0 %2244  ;;  %v2435_v56 = vpack.c.bf16 %v2409_v15, %v2408_v14  ;;  %v6222_v14 = vpop.permute.xlu1 %2199  ;;  %v2422_v15 = vmul.f32 %v6106_v10, %v2387_v11  ;;  %v2096_v48 = vmul.f32 %v6157_v16, %v7234_v18  ;;  %v7242_v18 = vld [vmem:[#allocation28_spill] sm:$0xff] }
 0x4c1   :  { %v2294_v5 = vadd.f32 %v2245_v34, %v2102_v37  ;;  %2591 = vmatpush.bf16.msrb.mxu3 %v2445_v44  ;;  %v2338_v31 = vmul.f32 0.2, %v2274_v30  ;;  %vm2306_vm0 = vcmp.ge.f32.partialorder %v2274_v30, 0.0  ;;  %v2271_v37 = vadd.f32 %v6140_v1, %v2079_v29  ;;  %v1918_v34 = vpop.permute.xlu2 %1917 }
 0x4c2   :  { %2544 = vmatpush.bf16.msrb.mxu2 %v2435_v56  ;;  %v2336_v13 = vmul.f32 0.2, %v2272_v7  ;;  %vm2304_vm1 = vcmp.ge.f32.partialorder %v2272_v7, 0.0 }
 0x4c3   :  { %vm2326_vm13 = vcmp.ge.f32.partialorder %v2294_v5, 0.0  ;;  %v2358_v53 = vmul.f32 0.2, %v2294_v5  ;;  %v2370_v56 = vsel %vm2306_vm0, %v2274_v30, %v2338_v31  ;;  %v2335_v52 = vmul.f32 0.2, %v2271_v37  ;;  %v7236_v31 = vld [vmem:[#allocation2_spill] sm:$0xff] }
 0x4c4   :  { %vm2303_vm3 = vcmp.ge.f32.partialorder %v2271_v37, 0.0  ;;  %v2368_v33 = vsel %vm2304_vm1, %v2272_v7, %v2336_v13 }
 0x4c5   :  { %2592 = vmatpush.bf16.msrb.mxu3 %v2444_v54  ;;  %v2390_v35 = vsel %vm2326_vm13, %v2294_v5, %v2358_v53  ;;  %v2289_v5 = vadd.f32 %v6164_v62, %v2097_v50  ;;  %v2405_v53 = vmul.f32 %v6106_v10, %v2370_v56  ;;  %v7232_v54 = vld [vmem:[#allocation19_spill] sm:$0xff] }
 0x4c6   :  { %2545 = vmatpush.bf16.msrb.mxu2 %v2434_v27  ;;  %v2425_v0 = vmul.f32 %v6106_v10, %v2390_v35  ;;  %v2098_v49 = vmul.f32 %v6053_v4, %v7232_v54  ;;  %v2367_v27 = vsel %vm2303_vm3, %v2271_v37, %v2335_v52  ;;  %v7233_v35 = vld [vmem:[#allocation16_spill] sm:$0xff] }
 0x4c7   :  { %v2353_v46 = vmul.f32 0.2, %v2289_v5  ;;  %vm2321_vm4 = vcmp.ge.f32.partialorder %v2289_v5, 0.0  ;;  %v2402_v20 = vmul.f32 %v6106_v10, %v2367_v27 }
 0x4c8   :  { %v2235_v61 = vpop.permute.xlu0 %2234  ;;  %v2443_v42 = vpack.c.bf16 %v2425_v0, %v2424_v6  ;;  %v2095_v6 = vmul.f32 %v6041_v12, %v7233_v35  ;;  %v1923_v0 = vpop.permute.xlu1 %1922 }
 0x4c9   :  { %v2292_v2 = vadd.f32 %v2235_v61, %v2100_v38  ;;  %v2403_v38 = vmul.f32 %v6106_v10, %v2368_v33  ;;  %v2385_v4 = vsel %vm2321_vm4, %v2289_v5, %v2353_v46  ;;  %v6241_v61 = vpop.permute.xlu2 %2002  ;;  %v7240_v46 = vld [vmem:[#allocation15_spill] sm:$0xff] }
 0x4ca   :  { %2593 = vmatpush.bf16.msrb.mxu3 %v2443_v42  ;;  %v2287_v58 = vadd.f32 %v6159_v24, %v2095_v6  ;;  %v2420_v30 = vmul.f32 %v6106_v10, %v2385_v4  ;;  %v7235_v24 = vld [vmem:[#allocation5_spill] sm:$0xff] }
 0x4cb   :  { %vm2324_vm15 = vcmp.ge.f32.partialorder %v2292_v2, 0.0  ;;  %v2356_v63 = vmul.f32 0.2, %v2292_v2  ;;  %v2432_v42 = vpack.c.bf16 %v2403_v38, %v2402_v20  ;;  %v4229_v20 = vld [vmem:[%s7110_s2] sm:$0xf] }
 0x4cc   :  { %v2351_v12 = vmul.f32 0.2, %v2287_v58  ;;  %vm2319_vm6 = vcmp.ge.f32.partialorder %v2287_v58, 0.0 }
 0x4cd   :  { %v2388_v23 = vsel %vm2324_vm15, %v2292_v2, %v2356_v63  ;;  %v2078_v63 = vmul.f32 %v6147_v59, %v7235_v24 }
 0x4ce   :  { %v2423_v9 = vmul.f32 %v6106_v10, %v2388_v23  ;;  %v2383_v23 = vsel %vm2319_vm6, %v2287_v58, %v2351_v12 }
 0x4cf   :  { %v2270_v29 = vadd.f32 %v6214_v51, %v2078_v63  ;;  %v2418_v59 = vmul.f32 %v6106_v10, %v2383_v23  ;;  %v2077_v51 = vmul.f32 %v6166_v3, %v7238_v57 }
 0x4d0   :  { %v2140_v60 = vpop.permute.xlu0 %2139  ;;  %v2442_v44 = vpack.c.bf16 %v2423_v9, %v2422_v15  ;;  %v2075_v15 = vmul.f32 %v1918_v34, %v7236_v31  ;;  %v7237_v9 = vld [vmem:[#allocation3_spill] sm:$0xff]  ;;  %v7239_v34 = vld [vmem:[#allocation14_spill] sm:$0xff] }
 0x4d1   :  { %v2273_v55 = vadd.f32 %v2140_v60, %v2081_v25  ;;  %v2076_v21 = vmul.f32 %v1923_v0, %v7237_v9  ;;  %v2334_v37 = vmul.f32 0.2, %v2270_v29  ;;  %v2115_v60 = vpop.permute.xlu2 %2114  ;;  %vm2302_vm8 = vcmp.ge.f32.partialorder %v2270_v29, 0.0 }
 0x4d2   :  { %2594 = vmatpush.bf16.msrb.mxu3 %v2442_v44  ;;  %v2110_v7 = vpop.permute.xlu1 %2109  ;;  %v2093_v56 = vmul.f32 %v6170_v45, %v7239_v34  ;;  %v2094_v45 = vmul.f32 %v6151_v32, %v7240_v46  ;;  %v4373_v32 = vld [vmem:[%s7110_s2 + $0x4] sm:$0xf0]  ;;  %v4379_v34 = vld [vmem:[%s7110_s2 + $0x34] sm:$0xf0] }
 0x4d3   :  { %vm2305_vm2 = vcmp.ge.f32.partialorder %v2273_v55, 0.0  ;;  %v2337_v40 = vmul.f32 0.2, %v2273_v55  ;;  %v2267_v25 = vadd.f32 %v2110_v7, %v2075_v15  ;;  %v2268_v50 = vadd.f32 %v2115_v60, %v2076_v21  ;;  %v4372_v15 = vld [vmem:[%s7110_s2 + $0x4] sm:$0xf] }
 0x4d4   :  { %v4383_v46 = vld [vmem:[%s7110_s2 + $0x54] sm:$0xf0] }
 0x4d5   :  { %v2369_v26 = vsel %vm2305_vm2, %v2273_v55, %v2337_v40  ;;  %v2331_v52 = vmul.f32 0.2, %v2267_v25  ;;  %vm2299_vm9 = vcmp.ge.f32.partialorder %v2267_v25, 0.0  ;;  %v2366_v40 = vsel %vm2302_vm8, %v2270_v29, %v2334_v37  ;;  %v4239_v37 = vld [vmem:[%s7110_s2 + $0x18] sm:$0xf0] }
 0x4d6   :  { %v2404_v1 = vmul.f32 %v6106_v10, %v2369_v26  ;;  %v2285_v26 = vadd.f32 %v6222_v14, %v2093_v56  ;;  %v2332_v33 = vmul.f32 0.2, %v2268_v50  ;;  %vm2300_vm11 = vcmp.ge.f32.partialorder %v2268_v50, 0.0 }
 0x4d7   :  { %v2363_v3 = vsel %vm2299_vm9, %v2267_v25, %v2331_v52  ;;  %v4375_v25 = vld [vmem:[%s7110_s2 + $0x14] sm:$0xf0]  ;;  %v4378_v52 = vld [vmem:[%s7110_s2 + $0x34] sm:$0xf] }
 0x4d8   :  { %v2225_v62 = vpop.permute.xlu0 %2224  ;;  %v2433_v41 = vpack.c.bf16 %v2405_v53, %v2404_v1  ;;  %v2349_v27 = vmul.f32 0.2, %v2285_v26  ;;  %v2364_v35 = vsel %vm2300_vm11, %v2268_v50, %v2332_v33  ;;  %vm2317_vm12 = vcmp.ge.f32.partialorder %v2285_v26, 0.0  ;;  %v4247_v50 = vld [vmem:[%s7110_s2 + $0x28] sm:$0xf0] }
 0x4d9   :  { %v2290_v36 = vadd.f32 %v2225_v62, %v2098_v49  ;;  %v2401_v49 = vmul.f32 %v6106_v10, %v2366_v40  ;;  %v2398_v14 = vmul.f32 %v6106_v10, %v2363_v3  ;;  %v2399_v58 = vmul.f32 %v6106_v10, %v2364_v35  ;;  %v4381_v33 = vld [vmem:[%s7110_s2 + $0x44] sm:$0xf0]  ;;  %v4263_v3 = vld [vmem:[%s7110_s2 + $0x48] sm:$0xf0]  ;;  %v4271_v35 = vld [vmem:[%s7110_s2 + $0x58] sm:$0xf0] }
 0x4da   :  { %2546 = vmatpush.bf16.msrb.mxu2 %v2433_v41  ;;  %v2190_v6 = vpop.permute.xlu1 %2189  ;;  %v7241_v41 = vld [vmem:[#allocation29_spill] sm:$0xff] }
 0x4db   :  { %vm2322_vm5 = vcmp.ge.f32.partialorder %v2290_v36, 0.0  ;;  %v2354_v8 = vmul.f32 0.2, %v2290_v36  ;;  %v2091_v38 = vmul.f32 %v6080_v47, %v7241_v41  ;;  %v4384_v41 = vld [vmem:[%s7110_s2 + $0x64] sm:$0xf] }
 0x4dd   :  { %v2386_v2 = vsel %vm2322_vm5, %v2290_v36, %v2354_v8  ;;  %v2283_v8 = vadd.f32 %v2190_v6, %v2091_v38  ;;  %v4279_v38 = vld [vmem:[%s7110_s2 + $0x68] sm:$0xf0] }
 0x4de   :  { %2547 = vmatpush.bf16.msrb.mxu2 %v2432_v42  ;;  %v2421_v19 = vmul.f32 %v6106_v10, %v2386_v2  ;;  %v2381_v42 = vsel %vm2317_vm12, %v2285_v26, %v2349_v27  ;;  %v2430_v2 = vpack.c.bf16 %v2399_v58, %v2398_v14  ;;  %v4261_v26 = vld [vmem:[%s7110_s2 + $0x40] sm:$0xf]  ;;  %v4382_v27 = vld [vmem:[%s7110_s2 + $0x54] sm:$0xf]  ;;  %v4285_v58 = vld [vmem:[%s7110_s2 + $0x70] sm:$0xf] }
 0x4df   :  { %v2416_v47 = vmul.f32 %v6106_v10, %v2381_v42  ;;  %v2347_v24 = vmul.f32 0.2, %v2283_v8  ;;  %vm2315_vm14 = vcmp.ge.f32.partialorder %v2283_v8, 0.0  ;;  %v4274_v6 = vor.u32 %v4382_v27, %v4271_v35 }
 0x4e0   :  { %v2215_v11 = vpop.permute.xlu0 %2214  ;;  %v2441_v17 = vpack.c.bf16 %v2421_v19, %v2420_v30  ;;  %v4230_v30 = vor.u32 %v4373_v32, %v4229_v20  ;;  %v4387_v20 = vld [vmem:[%s7110_s2 + $0x74] sm:$0xf0] }
 0x4e1   :  { %v2288_v28 = vadd.f32 %v2215_v11, %v2096_v48  ;;  %v2092_v48 = vmul.f32 %v6241_v61, %v7242_v18  ;;  %v2379_v29 = vsel %vm2315_vm14, %v2283_v8, %v2347_v24  ;;  %v4231_v61 = vld [vmem:[%s7110_s2 + $0x8] sm:$0xf0]  ;;  %v4286_v32 = vor.u32 %v4387_v20, %v4285_v58  ;;  %v4386_v8 = vld [vmem:[%s7110_s2 + $0x74] sm:$0xf] }
 0x4e2   :  { %2595 = vmatpush.bf16.msrb.mxu3 %v2441_v17  ;;  %v2414_v23 = vmul.f32 %v6106_v10, %v2379_v29  ;;  %v4234_v21 = vor.u32 %v4372_v15, %v4231_v61 }
 0x4e3   :  { %vm2320_vm7 = vcmp.ge.f32.partialorder %v2288_v28, 0.0  ;;  %v2352_v39 = vmul.f32 0.2, %v2288_v28 }
 0x4e5   :  { %v2384_v16 = vsel %vm2320_vm7, %v2288_v28, %v2352_v39  ;;  %v4237_v39 = vld [vmem:[%s7110_s2 + $0x10] sm:$0xf] }
 0x4e6   :  { %v2419_v44 = vmul.f32 %v6106_v10, %v2384_v16  ;;  %v4374_v16 = vld [vmem:[%s7110_s2 + $0x14] sm:$0xf] }
 0x4e7   :  { %v4242_v60 = vor.u32 %v4374_v16, %v4239_v37 }
 0x4e8   :  { %v2120_v13 = vpop.permute.xlu0 %2119  ;;  %v2440_v55 = vpack.c.bf16 %v2419_v44, %v2418_v59  ;;  %v4245_v59 = vld [vmem:[%s7110_s2 + $0x20] sm:$0xf]  ;;  %v4377_v44 = vld [vmem:[%s7110_s2 + $0x24] sm:$0xf0] }
 0x4e9   :  { %v2269_v5 = vadd.f32 %v2120_v13, %v2077_v51  ;;  %v4246_v57 = vor.u32 %v4377_v44, %v4245_v59  ;;  %v4376_v51 = vld [vmem:[%s7110_s2 + $0x24] sm:$0xf] }
 0x4ea   :  { %2596 = vmatpush.bf16.msrb.mxu3 %v2440_v55  ;;  %v4250_v13 = vor.u32 %v4376_v51, %v4247_v50  ;;  %v4253_v55 = vld [vmem:[%s7110_s2 + $0x30] sm:$0xf] }
 0x4eb   :  { %vm2301_vm10 = vcmp.ge.f32.partialorder %v2269_v5, 0.0  ;;  %v2333_v1 = vmul.f32 0.2, %v2269_v5  ;;  %v4254_v56 = vor.u32 %v4379_v34, %v4253_v55 }
 0x4ed   :  { %v2365_v53 = vsel %vm2301_vm10, %v2269_v5, %v2333_v1  ;;  %v4255_v5 = vld [vmem:[%s7110_s2 + $0x38] sm:$0xf0]  ;;  %v4262_v1 = vor.u32 %v4381_v33, %v4261_v26 }
 0x4ee   :  { %v2400_v54 = vmul.f32 %v6106_v10, %v2365_v53  ;;  %v4258_v40 = vor.u32 %v4378_v52, %v4255_v5  ;;  %v4380_v53 = vld [vmem:[%s7110_s2 + $0x44] sm:$0xf] }
 0x4f0   :  { %v2205_v0 = vpop.permute.xlu0 %2204  ;;  %v2431_v62 = vpack.c.bf16 %v2401_v49, %v2400_v54  ;;  %v4266_v54 = vor.u32 %v4380_v53, %v4263_v3  ;;  %v4269_v49 = vld [vmem:[%s7110_s2 + $0x50] sm:$0xf] }
 0x4f1   :  { %v2286_v36 = vadd.f32 %v2205_v0, %v2094_v45  ;;  %v4270_v45 = vor.u32 %v4383_v46, %v4269_v49  ;;  %v4277_v0 = vld [vmem:[%s7110_s2 + $0x60] sm:$0xf] }
 0x4f2   :  { %2548 = vmatpush.bf16.msrb.mxu2 %v2431_v62  ;;  %v4385_v62 = vld [vmem:[%s7110_s2 + $0x64] sm:$0xf0] }
 0x4f3   :  { %vm2318_vm13 = vcmp.ge.f32.partialorder %v2286_v36, 0.0  ;;  %v2350_v4 = vmul.f32 0.2, %v2286_v36  ;;  %v4278_v14 = vor.u32 %v4385_v62, %v4277_v0 }
 0x4f5   :  { %v2382_v12 = vsel %vm2318_vm13, %v2286_v36, %v2350_v4  ;;  %v4282_v36 = vor.u32 %v4384_v41, %v4279_v38  ;;  %v4287_v4 = vld [vmem:[%s7110_s2 + $0x78] sm:$0xf0] }
 0x4f6   :  { %2549 = vmatpush.bf16.msrb.mxu2 %v2430_v2  ;;  %v2417_v19 = vmul.f32 %v6106_v10, %v2382_v12  ;;  %v4290_v42 = vor.u32 %v4386_v8, %v4287_v4 }
 0x4f8   :  { %v2195_v63 = vpop.permute.xlu0 %2194  ;;  %v2439_v11 = vpack.c.bf16 %v2417_v19, %v2416_v47 }
 0x4f9   :  { %v2284_v17 = vadd.f32 %v2195_v63, %v2092_v48  ;;  %2550 = vmatmul.bf16.vlgmr.msrb.gmra.mxu2 %v4230_v30 }
 0x4fa   :  { %2597 = vmatpush.bf16.msrb.mxu3 %v2439_v11 }
 0x4fb   :  { %vm2316_vm15 = vcmp.ge.f32.partialorder %v2284_v17, 0.0  ;;  %v2348_v28 = vmul.f32 0.2, %v2284_v17 }
 0x4fd   :  { %v2380_v7 = vsel %vm2316_vm15, %v2284_v17, %v2348_v28 }
 0x4fe   :  { %v2415_v31 = vmul.f32 %v6106_v10, %v2380_v7  ;;  %v4238_v10 = vor.u32 %v4375_v25, %v4237_v39 }
 0x500   :  { %v2438_v9 = vpack.c.bf16 %v2415_v31, %v2414_v23 }
 0x502   :  { %2598 = vmatpush.bf16.msrb.mxu3 %v2438_v9 }
 0x505   :  { %2599 = vmatmul.bf16.vlgmr.msrb.gmra.mxu3 %v4234_v21 }
 0x509   :  { %2555 = vmatmul.bf16.gmra.mxu2 %v4238_v10 }
 0x515   :  { %2604 = vmatmul.bf16.gmra.mxu3 %v4242_v60 }
 0x519   :  { %2560 = vmatmul.bf16.gmra.mxu2 %v4246_v57 }
 0x525   :  { %2609 = vmatmul.bf16.gmra.mxu3 %v4250_v13 }
 0x529   :  { %2565 = vmatmul.bf16.gmra.mxu2 %v4254_v56 }
 0x535   :  { %2614 = vmatmul.bf16.gmra.mxu3 %v4258_v40 }
 0x539   :  { %2570 = vmatmul.bf16.gmra.mxu2 %v4262_v1 }
 0x545   :  { %2619 = vmatmul.bf16.gmra.mxu3 %v4266_v54 }
 0x549   :  { %2575 = vmatmul.bf16.gmra.mxu2 %v4270_v45 }
 0x555   :  { %2624 = vmatmul.bf16.gmra.mxu3 %v4274_v6 }
 0x559   :  { %2580 = vmatmul.bf16.gmra.mxu2 %v4278_v14 }
 0x565   :  { %2629 = vmatmul.bf16.gmra.mxu3 %v4282_v36 }
 0x569   :  { %2585 = vmatmul.bf16.gmra.mxu2 %v4286_v32 }
 0x575   :  { %2634 = vmatmul.bf16.gmra.mxu3 %v4290_v42 }
 0x57c   :  { %v6369_v2 = vpop.f32.mrf.mxu2 }
 0x584   :  { %v6371_v12 = vpop.f32.mrf.mxu2 }
 0x588   :  { %v6373_v30 = vpop.f32.mrf.mxu3 }
 0x589   :  { %v6472_v42 = vadd.f32 %v6373_v30, %v6369_v2 }
 0x58c   :  { %v6375_v47 = vpop.f32.mrf.mxu2 }
 0x590   :  { %v6377_v19 = vpop.f32.mrf.mxu3 }
 0x591   :  { %v6465_v8 = vadd.f32 %v6377_v19, %v6371_v12  ;;  %v2672_v12 = vmul.f32 %v6472_v42, %v6472_v42 }
 0x594   :  { %v6379_v18 = vpop.f32.mrf.mxu2 }
 0x598   :  { %v6381_v48 = vpop.f32.mrf.mxu3 }
 0x599   :  { %v6455_v58 = vadd.f32 %v6381_v48, %v6375_v47  ;;  %v2673_v47 = vmul.f32 %v6465_v8, %v6465_v8 }
 0x59b   :  { %v2674_v4 = vmul.f32 %v6455_v58, %v6455_v58 }
 0x59c   :  { %v6383_v24 = vpop.f32.mrf.mxu2 }
 0x5a0   :  { %v6385_v63 = vpop.f32.mrf.mxu3 }
 0x5a1   :  { %v6451_v36 = vadd.f32 %v6385_v63, %v6379_v18 }
 0x5a3   :  { %v2675_v32 = vmul.f32 %v6451_v36, %v6451_v36 }
 0x5a4   :  { %v2563_v11 = vpop.f32.mrf.mxu2 }
 0x5a8   :  { %v6387_v17 = vpop.f32.mrf.mxu3 }
 0x5a9   :  { %v6444_v41 = vadd.f32 %v6387_v17, %v6383_v24 }
 0x5ab   :  { %v2676_v20 = vmul.f32 %v6444_v41, %v6444_v41 }
 0x5ac   :  { %v2566_v28 = vpop.f32.mrf.mxu2 }
 0x5b0   :  { %v2612_v29 = vpop.f32.mrf.mxu3 }
 0x5b1   :  { %v6389_v7 = vadd.f32 %v2612_v29, %v2563_v11 }
 0x5b3   :  { %2650 = vadd.xlane.f32.xlu0 %v6389_v7  ;;  %v2677_v38 = vmul.f32 %v6389_v7, %v6389_v7 }
 0x5b4   :  { %v2568_v23 = vpop.f32.mrf.mxu2 }
 0x5b8   :  { %v2615_v31 = vpop.f32.mrf.mxu3 }
 0x5b9   :  { %v6392_v15 = vadd.f32 %v2615_v31, %v2566_v28 }
 0x5bb   :  { %2652 = vadd.xlane.f32.xlu2 %v6392_v15  ;;  %v2678_v14 = vmul.f32 %v6392_v15, %v6392_v15 }
 0x5bc   :  { %v2571_v61 = vpop.f32.mrf.mxu2 }
 0x5c0   :  { %v2617_v9 = vpop.f32.mrf.mxu3 }
 0x5c1   :  { %v6395_v21 = vadd.f32 %v2617_v9, %v2568_v23 }
 0x5c3   :  { %2654 = vadd.xlane.f32.xlu1 %v6395_v21  ;;  %v2679_v16 = vmul.f32 %v6395_v21, %v6395_v21 }
 0x5c4   :  { %v2573_v39 = vpop.f32.mrf.mxu2 }
 0x5c8   :  { %v2620_v25 = vpop.f32.mrf.mxu3 }
 0x5c9   :  { %v6398_v10 = vadd.f32 %v2620_v25, %v2571_v61 }
 0x5cb   :  { %2702 = vadd.xlane.f32.xlu1 %v2679_v16  ;;  %2656 = vadd.xlane.f32.xlu0 %v6398_v10  ;;  %v2680_v44 = vmul.f32 %v6398_v10, %v6398_v10 }
 0x5cc   :  { %v2576_v37 = vpop.f32.mrf.mxu2 }
 0x5d0   :  { %v2622_v60 = vpop.f32.mrf.mxu3 }
 0x5d1   :  { %v6403_v59 = vadd.f32 %v2622_v60, %v2573_v39 }
 0x5d3   :  { %2704 = vadd.xlane.f32.xlu0 %v2680_v44  ;;  %2658 = vadd.xlane.f32.xlu2 %v6403_v59  ;;  %v2681_v50 = vmul.f32 %v6403_v59, %v6403_v59 }
 0x5d4   :  { %v2578_v13 = vpop.f32.mrf.mxu2 }
 0x5d8   :  { %v2625_v57 = vpop.f32.mrf.mxu3 }
 0x5d9   :  { %v6408_v51 = vadd.f32 %v2625_v57, %v2576_v37 }
 0x5db   :  { %2706 = vadd.xlane.f32.xlu2 %v2681_v50  ;;  %2660 = vadd.xlane.f32.xlu1 %v6408_v51  ;;  %v2682_v56 = vmul.f32 %v6408_v51, %v6408_v51 }
 0x5dc   :  { %v2581_v52 = vpop.f32.mrf.mxu2 }
 0x5e0   :  { %v2627_v55 = vpop.f32.mrf.mxu3 }
 0x5e1   :  { %v6413_v34 = vadd.f32 %v2627_v55, %v2578_v13 }
 0x5e3   :  { %2708 = vadd.xlane.f32.xlu1 %v2682_v56  ;;  %2662 = vadd.xlane.f32.xlu0 %v6413_v34  ;;  %v2683_v26 = vmul.f32 %v6413_v34, %v6413_v34 }
 0x5e4   :  { %v2583_v33 = vpop.f32.mrf.mxu2 }
 0x5e8   :  { %v2630_v5 = vpop.f32.mrf.mxu3 }
 0x5e9   :  { %v6418_v40 = vadd.f32 %v2630_v5, %v2581_v52 }
 0x5eb   :  { %2710 = vadd.xlane.f32.xlu0 %v2683_v26  ;;  %2664 = vadd.xlane.f32.xlu2 %v6418_v40  ;;  %v2684_v3 = vmul.f32 %v6418_v40, %v6418_v40 }
 0x5ec   :  { %v2586_v49 = vpop.f32.mrf.mxu2 }
 0x5f0   :  { %v2632_v1 = vpop.f32.mrf.mxu3 }
 0x5f1   :  { %v6423_v53 = vadd.f32 %v2632_v1, %v2583_v33  ;;  %v2720_v33 = vld [vmem:[%s7111_s6] sm:$0xff] }
 0x5f3   :  { %2712 = vadd.xlane.f32.xlu2 %v2684_v3  ;;  %v2685_v54 = vmul.f32 %v6423_v53, %v6423_v53 }
 0x5f4   :  { %v2588_v27 = vpop.f32.mrf.mxu2 }
 0x5f5   :  { %2714 = vadd.xlane.f32.xlu1 %v2685_v54 }
 0x5f8   :  { %v2635_v46 = vpop.f32.mrf.mxu3 }
 0x5f9   :  { %v6429_v45 = vadd.f32 %v2635_v46, %v2586_v49  ;;  %v2721_v49 = vld [vmem:[%s7111_s6 + $0x8] sm:$0xff]  ;;  %v2722_v46 = vld [vmem:[%s7111_s6 + $0x10] sm:$0xff] }
 0x5fb   :  { %2666 = vadd.xlane.f32.xlu2 %v6423_v53  ;;  %v2686_v0 = vmul.f32 %v6429_v45, %v6429_v45 }
 0x5fd   :  { %2668 = vadd.xlane.f32.xlu1 %v6429_v45 }
 0x600   :  { %v2637_v35 = vpop.f32.mrf.mxu3 }
 0x601   :  { %v6433_v6 = vadd.f32 %v2637_v35, %v2588_v27  ;;  %v2723_v27 = vld [vmem:[%s7111_s6 + $0x18] sm:$0xff]  ;;  %v2724_v35 = vld [vmem:[%s7111_s6 + $0x20] sm:$0xff] }
 0x603   :  { %2670 = vadd.xlane.f32.xlu2 %v6433_v6  ;;  %v2687_v62 = vmul.f32 %v6433_v6, %v6433_v6 }
 0x605   :  { %2716 = vadd.xlane.f32.xlu1 %v2686_v0  ;;  %2718 = vadd.xlane.f32.xlu0 %v2687_v62  ;;  %v2725_v0 = vld [vmem:[%s7111_s6 + $0x28] sm:$0xff]  ;;  %v2726_v62 = vld [vmem:[%s7111_s6 + $0x30] sm:$0xff] }
 0x60b   :  { %2700 = vadd.xlane.f32.xlu2 %v2678_v14  ;;  %v2727_v14 = vld [vmem:[%s7111_s6 + $0x38] sm:$0xff] }
 0x60d   :  { %2648 = vadd.xlane.f32.xlu1 %v6444_v41  ;;  %2698 = vadd.xlane.f32.xlu0 %v2677_v38  ;;  %v2728_v38 = vld [vmem:[%s7111_s6 + $0x40] sm:$0xff] }
 0x613   :  { %2646 = vadd.xlane.f32.xlu2 %v6451_v36 }
 0x615   :  { %2696 = vadd.xlane.f32.xlu1 %v2676_v20  ;;  %2644 = vadd.xlane.f32.xlu0 %v6455_v58  ;;  %v2729_v20 = vld [vmem:[%s7111_s6 + $0x48] sm:$0xff] }
 0x61b   :  { %2694 = vadd.xlane.f32.xlu2 %v2675_v32  ;;  %v2730_v32 = vld [vmem:[%s7111_s6 + $0x50] sm:$0xff] }
 0x61d   :  { %2642 = vadd.xlane.f32.xlu1 %v6465_v8  ;;  %2692 = vadd.xlane.f32.xlu0 %v2674_v4  ;;  %v2731_v4 = vld [vmem:[%s7111_s6 + $0x58] sm:$0xff] }
 0x623   :  { %2640 = vadd.xlane.f32.xlu2 %v6472_v42 }
 0x625   :  { %2690 = vadd.xlane.f32.xlu1 %v2673_v47  ;;  %2688 = vadd.xlane.f32.xlu0 %v2672_v12  ;;  %v2732_v47 = vld [vmem:[%s7111_s6 + $0x60] sm:$0xff]  ;;  %v2733_v12 = vld [vmem:[%s7111_s6 + $0x68] sm:$0xff] }
 0x626   :  { %v2651_v48 = vpop.xlane.xlu0 %2650 }
 0x62e   :  { %v2653_v19 = vpop.xlane.xlu2 %2652 }
 0x636   :  { %v2655_v18 = vpop.xlane.xlu1 %2654 }
 0x63e   :  { %v2703_v63 = vpop.xlane.xlu1 %2702  ;;  %v2657_v11 = vpop.xlane.xlu0 %2656 }
 0x646   :  { %v2659_v24 = vpop.xlane.xlu2 %2658  ;;  %v2705_v2 = vpop.xlane.xlu0 %2704 }
 0x64e   :  { %v2707_v17 = vpop.xlane.xlu2 %2706  ;;  %v2661_v28 = vpop.xlane.xlu1 %2660 }
 0x656   :  { %v2709_v29 = vpop.xlane.xlu1 %2708  ;;  %v2663_v23 = vpop.xlane.xlu0 %2662 }
 0x65e   :  { %v2665_v30 = vpop.xlane.xlu2 %2664  ;;  %v2711_v39 = vpop.xlane.xlu0 %2710 }
 0x666   :  { %v2713_v31 = vpop.xlane.xlu2 %2712 }
 0x668   :  { %v2715_v61 = vpop.xlane.xlu1 %2714 }
 0x66e   :  { %v2667_v9 = vpop.xlane.xlu2 %2666 }
 0x670   :  { %v2669_v25 = vpop.xlane.xlu1 %2668 }
 0x676   :  { %v2671_v16 = vpop.xlane.xlu2 %2670 }
 0x677   :  { %2736 = vmatpush.msra.mxu2 %v2671_v16 }
 0x678   :  { %v2717_v37 = vpop.xlane.xlu1 %2716  ;;  %v2719_v60 = vpop.xlane.xlu0 %2718 }
 0x679   :  { %2737 = vmatpush.msra.mxu2 %v2669_v25  ;;  %2801 = vmatpush.msra.mxu3 %v2719_v60 }
 0x67b   :  { %2738 = vmatpush.msra.mxu2 %v2667_v9  ;;  %2802 = vmatpush.msra.mxu3 %v2717_v37 }
 0x67d   :  { %2739 = vmatpush.msra.mxu2 %v2665_v30  ;;  %2803 = vmatpush.msra.mxu3 %v2715_v61 }
 0x67e   :  { %v2701_v44 = vpop.xlane.xlu2 %2700 }
 0x67f   :  { %2740 = vmatpush.msra.mxu2 %v2663_v23  ;;  %2804 = vmatpush.msra.mxu3 %v2713_v31 }
 0x680   :  { %v2649_v57 = vpop.xlane.xlu1 %2648  ;;  %v2699_v50 = vpop.xlane.xlu0 %2698 }
 0x681   :  { %2741 = vmatpush.msra.mxu2 %v2661_v28  ;;  %2805 = vmatpush.msra.mxu3 %v2711_v39 }
 0x683   :  { %2742 = vmatpush.msra.mxu2 %v2659_v24  ;;  %2806 = vmatpush.msra.mxu3 %v2709_v29 }
 0x685   :  { %2743 = vmatpush.msra.mxu2 %v2657_v11  ;;  %2807 = vmatpush.msra.mxu3 %v2707_v17 }
 0x686   :  { %v2647_v13 = vpop.xlane.xlu2 %2646 }
 0x687   :  { %2744 = vmatpush.msra.mxu2 %v2655_v18  ;;  %2808 = vmatpush.msra.mxu3 %v2705_v2  ;;  %v2735_v18 = vld [vmem:[%s7111_s6 + $0x78] sm:$0xff] }
 0x688   :  { %v2697_v55 = vpop.xlane.xlu1 %2696  ;;  %v2645_v56 = vpop.xlane.xlu0 %2644 }
 0x689   :  { %2745 = vmatpush.msra.mxu2 %v2653_v19  ;;  %2809 = vmatpush.msra.mxu3 %v2703_v63  ;;  %v2734_v19 = vld [vmem:[%s7111_s6 + $0x70] sm:$0xff] }
 0x68b   :  { %2746 = vmatpush.msra.mxu2 %v2651_v48  ;;  %2810 = vmatpush.msra.mxu3 %v2701_v44 }
 0x68d   :  { %2747 = vmatpush.msra.mxu2 %v2649_v57  ;;  %2811 = vmatpush.msra.mxu3 %v2699_v50 }
 0x68e   :  { %v2695_v52 = vpop.xlane.xlu2 %2694 }
 0x68f   :  { %2748 = vmatpush.msra.mxu2 %v2647_v13  ;;  %2812 = vmatpush.msra.mxu3 %v2697_v55 }
 0x690   :  { %v2643_v5 = vpop.xlane.xlu1 %2642  ;;  %v2693_v26 = vpop.xlane.xlu0 %2692 }
 0x691   :  { %2749 = vmatpush.msra.mxu2 %v2645_v56  ;;  %2813 = vmatpush.msra.mxu3 %v2695_v52 }
 0x693   :  { %2750 = vmatpush.msra.mxu2 %v2643_v5  ;;  %2814 = vmatpush.msra.mxu3 %v2693_v26 }
 0x696   :  { %v2641_v1 = vpop.xlane.xlu2 %2640 }
 0x697   :  { %2751 = vmatpush.msra.mxu2 %v2641_v1  ;;  %v6538_v1 = vld [vmem:[%s7108_s8 + $0x100] sm:$0xff] }
 0x698   :  { %v2691_v3 = vpop.xlane.xlu1 %2690  ;;  %2752 = vmatmul.f32.vlgmr.msra.gmra.mxu2 %v2720_v33  ;;  %v2689_v54 = vpop.xlane.xlu0 %2688 }
 0x699   :  { %2815 = vmatpush.msra.mxu3 %v2691_v3 }
 0x69b   :  { %2816 = vmatpush.msra.mxu3 %v2689_v54 }
 0x69c   :  { %2817 = vmatmul.f32.vlgmr.msra.gmra.mxu3 %v2720_v33 }
 0x6a0   :  { %2755 = vmatmul.f32.gmra.mxu2 %v2721_v49 }
 0x6a4   :  { %2820 = vmatmul.f32.gmra.mxu3 %v2721_v49 }
 0x6a8   :  { %2758 = vmatmul.f32.gmra.mxu2 %v2722_v46 }
 0x6ac   :  { %2823 = vmatmul.f32.gmra.mxu3 %v2722_v46 }
 0x6b0   :  { %2761 = vmatmul.f32.gmra.mxu2 %v2723_v27 }
 0x6b4   :  { %2826 = vmatmul.f32.gmra.mxu3 %v2723_v27 }
 0x6b8   :  { %2764 = vmatmul.f32.gmra.mxu2 %v2724_v35 }
 0x6bc   :  { %2829 = vmatmul.f32.gmra.mxu3 %v2724_v35 }
 0x6c0   :  { %2767 = vmatmul.f32.gmra.mxu2 %v2725_v0 }
 0x6c4   :  { %2832 = vmatmul.f32.gmra.mxu3 %v2725_v0 }
 0x6c8   :  { %2770 = vmatmul.f32.gmra.mxu2 %v2726_v62 }
 0x6cc   :  { %2835 = vmatmul.f32.gmra.mxu3 %v2726_v62 }
 0x6d0   :  { %2773 = vmatmul.f32.gmra.mxu2 %v2727_v14 }
 0x6d4   :  { %2838 = vmatmul.f32.gmra.mxu3 %v2727_v14 }
 0x6d8   :  { %2776 = vmatmul.f32.gmra.mxu2 %v2728_v38 }
 0x6dc   :  { %2841 = vmatmul.f32.gmra.mxu3 %v2728_v38 }
 0x6e0   :  { %2779 = vmatmul.f32.gmra.mxu2 %v2729_v20 }
 0x6e4   :  { %2844 = vmatmul.f32.gmra.mxu3 %v2729_v20 }
 0x6e8   :  { %2782 = vmatmul.f32.gmra.mxu2 %v2730_v32 }
 0x6ec   :  { %2847 = vmatmul.f32.gmra.mxu3 %v2730_v32 }
 0x6f0   :  { %2785 = vmatmul.f32.gmra.mxu2 %v2731_v4 }
 0x6f4   :  { %2850 = vmatmul.f32.gmra.mxu3 %v2731_v4 }
 0x6f8   :  { %2788 = vmatmul.f32.gmra.mxu2 %v2732_v47 }
 0x6fc   :  { %2853 = vmatmul.f32.gmra.mxu3 %v2732_v47 }
 0x700   :  { %2791 = vmatmul.f32.gmra.mxu2 %v2733_v12 }
 0x704   :  { %2856 = vmatmul.f32.gmra.mxu3 %v2733_v12 }
 0x708   :  { %2794 = vmatmul.f32.gmra.mxu2 %v2734_v19 }
 0x70c   :  { %2859 = vmatmul.f32.gmra.mxu3 %v2734_v19  ;;  %v6552_v19 = vld [vmem:[%s7108_s8 + $0x108] sm:$0xff] }
 0x710   :  { %2797 = vmatmul.f32.gmra.mxu2 %v2735_v18 }
 0x714   :  { %2862 = vmatmul.f32.gmra.mxu3 %v2735_v18 }
 0x71b   :  { %v2753_v48 = vpop.f32.mrf.mxu2 }
 0x71c   :  { %v2866_v24 = vmul.f32 %v2753_v48, %v2753_v48 }
 0x71f   :  { %v2818_v63 = vpop.f32.mrf.mxu3 }
 0x720   :  { %v2882_v11 = vsub.f32 %v2818_v63, %v2866_v24 }
 0x722   :  { %v2898_v17 = vmax.f32 %v2882_v11, 0.0 }
 0x723   :  { %v2756_v28 = vpop.f32.mrf.mxu2 }
 0x724   :  { %v2930_v2 = vadd.f32 1e-05, %v2898_v17  ;;  %v2867_v30 = vmul.f32 %v2756_v28, %v2756_v28 }
 0x726   :  { %4512 = vrsqrt.f32 %v2930_v2  ;;  %vm2952_vm1 = vweird.f32 %v2930_v2 }
 0x727   :  { %v2821_v29 = vpop.f32.mrf.mxu3 }
 0x728   :  { %v2883_v23 = vsub.f32 %v2821_v29, %v2867_v30 }
 0x72a   :  { %v2899_v31 = vmax.f32 %v2883_v23, 0.0 }
 0x72b   :  { %v6527_v61 = vpop.f32.mrf.mxu2 }
 0x72c   :  { %v4513_v9 = vpop.eup %4512  ;;  %v2931_v39 = vadd.f32 1e-05, %v2899_v31  ;;  %v2868_v25 = vmul.f32 %v6527_v61, %v6527_v61 }
 0x72d   :  { %v2947_v16 = vmul.f32 %v4513_v9, %v2930_v2  ;;  %vm2953_vm0 = vweird.f32 %v4513_v9 }
 0x72e   :  { %4514 = vrsqrt.f32 %v2931_v39  ;;  %vm2954_vm2 = vmor %vm2952_vm1, %vm2953_vm0  ;;  %vm2962_vm4 = vweird.f32 %v2931_v39 }
 0x72f   :  { %v2948_v37 = vmul.f32 %v4513_v9, %v2947_v16  ;;  %v2824_v60 = vpop.f32.mrf.mxu3 }
 0x730   :  { %v2884_v44 = vsub.f32 %v2824_v60, %v2868_v25 }
 0x731   :  { %v2949_v57 = vmul.f32 0.5, %v2948_v37  ;;  %v6566_v37 = vld [vmem:[%s7108_s8 + $0x110] sm:$0xff] }
 0x732   :  { %v2900_v50 = vmax.f32 %v2884_v44, 0.0 }
 0x733   :  { %v2950_v13 = vsub.f32 1.5, %v2949_v57  ;;  %v6531_v55 = vpop.f32.mrf.mxu2 }
 0x734   :  { %v4515_v56 = vpop.eup %4514  ;;  %v2932_v52 = vadd.f32 1e-05, %v2900_v50  ;;  %v2869_v5 = vmul.f32 %v6531_v55, %v6531_v55 }
 0x735   :  { %v2951_v26 = vmul.f32 %v4513_v9, %v2950_v13  ;;  %v2957_v33 = vmul.f32 %v4515_v56, %v2931_v39  ;;  %vm2963_vm3 = vweird.f32 %v4515_v56 }
 0x736   :  { %4516 = vrsqrt.f32 %v2932_v52  ;;  %vm2964_vm5 = vmor %vm2962_vm4, %vm2963_vm3  ;;  %vm2972_vm7 = vweird.f32 %v2932_v52 }
 0x737   :  { %v2955_v3 = vsel %vm2954_vm2, %v4513_v9, %v2951_v26  ;;  %v2958_v54 = vmul.f32 %v4515_v56, %v2957_v33  ;;  %v2827_v49 = vpop.f32.mrf.mxu3 }
 0x738   :  { %v2885_v46 = vsub.f32 %v2827_v49, %v2869_v5  ;;  %v6541_v27 = vmul.f32 %v2955_v3, %v6538_v1 }
 0x739   :  { %v2959_v35 = vmul.f32 0.5, %v2958_v54 }
 0x73a   :  { %v2901_v0 = vmax.f32 %v2885_v46, 0.0  ;;  %v3122_v62 = vmul.f32 %v6541_v27, %v2753_v48 }
 0x73b   :  { %v2960_v14 = vsub.f32 1.5, %v2959_v35  ;;  %v6544_v38 = vpop.f32.mrf.mxu2  ;;  %v6581_v35 = vld [vmem:[%s7108_s8 + $0x118] sm:$0xff] }
 0x73c   :  { %v4517_v20 = vpop.eup %4516  ;;  %v2933_v32 = vadd.f32 1e-05, %v2901_v0  ;;  %3154 = vrot.lane.b32.xlu1 %v3122_v62, %s4572_s12  ;;  %v2870_v4 = vmul.f32 %v6544_v38, %v6544_v38 }
 0x73d   :  { %v2961_v47 = vmul.f32 %v4515_v56, %v2960_v14  ;;  %v2967_v12 = vmul.f32 %v4517_v20, %v2932_v52  ;;  %vm2973_vm6 = vweird.f32 %v4517_v20 }
 0x73e   :  { %4518 = vrsqrt.f32 %v2933_v32  ;;  %vm2974_vm8 = vmor %vm2972_vm7, %vm2973_vm6  ;;  %vm2982_vm10 = vweird.f32 %v2933_v32 }
 0x73f   :  { %v2965_v18 = vsel %vm2964_vm5, %v4515_v56, %v2961_v47  ;;  %v2968_v48 = vmul.f32 %v4517_v20, %v2967_v12  ;;  %v2830_v24 = vpop.f32.mrf.mxu3 }
 0x740   :  { %v2886_v63 = vsub.f32 %v2830_v24, %v2870_v4  ;;  %v6555_v11 = vmul.f32 %v2965_v18, %v6552_v19 }
 0x741   :  { %v2969_v17 = vmul.f32 0.5, %v2968_v48 }
 0x742   :  { %v2902_v2 = vmax.f32 %v2886_v63, 0.0  ;;  %v3123_v30 = vmul.f32 %v6555_v11, %v2756_v28 }
 0x743   :  { %v2970_v29 = vsub.f32 1.5, %v2969_v17  ;;  %v6558_v23 = vpop.f32.mrf.mxu2 }
 0x744   :  { %v4519_v31 = vpop.eup %4518  ;;  %v2934_v9 = vadd.f32 1e-05, %v2902_v2  ;;  %3156 = vrot.lane.b32.xlu2 %v3123_v30, %s4572_s12  ;;  %v2871_v39 = vmul.f32 %v6558_v23, %v6558_v23  ;;  %v6596_v30 = vld [vmem:[%s7108_s8 + $0x120] sm:$0xff] }
 0x745   :  { %v2971_v25 = vmul.f32 %v4517_v20, %v2970_v29  ;;  %v2977_v16 = vmul.f32 %v4519_v31, %v2933_v32  ;;  %vm2983_vm9 = vweird.f32 %v4519_v31 }
 0x746   :  { %4520 = vrsqrt.f32 %v2934_v9  ;;  %vm2984_vm11 = vmor %vm2982_vm10, %vm2983_vm9  ;;  %vm2992_vm13 = vweird.f32 %v2934_v9 }
 0x747   :  { %v2975_v28 = vsel %vm2974_vm8, %v4517_v20, %v2971_v25  ;;  %v2978_v60 = vmul.f32 %v4519_v31, %v2977_v16  ;;  %v2833_v44 = vpop.f32.mrf.mxu3 }
 0x748   :  { %v2887_v57 = vsub.f32 %v2833_v44, %v2871_v39  ;;  %v6569_v50 = vmul.f32 %v2975_v28, %v6566_v37 }
 0x749   :  { %v2979_v13 = vmul.f32 0.5, %v2978_v60 }
 0x74a   :  { %v2903_v56 = vmax.f32 %v2887_v57, 0.0  ;;  %v3124_v52 = vmul.f32 %v6569_v50, %v6527_v61 }
 0x74b   :  { %v2980_v5 = vsub.f32 1.5, %v2979_v13  ;;  %v6573_v26 = vpop.f32.mrf.mxu2 }
 0x74c   :  { %v4521_v33 = vpop.eup %4520  ;;  %v2935_v3 = vadd.f32 1e-05, %v2903_v56  ;;  %3158 = vrot.lane.b32.xlu2 %v3124_v52, %s4572_s12  ;;  %v2872_v54 = vmul.f32 %v6573_v26, %v6573_v26 }
 0x74d   :  { %v2981_v49 = vmul.f32 %v4519_v31, %v2980_v5  ;;  %v2987_v46 = vmul.f32 %v4521_v33, %v2934_v9  ;;  %vm2993_vm12 = vweird.f32 %v4521_v33 }
 0x74e   :  { %4522 = vrsqrt.f32 %v2935_v3  ;;  %vm2994_vm14 = vmor %vm2992_vm13, %vm2993_vm12  ;;  %vm3002_vm0 = vweird.f32 %v2935_v3 }
 0x74f   :  { %v2985_v61 = vsel %vm2984_vm11, %v4519_v31, %v2981_v49  ;;  %v2988_v0 = vmul.f32 %v4521_v33, %v2987_v46  ;;  %v2836_v62 = vpop.f32.mrf.mxu3 }
 0x750   :  { %v2888_v14 = vsub.f32 %v2836_v62, %v2872_v54  ;;  %v6584_v20 = vmul.f32 %v2985_v61, %v6581_v35 }
 0x751   :  { %v2989_v4 = vmul.f32 0.5, %v2988_v0 }
 0x752   :  { %v2904_v47 = vmax.f32 %v2888_v14, 0.0  ;;  %v3125_v32 = vmul.f32 %v6584_v20, %v6531_v55 }
 0x753   :  { %v2990_v12 = vsub.f32 1.5, %v2989_v4  ;;  %v6588_v18 = vpop.f32.mrf.mxu2 }
 0x754   :  { %v4523_v48 = vpop.eup %4522  ;;  %v2936_v24 = vadd.f32 1e-05, %v2904_v47  ;;  %3160 = vrot.lane.b32.xlu0 %v3125_v32, %s4572_s12  ;;  %v2873_v63 = vmul.f32 %v6588_v18, %v6588_v18 }
 0x755   :  { %v2991_v17 = vmul.f32 %v4521_v33, %v2990_v12  ;;  %v2997_v2 = vmul.f32 %v4523_v48, %v2935_v3  ;;  %vm3003_vm15 = vweird.f32 %v4523_v48 }
 0x756   :  { %4524 = vrsqrt.f32 %v2936_v24  ;;  %vm3004_vm1 = vmor %vm3002_vm0, %vm3003_vm15  ;;  %vm3012_vm3 = vweird.f32 %v2936_v24 }
 0x757   :  { %v2995_v55 = vsel %vm2994_vm14, %v4521_v33, %v2991_v17  ;;  %v2998_v29 = vmul.f32 %v4523_v48, %v2997_v2  ;;  %v2839_v31 = vpop.f32.mrf.mxu3  ;;  %v6611_v33 = vld [vmem:[%s7108_s8 + $0x128] sm:$0xff]  ;;  %v6626_v17 = vld [vmem:[%s7108_s8 + $0x130] sm:$0xff] }
 0x758   :  { %v2889_v39 = vsub.f32 %v2839_v31, %v2873_v63  ;;  %v6599_v25 = vmul.f32 %v2995_v55, %v6596_v30 }
 0x759   :  { %v2999_v16 = vmul.f32 0.5, %v2998_v29 }
 0x75a   :  { %v2905_v28 = vmax.f32 %v2889_v39, 0.0  ;;  %v3126_v9 = vmul.f32 %v6599_v25, %v6544_v38 }
 0x75b   :  { %v3000_v60 = vsub.f32 1.5, %v2999_v16  ;;  %v6603_v44 = vpop.f32.mrf.mxu2 }
 0x75c   :  { %v4525_v57 = vpop.eup %4524  ;;  %v2937_v13 = vadd.f32 1e-05, %v2905_v28  ;;  %3162 = vrot.lane.b32.xlu0 %v3126_v9, %s4572_s12  ;;  %v2874_v56 = vmul.f32 %v6603_v44, %v6603_v44 }
 0x75d   :  { %v3001_v52 = vmul.f32 %v4523_v48, %v3000_v60  ;;  %v3007_v5 = vmul.f32 %v4525_v57, %v2936_v24  ;;  %vm3013_vm2 = vweird.f32 %v4525_v57 }
 0x75e   :  { %4526 = vrsqrt.f32 %v2937_v13  ;;  %vm3014_vm4 = vmor %vm3012_vm3, %vm3013_vm2  ;;  %vm3022_vm6 = vweird.f32 %v2937_v13 }
 0x75f   :  { %v3005_v38 = vsel %vm3004_vm1, %v4523_v48, %v3001_v52  ;;  %v3008_v54 = vmul.f32 %v4525_v57, %v3007_v5  ;;  %v2842_v49 = vpop.f32.mrf.mxu3 }
 0x760   :  { %v2890_v46 = vsub.f32 %v2842_v49, %v2874_v56  ;;  %v6614_v61 = vmul.f32 %v3005_v38, %v6611_v33  ;;  %v6638_v38 = vld [vmem:[%s7108_s8 + $0x138] sm:$0xff] }
 0x761   :  { %v3009_v0 = vmul.f32 0.5, %v3008_v54 }
 0x762   :  { %v2906_v62 = vmax.f32 %v2890_v46, 0.0  ;;  %v3127_v3 = vmul.f32 %v6614_v61, %v6558_v23 }
 0x763   :  { %v3010_v14 = vsub.f32 1.5, %v3009_v0  ;;  %v6618_v4 = vpop.f32.mrf.mxu2 }
 0x764   :  { %v4527_v47 = vpop.eup %4526  ;;  %v2938_v32 = vadd.f32 1e-05, %v2906_v62  ;;  %3164 = vrot.lane.b32.xlu1 %v3127_v3, %s4572_s12  ;;  %v2875_v12 = vmul.f32 %v6618_v4, %v6618_v4 }
 0x765   :  { %v3011_v48 = vmul.f32 %v4525_v57, %v3010_v14  ;;  %v3017_v63 = vmul.f32 %v4527_v47, %v2937_v13  ;;  %vm3023_vm5 = vweird.f32 %v4527_v47 }
 0x766   :  { %4528 = vrsqrt.f32 %v2938_v32  ;;  %vm3024_vm7 = vmor %vm3022_vm6, %vm3023_vm5  ;;  %vm3032_vm9 = vweird.f32 %v2938_v32 }
 0x767   :  { %v3018_v23 = vmul.f32 %v4527_v47, %v3017_v63  ;;  %v2845_v2 = vpop.f32.mrf.mxu3  ;;  %v3015_v55 = vsel %vm3014_vm4, %v4525_v57, %v3011_v48 }
 0x768   :  { %v2891_v29 = vsub.f32 %v2845_v2, %v2875_v12  ;;  %v3112_v31 = vmul.f32 %v3015_v55, %v6626_v17  ;;  %v6653_v55 = vld [vmem:[%s7108_s8 + $0x140] sm:$0xff] }
 0x769   :  { %v3019_v39 = vmul.f32 0.5, %v3018_v23 }
 0x76a   :  { %v2907_v16 = vmax.f32 %v2891_v29, 0.0  ;;  %3250 = vperm.xlu0 %4426, %v3112_v31   ;;  %v3128_v28 = vmul.f32 %v3112_v31, %v6573_v26 }
 0x76b   :  { %v3020_v24 = vsub.f32 1.5, %v3019_v39  ;;  %v6630_v9 = vpop.f32.mrf.mxu2 }
 0x76c   :  { %v4529_v60 = vpop.eup %4528  ;;  %v2939_v56 = vadd.f32 1e-05, %v2907_v16  ;;  %3166 = vrot.lane.b32.xlu1 %v3128_v28, %s4572_s12  ;;  %v2876_v52 = vmul.f32 %v6630_v9, %v6630_v9 }
 0x76d   :  { %v3021_v57 = vmul.f32 %v4527_v47, %v3020_v24  ;;  %v3027_v5 = vmul.f32 %v4529_v60, %v2938_v32  ;;  %vm3033_vm8 = vweird.f32 %v4529_v60 }
 0x76e   :  { %4530 = vrsqrt.f32 %v2939_v56  ;;  %vm3034_vm10 = vmor %vm3032_vm9, %vm3033_vm8  ;;  %vm3042_vm12 = vweird.f32 %v2939_v56 }
 0x76f   :  { %v3025_v26 = vsel %vm3024_vm7, %v4527_v47, %v3021_v57  ;;  %v3028_v54 = vmul.f32 %v4529_v60, %v3027_v5  ;;  %v2848_v49 = vpop.f32.mrf.mxu3 }
 0x770   :  { %v2892_v46 = vsub.f32 %v2848_v49, %v2876_v52  ;;  %v6641_v0 = vmul.f32 %v3025_v26, %v6638_v38 }
 0x771   :  { %v3029_v62 = vmul.f32 0.5, %v3028_v54 }
 0x772   :  { %v2908_v3 = vmax.f32 %v2892_v46, 0.0  ;;  %v3129_v13 = vmul.f32 %v6641_v0, %v6588_v18  ;;  %v6665_v46 = vld [vmem:[%s7108_s8 + $0x148] sm:$0xff] }
 0x773   :  { %v3030_v14 = vsub.f32 1.5, %v3029_v62  ;;  %v6645_v12 = vpop.f32.mrf.mxu2 }
 0x774   :  { %v4531_v48 = vpop.eup %4530  ;;  %v2940_v63 = vadd.f32 1e-05, %v2908_v3  ;;  %3168 = vrot.lane.b32.xlu2 %v3129_v13, %s4572_s12  ;;  %v2877_v47 = vmul.f32 %v6645_v12, %v6645_v12 }
 0x775   :  { %v3031_v23 = vmul.f32 %v4529_v60, %v3030_v14  ;;  %v3037_v2 = vmul.f32 %v4531_v48, %v2939_v56  ;;  %vm3043_vm11 = vweird.f32 %v4531_v48 }
 0x776   :  { %4532 = vrsqrt.f32 %v2940_v63  ;;  %vm3044_vm13 = vmor %vm3042_vm12, %vm3043_vm11  ;;  %vm3052_vm15 = vweird.f32 %v2940_v63 }
 0x777   :  { %v3038_v18 = vmul.f32 %v4531_v48, %v3037_v2  ;;  %v2851_v29 = vpop.f32.mrf.mxu3  ;;  %v3035_v31 = vsel %vm3034_vm10, %v4529_v60, %v3031_v23 }
 0x778   :  { %v2893_v39 = vsub.f32 %v2851_v29, %v2877_v47  ;;  %v3114_v16 = vmul.f32 %v3035_v31, %v6653_v55 }
 0x779   :  { %v3039_v28 = vmul.f32 0.5, %v3038_v18 }
 0x77a   :  { %v2909_v24 = vmax.f32 %v2893_v39, 0.0  ;;  %3260 = vperm.xlu1 %4427, %v3114_v16   ;;  %v3130_v52 = vmul.f32 %v3114_v16, %v6603_v44 }
 0x77b   :  { %v3040_v32 = vsub.f32 1.5, %v3039_v28  ;;  %v6657_v57 = vpop.f32.mrf.mxu2 }
 0x77c   :  { %v4533_v5 = vpop.eup %4532  ;;  %v2941_v26 = vadd.f32 1e-05, %v2909_v24  ;;  %3170 = vrot.lane.b32.xlu2 %v3130_v52, %s4572_s12  ;;  %v2878_v54 = vmul.f32 %v6657_v57, %v6657_v57 }
 0x77d   :  { %v3041_v60 = vmul.f32 %v4531_v48, %v3040_v32  ;;  %v3047_v49 = vmul.f32 %v4533_v5, %v2940_v63  ;;  %vm3053_vm14 = vweird.f32 %v4533_v5 }
 0x77e   :  { %4534 = vrsqrt.f32 %v2941_v26  ;;  %vm3054_vm0 = vmor %vm3052_vm15, %vm3053_vm14  ;;  %vm3062_vm2 = vweird.f32 %v2941_v26 }
 0x77f   :  { %v3048_v44 = vmul.f32 %v4533_v5, %v3047_v49  ;;  %v2854_v62 = vpop.f32.mrf.mxu3  ;;  %v3045_v3 = vsel %vm3044_vm13, %v4531_v48, %v3041_v60 }
 0x780   :  { %v2894_v13 = vsub.f32 %v2854_v62, %v2878_v54  ;;  %v3115_v14 = vmul.f32 %v3045_v3, %v6665_v46 }
 0x781   :  { %v3049_v47 = vmul.f32 0.5, %v3048_v44 }
 0x782   :  { %v2910_v23 = vmax.f32 %v2894_v13, 0.0  ;;  %v3131_v2 = vmul.f32 %v3115_v14, %v6618_v4  ;;  %v6677_v4 = vld [vmem:[%s7108_s8 + $0x150] sm:$0xff] }
 0x783   :  { %v3050_v18 = vsub.f32 1.5, %v3049_v47  ;;  %v6669_v56 = vpop.f32.mrf.mxu2 }
 0x784   :  { %v4535_v29 = vpop.eup %4534  ;;  %v2942_v31 = vadd.f32 1e-05, %v2910_v23  ;;  %3265 = vperm.xlu2 %4428, %v3115_v14   ;;  %3172 = vrot.lane.b32.xlu0 %v3131_v2, %s4572_s12  ;;  %v2879_v39 = vmul.f32 %v6669_v56, %v6669_v56 }
 0x785   :  { %v3051_v48 = vmul.f32 %v4533_v5, %v3050_v18  ;;  %v3057_v16 = vmul.f32 %v4535_v29, %v2941_v26  ;;  %vm3063_vm1 = vweird.f32 %v4535_v29 }
 0x786   :  { %4536 = vrsqrt.f32 %v2942_v31  ;;  %vm3064_vm3 = vmor %vm3062_vm2, %vm3063_vm1  ;;  %vm3072_vm5 = vweird.f32 %v2942_v31 }
 0x787   :  { %v3058_v28 = vmul.f32 %v4535_v29, %v3057_v16  ;;  %v2857_v24 = vpop.f32.mrf.mxu3  ;;  %v3055_v52 = vsel %vm3054_vm0, %v4533_v5, %v3051_v48  ;;  %v6687_v5 = vld [vmem:[%s7108_s8 + $0x158] sm:$0xff] }
 0x788   :  { %v2895_v32 = vsub.f32 %v2857_v24, %v2879_v39  ;;  %v3116_v49 = vmul.f32 %v3055_v52, %v6677_v4 }
 0x789   :  { %v3059_v54 = vmul.f32 0.5, %v3058_v28 }
 0x78a   :  { %v2911_v60 = vmax.f32 %v2895_v32, 0.0  ;;  %v3132_v24 = vmul.f32 %v3116_v49, %v6630_v9 }
 0x78b   :  { %v3060_v44 = vsub.f32 1.5, %v3059_v54  ;;  %v6680_v62 = vpop.f32.mrf.mxu2 }
 0x78c   :  { %v4537_v63 = vpop.eup %4536  ;;  %v2943_v3 = vadd.f32 1e-05, %v2911_v60  ;;  %3270 = vperm.xlu0 %4426, %v3116_v49   ;;  %v2880_v13 = vmul.f32 %v6680_v62, %v6680_v62 }
 0x78d   :  { %v3061_v14 = vmul.f32 %v4535_v29, %v3060_v44  ;;  %v3067_v47 = vmul.f32 %v4537_v63, %v2942_v31  ;;  %vm3073_vm4 = vweird.f32 %v4537_v63 }
 0x78e   :  { %4538 = vrsqrt.f32 %v2943_v3  ;;  %vm3074_vm6 = vmor %vm3072_vm5, %vm3073_vm4  ;;  %vm3082_vm8 = vweird.f32 %v2943_v3 }
 0x78f   :  { %v3068_v23 = vmul.f32 %v4537_v63, %v3067_v47  ;;  %v2860_v2 = vpop.f32.mrf.mxu3  ;;  %v3065_v18 = vsel %vm3064_vm3, %v4535_v29, %v3061_v14 }
 0x790   :  { %v2896_v39 = vsub.f32 %v2860_v2, %v2880_v13  ;;  %v3117_v48 = vmul.f32 %v3065_v18, %v6687_v5  ;;  %v6699_v13 = vld [vmem:[%s7108_s8 + $0x160] sm:$0xff] }
 0x791   :  { %v3069_v16 = vmul.f32 0.5, %v3068_v23 }
 0x792   :  { %v2912_v28 = vmax.f32 %v2896_v39, 0.0  ;;  %3275 = vperm.xlu1 %4427, %v3117_v48   ;;  %v3133_v23 = vmul.f32 %v3117_v48, %v6645_v12  ;;  %v6709_v12 = vld [vmem:[%s7108_s8 + $0x168] sm:$0xff] }
 0x793   :  { %v3070_v26 = vsub.f32 1.5, %v3069_v16  ;;  %v6691_v52 = vpop.f32.mrf.mxu2 }
 0x794   :  { %v4539_v32 = vpop.eup %4538  ;;  %v2944_v54 = vadd.f32 1e-05, %v2912_v28  ;;  %3174 = vrot.lane.b32.xlu0 %v3132_v24, %s4572_s12  ;;  %v2881_v60 = vmul.f32 %v6691_v52, %v6691_v52 }
 0x795   :  { %v3071_v29 = vmul.f32 %v4537_v63, %v3070_v26  ;;  %v3077_v44 = vmul.f32 %v4539_v32, %v2943_v3  ;;  %vm3083_vm7 = vweird.f32 %v4539_v32 }
 0x796   :  { %4540 = vrsqrt.f32 %v2944_v54  ;;  %vm3084_vm9 = vmor %vm3082_vm8, %vm3083_vm7  ;;  %vm3092_vm11 = vweird.f32 %v2944_v54 }
 0x797   :  { %v3078_v9 = vmul.f32 %v4539_v32, %v3077_v44  ;;  %v2863_v49 = vpop.f32.mrf.mxu3  ;;  %v3075_v14 = vsel %vm3074_vm6, %v4537_v63, %v3071_v29 }
 0x798   :  { %v2897_v47 = vsub.f32 %v2863_v49, %v2881_v60  ;;  %v3118_v2 = vmul.f32 %v3075_v14, %v6699_v13 }
 0x799   :  { %v3079_v18 = vmul.f32 0.5, %v3078_v9 }
 0x79a   :  { %v2913_v39 = vmax.f32 %v2897_v47, 0.0  ;;  %3176 = vrot.lane.b32.xlu1 %v3133_v23, %s4572_s12  ;;  %3280 = vperm.xlu2 %4428, %v3118_v2   ;;  %v3134_v31 = vmul.f32 %v3118_v2, %v6657_v57  ;;  %v6717_v47 = vld [vmem:[%s7108_s8 + $0x170] sm:$0xff] }
 0x79b   :  { %v3080_v16 = vsub.f32 1.5, %v3079_v18 }
 0x79c   :  { %v4541_v28 = vpop.eup %4540  ;;  %v2945_v24 = vadd.f32 1e-05, %v2913_v39  ;;  %3178 = vrot.lane.b32.xlu0 %v3134_v31, %s4572_s12  ;;  %v6725_v31 = vld [vmem:[%s7108_s8 + $0x178] sm:$0xff] }
 0x79d   :  { %v3081_v26 = vmul.f32 %v4539_v32, %v3080_v16  ;;  %v3087_v63 = vmul.f32 %v4541_v28, %v2944_v54  ;;  %vm3093_vm10 = vweird.f32 %v4541_v28 }
 0x79e   :  { %4542 = vrsqrt.f32 %v2945_v24  ;;  %vm3094_vm12 = vmor %vm3092_vm11, %vm3093_vm10  ;;  %vm3102_vm14 = vweird.f32 %v2945_v24 }
 0x79f   :  { %v3088_v48 = vmul.f32 %v4541_v28, %v3087_v63  ;;  %v3085_v60 = vsel %vm3084_vm9, %v4539_v32, %v3081_v26  ;;  %v6732_v26 = vpop.permute.xlu2 %3156 }
 0x7a0   :  { %v3119_v57 = vmul.f32 %v3085_v60, %v6709_v12 }
 0x7a1   :  { %v3089_v29 = vmul.f32 0.5, %v3088_v48 }
 0x7a2   :  { %v3135_v44 = vmul.f32 %v3119_v57, %v6669_v56 }
 0x7a3   :  { %v3090_v9 = vsub.f32 1.5, %v3089_v29 }
 0x7a4   :  { %v4543_v49 = vpop.eup %4542  ;;  %3285 = vperm.xlu0 %4426, %v3119_v57   ;;  %3180 = vrot.lane.b32.xlu2 %v3135_v44, %s4572_s12 }
 0x7a5   :  { %v3091_v3 = vmul.f32 %v4541_v28, %v3090_v9  ;;  %v3097_v14 = vmul.f32 %v4543_v49, %v2945_v24  ;;  %vm3103_vm13 = vweird.f32 %v4543_v49 }
 0x7a6   :  { %vm3104_vm15 = vmor %vm3102_vm14, %vm3103_vm13 }
 0x7a7   :  { %v3098_v32 = vmul.f32 %v4543_v49, %v3097_v14  ;;  %v3095_v23 = vsel %vm3094_vm12, %v4541_v28, %v3091_v3  ;;  %v3159_v24 = vpop.permute.xlu2 %3158 }
 0x7a8   :  { %v3120_v2 = vmul.f32 %v3095_v23, %v6717_v47 }
 0x7a9   :  { %v3099_v56 = vmul.f32 0.5, %v3098_v32 }
 0x7aa   :  { %v3136_v18 = vmul.f32 %v3120_v2, %v6680_v62 }
 0x7ab   :  { %v3100_v39 = vsub.f32 1.5, %v3099_v56 }
 0x7ac   :  { %3290 = vperm.xlu0 %4426, %v3120_v2   ;;  %3182 = vrot.lane.b32.xlu2 %v3136_v18, %s4572_s12 }
 0x7ad   :  { %v3101_v54 = vmul.f32 %v4543_v49, %v3100_v39 }
 0x7ae   :  { %v6738_v63 = vpop.permute.xlu1 %3154 }
 0x7af   :  { %v3105_v16 = vsel %vm3104_vm15, %v4543_v49, %v3101_v54 }
 0x7b0   :  { %v3121_v28 = vmul.f32 %v3105_v16, %v6725_v31 }
 0x7b2   :  { %3295 = vperm.xlu1 %4427, %v3121_v28   ;;  %v3137_v62 = vmul.f32 %v3121_v28, %v6691_v52 }
 0x7b4   :  { %3245 = vperm.xlu0 %4426, %v6614_v61   ;;  %3240 = vperm.xlu2 %4428, %v6599_v25  }
 0x7ba   :  { %3184 = vrot.lane.b32.xlu1 %v3137_v62, %s4572_s12 }
 0x7bc   :  { %4429 = vset.pattern.permute.xlu2 %v7195_v43  ;;  %4431 = vset.pattern.permute.xlu0 %v7195_v43 }
 0x7c2   :  { %3255 = vperm.xlu1 %4427, %v6641_v0  }
 0x7c6   :  { %v3161_v57 = vpop.permute.xlu0 %3160 }
 0x7ca   :  { %4430 = vset.pattern.permute.xlu1 %v7195_v43 }
 0x7ce   :  { %v3169_v61 = vpop.permute.xlu2 %3168  ;;  %v3163_v0 = vpop.permute.xlu0 %3162 }
 0x7cf   :  { %v3209_v25 = vsub.f32 %v6638_v38, %v3169_v61 }
 0x7d1   :  { %3351 = vperm.xlu1 %4430, %v3209_v25  }
 0x7d6   :  { %v3165_v52 = vpop.permute.xlu1 %3164  ;;  %v3171_v48 = vpop.permute.xlu2 %3170 }
 0x7d7   :  { %v3210_v60 = vsub.f32 %v6653_v55, %v3171_v48 }
 0x7d9   :  { %3356 = vperm.xlu1 %4430, %v3210_v60  }
 0x7dc   :  { %v6743_v9 = vpop.permute.xlu0 %3250 }
 0x7de   :  { %v3167_v29 = vpop.permute.xlu1 %3166  ;;  %v3266_v14 = vpop.permute.xlu2 %3265 }
 0x7df   :  { %v3208_v44 = vsub.f32 %v6626_v17, %v3167_v29 }
 0x7e1   :  { %3346 = vperm.xlu2 %4429, %v3208_v44  }
 0x7ec   :  { %v3261_v38 = vpop.permute.xlu1 %3260 }
 0x7f4   :  { %v6748_v23 = vpop.permute.xlu2 %3280 }
 0x7f6   :  { %v3173_v49 = vpop.permute.xlu0 %3172 }
 0x7f7   :  { %v3211_v3 = vsub.f32 %v6665_v46, %v3173_v49 }
 0x7f9   :  { %3361 = vperm.xlu2 %4429, %v3211_v3  }
 0x7fe   :  { %v6746_v32 = vpop.permute.xlu0 %3270  ;;  %v3181_v17 = vpop.permute.xlu2 %3180 }
 0x7ff   :  { %v3215_v46 = vsub.f32 %v6709_v12, %v3181_v17  ;;  %v3204_v12 = vsub.f32 %v6566_v37, %v3159_v24  ;;  %v3202_v24 = vsub.f32 %v6538_v1, %v6738_v63  ;;  %v3308_v3 = vmul.f32 %v6746_v32, %v6408_v51 }
 0x804   :  { %v6750_v55 = vpop.permute.xlu1 %3275 }
 0x806   :  { %v3175_v2 = vpop.permute.xlu0 %3174  ;;  %v3183_v28 = vpop.permute.xlu2 %3182 }
 0x807   :  { %v3212_v56 = vsub.f32 %v6677_v4, %v3175_v2  ;;  %v3216_v62 = vsub.f32 %v6717_v47, %v3183_v28  ;;  %v3205_v4 = vsub.f32 %v6581_v35, %v3161_v57  ;;  %v3203_v35 = vsub.f32 %v6552_v19, %v6732_v26 }
 0x809   :  { %3366 = vperm.xlu2 %4429, %v3212_v56  }
 0x80c   :  { %v3177_v18 = vpop.permute.xlu1 %3176 }
 0x80d   :  { %v3213_v39 = vsub.f32 %v6687_v5, %v3177_v18  ;;  %v3207_v5 = vsub.f32 %v6611_v33, %v3165_v52 }
 0x80e   :  { %v3179_v54 = vpop.permute.xlu0 %3178  ;;  %v6777_v33 = vpop.permute.xlu2 %3240 }
 0x80f   :  { %v3214_v16 = vsub.f32 %v6699_v13, %v3179_v54  ;;  %3371 = vperm.xlu0 %4431, %v3213_v39  }
 0x811   :  { %3381 = vperm.xlu2 %4429, %v3215_v46   ;;  %3376 = vperm.xlu1 %4430, %v3214_v16  }
 0x816   :  { %v3286_v29 = vpop.permute.xlu0 %3285 }
 0x817   :  { %4432 = vset.pattern.permute.xlu0 %v7192_v22 }
 0x818   :  { %3230 = vperm.xlu0 %4432, %v6569_v50   ;;  %v3206_v50 = vsub.f32 %v6596_v30, %v3163_v0  ;;  %v3306_v30 = vmul.f32 %v3261_v38, %v6398_v10  ;;  %v6793_v10 = vld [vmem:[%s7109_s9] ss:$0 sm:$0xff]  ;;  %v3309_v38 = vmul.f32 %v6750_v55, %v6413_v34  ;;  %v3310_v34 = vmul.f32 %v6748_v23, %v6418_v40 }
 0x819   :  { %3386 = vperm.xlu2 %4429, %v3216_v62  }
 0x81e   :  { %v3291_v44 = vpop.permute.xlu0 %3290 }
 0x81f   :  { %v3312_v32 = vmul.f32 %v3291_v44, %v6429_v45 }
 0x820   :  { %4434 = vset.pattern.permute.xlu0 %v7195_v43 }
 0x821   :  { %3331 = vperm.xlu0 %4434, %v3205_v4   ;;  %3341 = vperm.xlu2 %4429, %v3207_v5  }
 0x824   :  { %v6762_v13 = vpop.permute.xlu1 %3295 }
 0x826   :  { %v3246_v0 = vpop.permute.xlu0 %3245 }
 0x829   :  { %3326 = vperm.xlu2 %4429, %v3204_v12   ;;  %4440 = vset.pattern.permute.xlu0 %v7192_v22  ;;  %v3311_v12 = vmul.f32 %v3286_v29, %v6423_v53 }
 0x82c   :  { %v3185_v47 = vpop.permute.xlu1 %3184 }
 0x82d   :  { %v3217_v61 = vsub.f32 %v6725_v31, %v3185_v47 }
 0x82f   :  { %3391 = vperm.xlu1 %4430, %v3217_v61   ;;  %v3313_v61 = vmul.f32 %v6762_v13, %v6433_v6 }
 0x831   :  { %4435 = vset.pattern.permute.xlu2 %v7192_v22 }
 0x832   :  { %3225 = vperm.xlu2 %4435, %v6555_v11  }
 0x834   :  { %v6773_v37 = vpop.permute.xlu1 %3255 }
 0x835   :  { %v3305_v6 = vmul.f32 %v6773_v37, %v6395_v21  ;;  %v3303_v37 = vmul.f32 %v3246_v0, %v6389_v7 }
 0x837   :  { %3336 = vperm.xlu1 %4430, %v3206_v50  }
 0x83a   :  { %4437 = vset.pattern.permute.xlu2 %v7195_v43 }
 0x83b   :  { %3321 = vperm.xlu2 %4437, %v3203_v35   ;;  %v6783_v11 = vpop.permute.xlu2 %3346 }
 0x83f   :  { %4433 = vset.pattern.permute.xlu1 %v7192_v22 }
 0x840   :  { %3235 = vperm.xlu1 %4433, %v6584_v20   ;;  %v3307_v20 = vmul.f32 %v3266_v14, %v6403_v59 }
 0x843   :  { %v6779_v31 = vpop.permute.xlu1 %3351  ;;  %4438 = vset.pattern.permute.xlu2 %v7192_v22 }
 0x844   :  { %v3401_v29 = vadd.f32 %v6779_v31, %v3305_v6 }
 0x846   :  { %vm3417_vm8 = vcmp.ge.f32.partialorder %v3401_v29, 0.0 }
 0x848   :  { %3220 = vperm.xlu1 %4433, %v6541_v27  }
 0x84b   :  { %v3357_v19 = vpop.permute.xlu1 %3356 }
 0x84c   :  { %v3402_v26 = vadd.f32 %v3357_v19, %v3306_v30 }
 0x84e   :  { %v3434_v25 = vmul.f32 0.2, %v3402_v26  ;;  %vm3418_vm0 = vcmp.ge.f32.partialorder %v3402_v26, 0.0 }
 0x850   :  { %4436 = vset.pattern.permute.xlu1 %v7195_v43  ;;  %v3450_v60 = vsel %vm3418_vm0, %v3402_v26, %v3434_v25  ;;  %vm3591_vm0 = vcmask 523264  }
 0x851   :  { %3316 = vperm.xlu1 %4436, %v3202_v24   ;;  %v6796_v1 = vmul.f32 %v6793_v10, %v3450_v60 }
 0x853   :  { %v3362_v52 = vpop.permute.xlu2 %3361 }
 0x854   :  { %v3403_v48 = vadd.f32 %v3362_v52, %v3307_v20 }
 0x856   :  { %vm3419_vm1 = vcmp.ge.f32.partialorder %v3403_v48, 0.0  ;;  %v3435_v27 = vmul.f32 0.2, %v3403_v48 }
 0x858   :  { %v3451_v57 = vsel %vm3419_vm1, %v3403_v48, %v3435_v27 }
 0x859   :  { %v6799_v63 = vmul.f32 %v6793_v10, %v3451_v57  ;;  %4439 = vset.pattern.permute.xlu1 %v7192_v22  ;;  %v3304_v57 = vmul.f32 %v6743_v9, %v6392_v15 }
 0x85b   :  { %v3478_v59 = vpack.c.bf16 %v6799_v63, %v6796_v1 }
 0x863   :  { %v3367_v49 = vpop.permute.xlu2 %3366 }
 0x864   :  { %v3404_v14 = vadd.f32 %v3367_v49, %v3308_v3  ;;  %v3302_v3 = vmul.f32 %v6777_v33, %v6444_v41 }
 0x866   :  { %v3436_v2 = vmul.f32 0.2, %v3404_v14  ;;  %vm3420_vm2 = vcmp.ge.f32.partialorder %v3404_v14, 0.0 }
 0x868   :  { %v3452_v18 = vsel %vm3420_vm2, %v3404_v14, %v3436_v2  ;;  %v3400_v14 = vadd.f32 %v6783_v11, %v3304_v57 }
 0x869   :  { %v3468_v46 = vmul.f32 %v6793_v10, %v3452_v18 }
 0x86a   :  { %vm3416_vm9 = vcmp.ge.f32.partialorder %v3400_v14, 0.0 }
 0x86b   :  { %v3382_v28 = vpop.permute.xlu2 %3381 }
 0x86c   :  { %v3407_v50 = vadd.f32 %v3382_v28, %v3311_v12 }
 0x86e   :  { %v3439_v24 = vmul.f32 0.2, %v3407_v50  ;;  %vm3423_vm7 = vcmp.ge.f32.partialorder %v3407_v50, 0.0 }
 0x870   :  { %v3455_v13 = vsel %vm3423_vm7, %v3407_v50, %v3439_v24 }
 0x871   :  { %v3471_v49 = vmul.f32 %v6793_v10, %v3455_v13 }
 0x873   :  { %v3387_v4 = vpop.permute.xlu2 %3386 }
 0x874   :  { %v3408_v55 = vadd.f32 %v3387_v4, %v3312_v32 }
 0x876   :  { %v3440_v35 = vmul.f32 0.2, %v3408_v55  ;;  %vm3424_vm4 = vcmp.ge.f32.partialorder %v3408_v55, 0.0 }
 0x878   :  { %v3456_v45 = vsel %vm3424_vm4, %v3408_v55, %v3440_v35 }
 0x879   :  { %v3472_v53 = vmul.f32 %v6793_v10, %v3456_v45 }
 0x87b   :  { %v3342_v5 = vpop.permute.xlu2 %3341 }
 0x87c   :  { %v3399_v15 = vadd.f32 %v3342_v5, %v3303_v37 }
 0x87e   :  { %v3431_v11 = vmul.f32 0.2, %v3399_v15  ;;  %vm3415_vm11 = vcmp.ge.f32.partialorder %v3399_v15, 0.0 }
 0x880   :  { %v3447_v4 = vsel %vm3415_vm11, %v3399_v15, %v3431_v11 }
 0x881   :  { %v3372_v56 = vpop.permute.xlu0 %3371  ;;  %v3463_v5 = vmul.f32 %v6793_v10, %v3447_v4  ;;  %v3584_v4 = vld [vmem:[%s7113_s7 + $0x8] sm:$0xff] }
 0x882   :  { %v3405_v17 = vadd.f32 %v3372_v56, %v3309_v38  ;;  %v3433_v38 = vmul.f32 0.2, %v3401_v29  ;;  %v3432_v56 = vmul.f32 0.2, %v3400_v14 }
 0x883   :  { %v3377_v51 = vpop.permute.xlu1 %3376  ;;  %v3327_v25 = vpop.permute.xlu2 %3326 }
 0x884   :  { %vm3421_vm3 = vcmp.ge.f32.partialorder %v3405_v17, 0.0  ;;  %v3437_v39 = vmul.f32 0.2, %v3405_v17  ;;  %v3406_v47 = vadd.f32 %v3377_v51, %v3310_v34  ;;  %v3448_v33 = vsel %vm3416_vm9, %v3400_v14, %v3432_v56 }
 0x885   :  { %v3464_v28 = vmul.f32 %v6793_v10, %v3448_v33 }
 0x886   :  { %v3453_v54 = vsel %vm3421_vm3, %v3405_v17, %v3437_v39  ;;  %v3438_v30 = vmul.f32 0.2, %v3406_v47  ;;  %vm3422_vm5 = vcmp.ge.f32.partialorder %v3406_v47, 0.0  ;;  %v3449_v17 = vsel %vm3417_vm8, %v3401_v29, %v3433_v38 }
 0x887   :  { %v3469_v16 = vmul.f32 %v6793_v10, %v3453_v54 }
 0x888   :  { %v3454_v40 = vsel %vm3422_vm5, %v3406_v47, %v3438_v30 }
 0x889   :  { %v3479_v62 = vpack.c.bf16 %v3469_v16, %v3468_v46  ;;  %v3470_v27 = vmul.f32 %v6793_v10, %v3454_v40  ;;  %v3465_v46 = vmul.f32 %v6793_v10, %v3449_v17 }
 0x88a   :  { %v3231_v44 = vpop.permute.xlu0 %3230 }
 0x88b   :  { %v3480_v21 = vpack.c.bf16 %v3471_v49, %v3470_v27  ;;  %v3300_v9 = vmul.f32 %v3231_v44, %v6455_v58 }
 0x88c   :  { %v3226_v31 = vpop.permute.xlu2 %3225 }
 0x88d   :  { %v3396_v7 = vadd.f32 %v3327_v25, %v3300_v9  ;;  %v3299_v12 = vmul.f32 %v3226_v31, %v6465_v8  ;;  %v4390_v25 = vld [vmem:[%s7112_s3 + $0x10] sm:$0xff] }
 0x88f   :  { %vm3412_vm13 = vcmp.ge.f32.partialorder %v3396_v7, 0.0 }
 0x893   :  { %v3332_v0 = vpop.permute.xlu0 %3331 }
 0x895   :  { %v3322_v55 = vpop.permute.xlu2 %3321 }
 0x896   :  { %v3395_v63 = vadd.f32 %v3322_v55, %v3299_v12  ;;  %v3589_v55 = vld [vmem:[%s7113_s7 + $0x30] sm:$0xff] }
 0x898   :  { %v3427_v35 = vmul.f32 0.2, %v3395_v63  ;;  %vm3411_vm14 = vcmp.ge.f32.partialorder %v3395_v63, 0.0 }
 0x89a   :  { %v3443_v24 = vsel %vm3411_vm14, %v3395_v63, %v3427_v35 }
 0x89b   :  { %v3459_v40 = vmul.f32 %v6793_v10, %v3443_v24 }
 0x8a1   :  { %v3392_v19 = vpop.permute.xlu1 %3391 }
 0x8a2   :  { %v3409_v26 = vadd.f32 %v3392_v19, %v3313_v61 }
 0x8a4   :  { %vm3425_vm6 = vcmp.ge.f32.partialorder %v3409_v26, 0.0  ;;  %v3441_v20 = vmul.f32 0.2, %v3409_v26 }
 0x8a6   :  { %v3457_v23 = vsel %vm3425_vm6, %v3409_v26, %v3441_v20 }
 0x8a7   :  { %v3473_v52 = vmul.f32 %v6793_v10, %v3457_v23 }
 0x8a9   :  { %v3337_v48 = vpop.permute.xlu1 %3336  ;;  %v3481_v60 = vpack.c.bf16 %v3473_v52, %v3472_v53  ;;  %v4388_v53 = vld [vmem:[%s7112_s3] sm:$0xff]  ;;  %v4391_v52 = vld [vmem:[%s7112_s3 + $0x18] sm:$0xff] }
 0x8aa   :  { %v3398_v2 = vadd.f32 %v3337_v48, %v3302_v3 }
 0x8ab   :  { %3514 = vmatpush.bf16.msra.mxu0 %v3481_v60 }
 0x8ac   :  { %v3430_v18 = vmul.f32 0.2, %v3398_v2  ;;  %vm3414_vm10 = vcmp.ge.f32.partialorder %v3398_v2, 0.0 }
 0x8ae   :  { %v3446_v16 = vsel %vm3414_vm10, %v3398_v2, %v3430_v18 }
 0x8af   :  { %3515 = vmatpush.bf16.msra.mxu0 %v3480_v21  ;;  %v3462_v51 = vmul.f32 %v6793_v10, %v3446_v16 }
 0x8b1   :  { %v3476_v61 = vpack.c.bf16 %v3463_v5, %v3462_v51  ;;  %v3586_v51 = vld [vmem:[%s7113_s7 + $0x18] sm:$0xff] }
 0x8b2   :  { %v3236_v39 = vpop.permute.xlu1 %3235  ;;  %v3590_v5 = vld [vmem:[%s7113_s7 + $0x38] sm:$0xff] }
 0x8b3   :  { %v3301_v41 = vmul.f32 %v3236_v39, %v6451_v36  ;;  %3516 = vmatpush.bf16.msra.mxu0 %v3479_v62  ;;  %v3428_v36 = vmul.f32 0.2, %v3396_v7  ;;  %v3477_v62 = vpack.c.bf16 %v3465_v46, %v3464_v28  ;;  %v3583_v46 = vld [vmem:[%s7113_s7] sm:$0xff] }
 0x8b5   :  { %v3397_v54 = vadd.f32 %v3332_v0, %v3301_v41  ;;  %v3444_v47 = vsel %vm3412_vm13, %v3396_v7, %v3428_v36 }
 0x8b7   :  { %vm3413_vm12 = vcmp.ge.f32.partialorder %v3397_v54, 0.0  ;;  %v3429_v58 = vmul.f32 0.2, %v3397_v54  ;;  %3517 = vmatpush.bf16.msra.mxu0 %v3478_v59  ;;  %v3460_v59 = vmul.f32 %v6793_v10, %v3444_v47 }
 0x8b9   :  { %v3445_v34 = vsel %vm3413_vm12, %v3397_v54, %v3429_v58 }
 0x8ba   :  { %v3221_v32 = vpop.permute.xlu1 %3220  ;;  %v3461_v1 = vmul.f32 %v6793_v10, %v3445_v34  ;;  %v3588_v34 = vld [vmem:[%s7113_s7 + $0x28] sm:$0xff] }
 0x8bb   :  { %3518 = vmatpush.bf16.msra.mxu0 %v3477_v62  ;;  %v3298_v19 = vmul.f32 %v3221_v32, %v6472_v42  ;;  %v4389_v42 = vld [vmem:[%s7112_s3 + $0x8] sm:$0xff]  ;;  %v3585_v62 = vld [vmem:[%s7113_s7 + $0x10] sm:$0xff]  ;;  %v3587_v32 = vld [vmem:[%s7113_s7 + $0x20] sm:$0xff] }
 0x8bc   :  { %v3475_v50 = vpack.c.bf16 %v3461_v1, %v3460_v59 }
 0x8bf   :  { %3519 = vmatpush.bf16.msra.mxu0 %v3476_v61 }
 0x8c3   :  { %3520 = vmatpush.bf16.msra.mxu0 %v3475_v50  ;;  %v3317_v30 = vpop.permute.xlu1 %3316 }
 0x8c4   :  { %v3394_v26 = vadd.f32 %v3317_v30, %v3298_v19 }
 0x8c6   :  { %vm3410_vm15 = vcmp.ge.f32.partialorder %v3394_v26, 0.0  ;;  %v3426_v45 = vmul.f32 0.2, %v3394_v26 }
 0x8c8   :  { %v3442_v8 = vsel %vm3410_vm15, %v3394_v26, %v3426_v45 }
 0x8c9   :  { %v3458_v20 = vmul.f32 %v6793_v10, %v3442_v8 }
 0x8cb   :  { %v3474_v23 = vpack.c.bf16 %v3459_v40, %v3458_v20 }
 0x8cd   :  { %3521 = vmatpush.bf16.msra.mxu0 %v3474_v23 }
 0x8d0   :  { %3522 = vmatmul.bf16.vlgmr.msra.gmra.mxu0 %v4388_v53 }
 0x8e0   :  { %3527 = vmatmul.bf16.gmra.mxu0 %v4389_v42 }
 0x8f0   :  { %3532 = vmatmul.bf16.gmra.mxu0 %v4390_v25 }
 0x900   :  { %3537 = vmatmul.bf16.gmra.mxu0 %v4391_v52 }
 0x94d   :  { %v6856_v6 = vpop.f32.mrf.mxu0 }
 0x94e   :  { %v3559_v56 = vmul.f32 %v6856_v6, %v6856_v6 }
 0x955   :  { %v6858_v13 = vpop.f32.mrf.mxu0 }
 0x956   :  { %v3560_v38 = vmul.f32 %v6858_v13, %v6858_v13 }
 0x95d   :  { %v6860_v48 = vpop.f32.mrf.mxu0 }
 0x95e   :  { %v3561_v2 = vmul.f32 %v6860_v48, %v6860_v48 }
 0x965   :  { %v6862_v60 = vpop.f32.mrf.mxu0 }
 0x966   :  { %v3562_v27 = vmul.f32 %v6862_v60, %v6862_v60 }
 0x968   :  { %3573 = vadd.xlane.f32.xlu1 %v3562_v27 }
 0x96d   :  { %v6866_v57 = vpop.f32.mrf.mxu0 }
 0x96e   :  { %3551 = vadd.xlane.f32.xlu2 %v6866_v57  ;;  %v3563_v29 = vmul.f32 %v6866_v57, %v6866_v57 }
 0x975   :  { %v6871_v44 = vpop.f32.mrf.mxu0 }
 0x976   :  { %3575 = vadd.xlane.f32.xlu2 %v3563_v29  ;;  %3553 = vadd.xlane.f32.xlu0 %v6871_v44  ;;  %v3564_v49 = vmul.f32 %v6871_v44, %v6871_v44 }
 0x97d   :  { %v6876_v3 = vpop.f32.mrf.mxu0 }
 0x97e   :  { %3577 = vadd.xlane.f32.xlu0 %v3564_v49  ;;  %3555 = vadd.xlane.f32.xlu1 %v6876_v3  ;;  %v3565_v14 = vmul.f32 %v6876_v3, %v6876_v3 }
 0x985   :  { %v6881_v21 = vpop.f32.mrf.mxu0 }
 0x986   :  { %v3566_v37 = vmul.f32 %v6881_v21, %v6881_v21  ;;  %3579 = vadd.xlane.f32.xlu1 %v3565_v14  ;;  %3557 = vadd.xlane.f32.xlu2 %v6881_v21 }
 0x988   :  { %3581 = vadd.xlane.f32.xlu0 %v3566_v37 }
 0x98e   :  { %3549 = vadd.xlane.f32.xlu1 %v6862_v60  ;;  %3569 = vadd.xlane.f32.xlu2 %v3560_v38 }
 0x990   :  { %3571 = vadd.xlane.f32.xlu0 %v3561_v2 }
 0x996   :  { %3567 = vadd.xlane.f32.xlu1 %v3559_v56  ;;  %3545 = vadd.xlane.f32.xlu2 %v6858_v13 }
 0x998   :  { %3547 = vadd.xlane.f32.xlu0 %v6860_v48 }
 0x9a0   :  { %3543 = vadd.xlane.f32.xlu0 %v6856_v6 }
 0x9db   :  { %v3574_v9 = vpop.xlane.xlu1 %3573 }
 0x9e1   :  { %v3552_v15 = vpop.xlane.xlu2 %3551 }
 0x9e9   :  { %v3554_v31 = vpop.xlane.xlu0 %3553  ;;  %v3576_v17 = vpop.xlane.xlu2 %3575 }
 0x9f1   :  { %v3556_v18 = vpop.xlane.xlu1 %3555  ;;  %v3578_v39 = vpop.xlane.xlu0 %3577 }
 0x9f9   :  { %v3580_v41 = vpop.xlane.xlu1 %3579  ;;  %v3558_v33 = vpop.xlane.xlu2 %3557 }
 0x9fa   :  { %3624 = vmatpush.msra.mxu1 %v3558_v33 }
 0x9fb   :  { %v3582_v11 = vpop.xlane.xlu0 %3581 }
 0x9fc   :  { %3625 = vmatpush.msra.mxu1 %v3556_v18  ;;  %3665 = vmatpush.msrb.mxu2 %v3582_v11 }
 0x9fe   :  { %3626 = vmatpush.msra.mxu1 %v3554_v31  ;;  %3666 = vmatpush.msrb.mxu2 %v3580_v41  ;;  %v6962_v41 = vld [vmem:[%s7108_s8 + $0x190] sm:$0xff] }
 0xa00   :  { %3627 = vmatpush.msra.mxu1 %v3552_v15  ;;  %3667 = vmatpush.msrb.mxu2 %v3578_v39 }
 0xa01   :  { %v3550_v7 = vpop.xlane.xlu1 %3549  ;;  %v3570_v0 = vpop.xlane.xlu2 %3569 }
 0xa02   :  { %3628 = vmatpush.msra.mxu1 %v3550_v7  ;;  %3668 = vmatpush.msrb.mxu2 %v3576_v17 }
 0xa03   :  { %v3572_v54 = vpop.xlane.xlu0 %3571 }
 0xa04   :  { %3669 = vmatpush.msrb.mxu2 %v3574_v9 }
 0xa06   :  { %3670 = vmatpush.msrb.mxu2 %v3572_v54 }
 0xa08   :  { %3671 = vmatpush.msrb.mxu2 %v3570_v0 }
 0xa09   :  { %v3568_v16 = vpop.xlane.xlu1 %3567  ;;  %v3546_v28 = vpop.xlane.xlu2 %3545 }
 0xa0a   :  { %3672 = vmatpush.msrb.mxu2 %v3568_v16 }
 0xa0b   :  { %v3548_v58 = vpop.xlane.xlu0 %3547  ;;  %4315 = vmatmul.msk.f32.vlgmr.msrb.gmra.mxu2 %vm3591_vm0, %v3583_v46 }
 0xa0c   :  { %3629 = vmatpush.msra.mxu1 %v3548_v58 }
 0xa0e   :  { %3630 = vmatpush.msra.mxu1 %v3546_v28 }
 0xa13   :  { %v3544_v36 = vpop.xlane.xlu0 %3543  ;;  %4316 = vmatmul.msk.f32.gmra.mxu2 %vm3591_vm0, %v3584_v4 }
 0xa14   :  { %3631 = vmatpush.msra.mxu1 %v3544_v36 }
 0xa15   :  { %4307 = vmatmul.msk.f32.vlgmr.msra.gmra.mxu1 %vm3591_vm0, %v3583_v46 }
 0xa1b   :  { %4317 = vmatmul.msk.f32.gmra.mxu2 %vm3591_vm0, %v3585_v62 }
 0xa1d   :  { %4308 = vmatmul.msk.f32.gmra.mxu1 %vm3591_vm0, %v3584_v4 }
 0xa23   :  { %4318 = vmatmul.msk.f32.gmra.mxu2 %vm3591_vm0, %v3586_v51 }
 0xa25   :  { %4309 = vmatmul.msk.f32.gmra.mxu1 %vm3591_vm0, %v3585_v62 }
 0xa2b   :  { %4319 = vmatmul.msk.f32.gmra.mxu2 %vm3591_vm0, %v3587_v32 }
 0xa2d   :  { %4310 = vmatmul.msk.f32.gmra.mxu1 %vm3591_vm0, %v3586_v51 }
 0xa33   :  { %4320 = vmatmul.msk.f32.gmra.mxu2 %vm3591_vm0, %v3588_v34 }
 0xa35   :  { %4311 = vmatmul.msk.f32.gmra.mxu1 %vm3591_vm0, %v3587_v32 }
 0xa3b   :  { %4321 = vmatmul.msk.f32.gmra.mxu2 %vm3591_vm0, %v3589_v55 }
 0xa3d   :  { %4312 = vmatmul.msk.f32.gmra.mxu1 %vm3591_vm0, %v3588_v34 }
 0xa43   :  { %4322 = vmatmul.msk.f32.gmra.mxu2 %vm3591_vm0, %v3590_v5 }
 0xa45   :  { %4313 = vmatmul.msk.f32.gmra.mxu1 %vm3591_vm0, %v3589_v55 }
 0xa4d   :  { %4314 = vmatmul.msk.f32.gmra.mxu1 %vm3591_vm0, %v3590_v5 }
 0xa8e   :  { %v3674_v12 = vpop.f32.mrf.mxu2 }
 0xa92   :  { %v6936_v47 = vpop.f32.mrf.mxu1 }
 0xa93   :  { %v3698_v42 = vmul.f32 %v6936_v47, %v6936_v47 }
 0xa95   :  { %v3706_v14 = vsub.f32 %v3674_v12, %v3698_v42 }
 0xa96   :  { %v3677_v61 = vpop.f32.mrf.mxu2 }
 0xa97   :  { %v3714_v31 = vmax.f32 %v3706_v14, 0.0 }
 0xa99   :  { %v6971_v46 = vadd.f32 1e-05, %v3714_v31 }
 0xa9a   :  { %v6938_v1 = vpop.f32.mrf.mxu1 }
 0xa9b   :  { %v3699_v50 = vmul.f32 %v6938_v1, %v6938_v1 }
 0xa9d   :  { %v3707_v26 = vsub.f32 %v3677_v61, %v3699_v50 }
 0xa9e   :  { %v3680_v63 = vpop.f32.mrf.mxu2 }
 0xa9f   :  { %v3715_v20 = vmax.f32 %v3707_v26, 0.0 }
 0xaa1   :  { %v6944_v23 = vadd.f32 1e-05, %v3715_v20 }
 0xaa2   :  { %v3639_v59 = vpop.f32.mrf.mxu1 }
 0xaa3   :  { %v3700_v35 = vmul.f32 %v3639_v59, %v3639_v59  ;;  %vm3754_vm8 = vweird.f32 %v6944_v23 }
 0xaa5   :  { %v3708_v19 = vsub.f32 %v3680_v63, %v3700_v35 }
 0xaa6   :  { %v3683_v30 = vpop.f32.mrf.mxu2 }
 0xaa7   :  { %v3716_v24 = vmax.f32 %v3708_v19, 0.0 }
 0xaa9   :  { %v3732_v45 = vadd.f32 1e-05, %v3716_v24 }
 0xaaa   :  { %v6942_v8 = vpop.f32.mrf.mxu1 }
 0xaab   :  { %4544 = vrsqrt.f32 %v3732_v45  ;;  %vm3764_vm2 = vweird.f32 %v3732_v45  ;;  %v3701_v18 = vmul.f32 %v6942_v8, %v6942_v8 }
 0xaac   :  { %4546 = vrsqrt.f32 %v6944_v23 }
 0xaad   :  { %v3709_v16 = vsub.f32 %v3683_v30, %v3701_v18 }
 0xaae   :  { %v3686_v40 = vpop.f32.mrf.mxu2 }
 0xaaf   :  { %v3717_v32 = vmax.f32 %v3709_v16, 0.0 }
 0xab1   :  { %v4545_v53 = vpop.eup %4544 }
 0xab2   :  { %v3759_v25 = vmul.f32 %v4545_v53, %v3732_v45  ;;  %v6948_v52 = vpop.f32.mrf.mxu1  ;;  %vm3765_vm1 = vweird.f32 %v4545_v53  ;;  %v6953_v15 = vpop.eup %4546 }
 0xab3   :  { %v3702_v27 = vmul.f32 %v6948_v52, %v6948_v52  ;;  %vm3766_vm3 = vmor %vm3764_vm2, %vm3765_vm1  ;;  %v3749_v11 = vmul.f32 %v6953_v15, %v6944_v23  ;;  %vm3755_vm7 = vweird.f32 %v6953_v15  ;;  %v7018_v23 = vld [vmem:[%s7108_s8 + $0x188] sm:$0xff]  ;;  %vm3744_vm2 = vweird.f32 %v6971_v46 }
 0xab4   :  { %v3760_v29 = vmul.f32 %v4545_v53, %v3759_v25  ;;  %v6991_v25 = vld [vmem:[%s7108_s8 + $0x1a0] sm:$0xff]  ;;  %vm7003_vm9 = vmor %vm3754_vm8, %vm3755_vm7 }
 0xab5   :  { %v3710_v49 = vsub.f32 %v3686_v40, %v3702_v27  ;;  %v3750_v4 = vmul.f32 %v6953_v15, %v3749_v11 }
 0xab6   :  { %v3761_v37 = vmul.f32 0.5, %v3760_v29  ;;  %v3689_v38 = vpop.f32.mrf.mxu2 }
 0xab7   :  { %v3718_v2 = vmax.f32 %v3710_v49, 0.0  ;;  %v3751_v12 = vmul.f32 0.5, %v3750_v4 }
 0xab8   :  { %v3762_v56 = vsub.f32 1.5, %v3761_v37 }
 0xab9   :  { %v3734_v9 = vadd.f32 1e-05, %v3718_v2  ;;  %v3752_v30 = vsub.f32 1.5, %v3751_v12 }
 0xaba   :  { %v3763_v17 = vmul.f32 %v4545_v53, %v3762_v56  ;;  %v6957_v39 = vpop.f32.mrf.mxu1 }
 0xabb   :  { %4548 = vrsqrt.f32 %v3734_v9  ;;  %v3703_v33 = vmul.f32 %v6957_v39, %v6957_v39  ;;  %vm3784_vm5 = vweird.f32 %v3734_v9  ;;  %v3753_v49 = vmul.f32 %v6953_v15, %v3752_v30 }
 0xabc   :  { %v3767_v7 = vsel %vm3766_vm3, %v4545_v53, %v3763_v17  ;;  %4550 = vrsqrt.f32 %v6971_v46 }
 0xabd   :  { %v3711_v0 = vsub.f32 %v3689_v38, %v3703_v33  ;;  %v6969_v54 = vmul.f32 %v3767_v7, %v6962_v41  ;;  %v3757_v11 = vsel %vm7003_vm9, %v6953_v15, %v3753_v49 }
 0xabe   :  { %v3692_v36 = vpop.f32.mrf.mxu2  ;;  %v7027_v15 = vmul.f32 %v3757_v11, %v7018_v23  ;;  %v3725_v11 = vld [vmem:[%s7108_s8 + $0x198] sm:$0xff] }
 0xabf   :  { %v3719_v58 = vmax.f32 %v3711_v0, 0.0  ;;  %v3828_v28 = vmul.f32 %v6969_v54, %v3639_v59  ;;  %v6981_v59 = vadd.f32 1e-05, %v3717_v32 }
 0xac1   :  { %v4549_v62 = vpop.eup %4548  ;;  %v3735_v51 = vadd.f32 1e-05, %v3719_v58  ;;  %3846 = vrot.lane.b32.xlu0 %v3828_v28, %s4572_s12  ;;  %v7024_v28 = vld [vmem:[%s7108_s8 + $0x1a8] sm:$0xff]  ;;  %vm3774_vm8 = vweird.f32 %v6981_v59 }
 0xac2   :  { %v3779_v34 = vmul.f32 %v4549_v62, %v3734_v9  ;;  %v6977_v55 = vpop.f32.mrf.mxu1  ;;  %v6983_v19 = vpop.eup %4550  ;;  %vm3785_vm4 = vweird.f32 %v4549_v62 }
 0xac3   :  { %4552 = vrsqrt.f32 %v3735_v51  ;;  %v3704_v5 = vmul.f32 %v6977_v55, %v6977_v55  ;;  %v3739_v27 = vmul.f32 %v6983_v19, %v6971_v46  ;;  %vm3786_vm6 = vmor %vm3784_vm5, %vm3785_vm4  ;;  %vm3794_vm11 = vweird.f32 %v3735_v51  ;;  %v3729_v46 = vld [vmem:[%s7108_s8 + $0x1b8] sm:$0xff] }
 0xac4   :  { %v3780_v61 = vmul.f32 %v4549_v62, %v3779_v34  ;;  %4554 = vrsqrt.f32 %v6981_v59  ;;  %vm3745_vm15 = vweird.f32 %v6983_v19 }
 0xac5   :  { %v3712_v63 = vsub.f32 %v3692_v36, %v3704_v5  ;;  %v3740_v33 = vmul.f32 %v6983_v19, %v3739_v27  ;;  %v3827_v5 = vmul.f32 %v7027_v15, %v6938_v1  ;;  %vm3746_vm5 = vmor %vm3744_vm2, %vm3745_vm15 }
 0xac6   :  { %v3781_v50 = vmul.f32 0.5, %v3780_v61  ;;  %v3695_v42 = vpop.f32.mrf.mxu2 }
 0xac7   :  { %v3720_v35 = vmax.f32 %v3712_v63, 0.0  ;;  %v3741_v4 = vmul.f32 0.5, %v3740_v33 }
 0xac8   :  { %v3782_v26 = vsub.f32 1.5, %v3781_v50 }
 0xac9   :  { %v4553_v24 = vpop.eup %4552  ;;  %v3736_v45 = vadd.f32 1e-05, %v3720_v35  ;;  %v3742_v61 = vsub.f32 1.5, %v3741_v4 }
 0xaca   :  { %v3783_v20 = vmul.f32 %v4549_v62, %v3782_v26  ;;  %v3789_v40 = vmul.f32 %v4553_v24, %v3735_v51  ;;  %v6986_v53 = vpop.f32.mrf.mxu1  ;;  %v7009_v18 = vpop.eup %4554  ;;  %vm3795_vm10 = vweird.f32 %v4553_v24 }
 0xacb   :  { %4556 = vrsqrt.f32 %v3736_v45  ;;  %v3705_v29 = vmul.f32 %v6986_v53, %v6986_v53  ;;  %vm3796_vm12 = vmor %vm3794_vm11, %vm3795_vm10  ;;  %v3769_v36 = vmul.f32 %v7009_v18, %v6981_v59  ;;  %vm3804_vm14 = vweird.f32 %v3736_v45 }
 0xacc   :  { %v3787_v14 = vsel %vm3786_vm6, %v4549_v62, %v3783_v20  ;;  %v3790_v37 = vmul.f32 %v4553_v24, %v3789_v40  ;;  %v3743_v1 = vmul.f32 %v6983_v19, %v3742_v61  ;;  %vm3775_vm7 = vweird.f32 %v7009_v18 }
 0xacd   :  { %v3713_v38 = vsub.f32 %v3695_v42, %v3705_v29  ;;  %v7000_v2 = vmul.f32 %v3787_v14, %v6991_v25  ;;  %v3770_v63 = vmul.f32 %v7009_v18, %v3769_v36  ;;  %vm3776_vm9 = vmor %vm3774_vm8, %vm3775_vm7 }
 0xace   :  { %v3791_v56 = vmul.f32 0.5, %v3790_v37  ;;  %v3747_v29 = vsel %vm3746_vm5, %v6983_v19, %v3743_v1  ;;  %v3722_v37 = vld [vmem:[%s7108_s8 + $0x180] sm:$0xff] }
 0xacf   :  { %v3721_v31 = vmax.f32 %v3713_v38, 0.0  ;;  %v3830_v17 = vmul.f32 %v7000_v2, %v6948_v52 }
 0xad0   :  { %v3792_v7 = vsub.f32 1.5, %v3791_v56  ;;  %v3818_v56 = vmul.f32 %v3747_v29, %v3722_v37 }
 0xad1   :  { %v4557_v0 = vpop.eup %4556  ;;  %v3737_v16 = vadd.f32 1e-05, %v3721_v31  ;;  %3850 = vrot.lane.b32.xlu0 %v3830_v17, %s4572_s12 }
 0xad2   :  { %v3793_v52 = vmul.f32 %v4553_v24, %v3792_v7  ;;  %v3799_v58 = vmul.f32 %v4557_v0, %v3736_v45  ;;  %vm3805_vm13 = vweird.f32 %v4557_v0  ;;  %v3826_v31 = vmul.f32 %v3818_v56, %v6936_v47 }
 0xad3   :  { %4558 = vrsqrt.f32 %v3737_v16  ;;  %vm3806_vm1 = vmor %vm3804_vm14, %vm3805_vm13  ;;  %vm3814_vm3 = vweird.f32 %v3737_v16 }
 0xad4   :  { %v3797_v62 = vsel %vm3796_vm12, %v4553_v24, %v3793_v52  ;;  %v3800_v32 = vmul.f32 %v4557_v0, %v3799_v58  ;;  %v3728_v24 = vld [vmem:[%s7108_s8 + $0x1b0] sm:$0xff] }
 0xad5   :  { %v3823_v34 = vmul.f32 %v3797_v62, %v7024_v28 }
 0xad6   :  { %v3801_v51 = vmul.f32 0.5, %v3800_v32 }
 0xad7   :  { %v3831_v12 = vmul.f32 %v3823_v34, %v6957_v39  ;;  %v3771_v39 = vmul.f32 0.5, %v3770_v63 }
 0xad8   :  { %v3802_v50 = vsub.f32 1.5, %v3801_v51 }
 0xad9   :  { %v4559_v35 = vpop.eup %4558  ;;  %3844 = vrot.lane.b32.xlu0 %v3827_v5, %s4572_s12  ;;  %3852 = vrot.lane.b32.xlu1 %v3831_v12, %s4572_s12  ;;  %v3772_v49 = vsub.f32 1.5, %v3771_v39 }
 0xada   :  { %v3803_v30 = vmul.f32 %v4557_v0, %v3802_v50  ;;  %v3809_v26 = vmul.f32 %v4559_v35, %v3737_v16  ;;  %vm3815_vm4 = vweird.f32 %v4559_v35 }
 0xadb   :  { %vm3816_vm6 = vmor %vm3814_vm3, %vm3815_vm4 }
 0xadc   :  { %v3807_v20 = vsel %vm3806_vm1, %v4557_v0, %v3803_v30  ;;  %v3810_v40 = vmul.f32 %v4559_v35, %v3809_v26 }
 0xadd   :  { %v3824_v42 = vmul.f32 %v3807_v20, %v3728_v24 }
 0xade   :  { %v3811_v27 = vmul.f32 0.5, %v3810_v40 }
 0xadf   :  { %v3832_v45 = vmul.f32 %v3824_v42, %v6977_v55  ;;  %v3773_v55 = vmul.f32 %v7009_v18, %v3772_v49 }
 0xae0   :  { %v3812_v14 = vsub.f32 1.5, %v3811_v27 }
 0xae1   :  { %3901 = vperm.xlu0 %4440, %v3823_v34   ;;  %3854 = vrot.lane.b32.xlu1 %v3832_v45, %s4572_s12  ;;  %v3777_v33 = vsel %vm3776_vm9, %v7009_v18, %v3773_v55 }
 0xae2   :  { %v3813_v38 = vmul.f32 %v4559_v35, %v3812_v14  ;;  %v3821_v7 = vmul.f32 %v3777_v33, %v3725_v11 }
 0xae4   :  { %v3817_v19 = vsel %vm3816_vm6, %v4559_v35, %v3813_v38  ;;  %v3829_v59 = vmul.f32 %v3821_v7, %v6942_v8 }
 0xae5   :  { %v3825_v9 = vmul.f32 %v3817_v19, %v3729_v46 }
 0xae7   :  { %v3833_v17 = vmul.f32 %v3825_v9, %v6986_v53 }
 0xae9   :  { %3842 = vrot.lane.b32.xlu1 %v3826_v31, %s4572_s12  ;;  %3856 = vrot.lane.b32.xlu2 %v3833_v17, %s4572_s12 }
 0xaea   :  { %4443 = vset.pattern.permute.xlu0 %v7195_v43 }
 0xaf1   :  { %3911 = vperm.xlu1 %4439, %v3825_v9   ;;  %3848 = vrot.lane.b32.xlu2 %v3829_v59, %s4572_s12 }
 0xaf9   :  { %3896 = vperm.xlu1 %4439, %v7000_v2   ;;  %3906 = vperm.xlu2 %4438, %v3824_v42  }
 0xb01   :  { %3891 = vperm.xlu1 %4439, %v3821_v7   ;;  %3886 = vperm.xlu2 %4438, %v6969_v54  }
 0xb09   :  { %4441 = vset.pattern.permute.xlu2 %v7195_v43  ;;  %4442 = vset.pattern.permute.xlu1 %v7195_v43 }
 0xb33   :  { %v3847_v47 = vpop.permute.xlu0 %3846 }
 0xb43   :  { %v3851_v53 = vpop.permute.xlu0 %3850  ;;  %v3857_v0 = vpop.permute.xlu2 %3856 }
 0xb44   :  { %v3870_v18 = vsub.f32 %v6991_v25, %v3851_v53  ;;  %v3873_v8 = vsub.f32 %v3729_v46, %v3857_v0  ;;  %v3868_v25 = vsub.f32 %v6962_v41, %v3847_v47  ;;  %v4007_v41 = vld [vmem:[%s7108_s8 + $0x1c0] sm:$0x1] }
 0xb46   :  { %3944 = vperm.xlu2 %4441, %v3870_v18  }
 0xb4b   :  { %v3853_v16 = vpop.permute.xlu1 %3852  ;;  %v3849_v2 = vpop.permute.xlu2 %3848 }
 0xb4c   :  { %v3871_v52 = vsub.f32 %v7024_v28, %v3853_v16  ;;  %v3869_v54 = vsub.f32 %v3725_v11, %v3849_v2  ;;  %v3845_v28 = vpop.permute.xlu0 %3844 }
 0xb4d   :  { %v3867_v32 = vsub.f32 %v7018_v23, %v3845_v28 }
 0xb4e   :  { %3949 = vperm.xlu1 %4442, %v3871_v52   ;;  %3959 = vperm.xlu2 %4441, %v3873_v8  }
 0xb53   :  { %v3855_v58 = vpop.permute.xlu1 %3854  ;;  %v3907_v34 = vpop.permute.xlu2 %3906 }
 0xb54   :  { %v3872_v4 = vsub.f32 %v3728_v24, %v3855_v58  ;;  %v3920_v1 = vmul.f32 %v3907_v34, %v6876_v3 }
 0xb56   :  { %3954 = vperm.xlu0 %4443, %v3872_v4   ;;  %4444 = vset.pattern.permute.xlu1 %v7192_v22 }
 0xb57   :  { %3939 = vperm.xlu2 %4441, %v3869_v54   ;;  %3876 = vperm.xlu1 %4444, %v3818_v56  }
 0xb5b   :  { %v3843_v36 = vpop.permute.xlu1 %3842  ;;  %v3887_v5 = vpop.permute.xlu2 %3886 }
 0xb5c   :  { %v3866_v62 = vsub.f32 %v3722_v37, %v3843_v36  ;;  %v3916_v46 = vmul.f32 %v3887_v5, %v6860_v48 }
 0xb5e   :  { %3934 = vperm.xlu0 %4443, %v3868_v25  }
 0xb5f   :  { %4445 = vset.pattern.permute.xlu2 %v7192_v22  ;;  %4446 = vset.pattern.permute.xlu1 %v7195_v43  ;;  %v3902_v43 = vpop.permute.xlu0 %3901 }
 0xb60   :  { %3881 = vperm.xlu2 %4445, %v7027_v15   ;;  %3924 = vperm.xlu1 %4446, %v3866_v62   ;;  %v3919_v23 = vmul.f32 %v3902_v43, %v6871_v44 }
 0xb63   :  { %v3912_v51 = vpop.permute.xlu1 %3911 }
 0xb64   :  { %v3921_v50 = vmul.f32 %v3912_v51, %v6881_v21 }
 0xb66   :  { %3929 = vperm.xlu0 %4443, %v3867_v32  }
 0xb68   :  { %4009 = vrot.lane.b32.xlu2 %v4007_v41, %s4574_s5 }
 0xb6b   :  { %v3897_v12 = vpop.permute.xlu1 %3896 }
 0xb6c   :  { %v3918_v30 = vmul.f32 %v3897_v12, %v6866_v57 }
 0xb73   :  { %v3892_v63 = vpop.permute.xlu1 %3891 }
 0xb74   :  { %v3917_v42 = vmul.f32 %v3892_v63, %v6862_v60 }
 0xba0   :  { %v3945_v61 = vpop.permute.xlu2 %3944 }
 0xba1   :  { %v3966_v24 = vadd.f32 %v3945_v61, %v3918_v30 }
 0xba3   :  { %v3982_v49 = vmul.f32 0.2, %v3966_v24  ;;  %vm3974_vm13 = vcmp.ge.f32.partialorder %v3966_v24, 0.0 }
 0xba5   :  { %v3990_v56 = vsel %vm3974_vm13, %v3966_v24, %v3982_v49 }
 0xba6   :  { %v3998_v11 = vmul.f32 %v6793_v10, %v3990_v56 }
 0xba8   :  { %v3960_v22 = vpop.permute.xlu2 %3959 }
 0xba9   :  { %v3969_v35 = vadd.f32 %v3960_v22, %v3921_v50 }
 0xbab   :  { %v3985_v39 = vmul.f32 0.2, %v3969_v35  ;;  %vm3977_vm10 = vcmp.ge.f32.partialorder %v3969_v35, 0.0 }
 0xbad   :  { %v3993_v21 = vsel %vm3977_vm10, %v3969_v35, %v3985_v39 }
 0xbae   :  { %v4001_v3 = vmul.f32 %v6793_v10, %v3993_v21 }
 0xbb1   :  { %v3940_v20 = vpop.permute.xlu2 %3939 }
 0xbb2   :  { %v3965_v44 = vadd.f32 %v3940_v20, %v3917_v42 }
 0xbb4   :  { %v3981_v60 = vmul.f32 0.2, %v3965_v44  ;;  %vm3973_vm14 = vcmp.ge.f32.partialorder %v3965_v44, 0.0 }
 0xbb6   :  { %v3989_v7 = vsel %vm3973_vm14, %v3965_v44, %v3981_v60 }
 0xbb7   :  { %v3997_v8 = vmul.f32 %v6793_v10, %v3989_v7 }
 0xbba   :  { %v3882_v53 = vpop.permute.xlu2 %3881 }
 0xbbb   :  { %v3915_v16 = vmul.f32 %v3882_v53, %v6858_v13  ;;  %v4006_v13 = vld [vmem:[%s7114_s4] sm:$0xf] }
 0xbc0   :  { %v3950_v15 = vpop.permute.xlu1 %3949 }
 0xbc1   :  { %v3967_v26 = vadd.f32 %v3950_v15, %v3919_v23 }
 0xbc2   :  { %v4010_v32 = vpop.permute.xlu2 %4009 }
 0xbc3   :  { %v3983_v27 = vmul.f32 0.2, %v3967_v26  ;;  %vm3975_vm11 = vcmp.ge.f32.partialorder %v3967_v26, 0.0  ;;  %4392 = vpush %v4010_v32 }
 0xbc5   :  { %v3991_v57 = vsel %vm3975_vm11, %v3967_v26, %v3983_v27 }
 0xbc6   :  { %v3999_v9 = vmul.f32 %v6793_v10, %v3991_v57 }
 0xbc8   :  { %v3955_v40 = vpop.permute.xlu0 %3954  ;;  %v4004_v48 = vpack.c.bf16 %v3999_v9, %v3998_v11 }
 0xbc9   :  { %v3968_v45 = vadd.f32 %v3955_v40, %v3920_v1  ;;  %v3877_v29 = vpop.permute.xlu1 %3876 }
 0xbca   :  { %v3914_v31 = vmul.f32 %v3877_v29, %v6856_v6 }
 0xbcb   :  { %vm3976_vm12 = vcmp.ge.f32.partialorder %v3968_v45, 0.0  ;;  %v3984_v14 = vmul.f32 0.2, %v3968_v45 }
 0xbcd   :  { %v3992_v37 = vsel %vm3976_vm12, %v3968_v45, %v3984_v14 }
 0xbce   :  { %v4000_v38 = vmul.f32 %v6793_v10, %v3992_v37 }
 0xbd0   :  { %v3935_v55 = vpop.permute.xlu0 %3934  ;;  %v4005_v19 = vpack.c.bf16 %v4001_v3, %v4000_v38 }
 0xbd1   :  { %v3964_v17 = vadd.f32 %v3935_v55, %v3916_v46 }
 0xbd2   :  { %v3925_v33 = vpop.permute.xlu1 %3924  ;;  %4021 = vmatpush.bf16.msrb.mxu3 %v4005_v19 }
 0xbd3   :  { %vm3972_vm15 = vcmp.ge.f32.partialorder %v3964_v17, 0.0  ;;  %v3980_v59 = vmul.f32 0.2, %v3964_v17  ;;  %v3962_v47 = vadd.f32 %v3925_v33, %v3914_v31 }
 0xbd5   :  { %v3988_v18 = vsel %vm3972_vm15, %v3964_v17, %v3980_v59  ;;  %v3978_v6 = vmul.f32 0.2, %v3962_v47  ;;  %vm3970_vm1 = vcmp.ge.f32.partialorder %v3962_v47, 0.0 }
 0xbd6   :  { %4022 = vmatpush.bf16.msrb.mxu3 %v4004_v48  ;;  %v3996_v0 = vmul.f32 %v6793_v10, %v3988_v18 }
 0xbd7   :  { %v3986_v4 = vsel %vm3970_vm1, %v3962_v47, %v3978_v6 }
 0xbd8   :  { %v3930_v52 = vpop.permute.xlu0 %3929  ;;  %v4003_v2 = vpack.c.bf16 %v3997_v8, %v3996_v0  ;;  %v3994_v25 = vmul.f32 %v6793_v10, %v3986_v4 }
 0xbd9   :  { %v3963_v58 = vadd.f32 %v3930_v52, %v3915_v16 }
 0xbda   :  { %4023 = vmatpush.bf16.msrb.mxu3 %v4003_v2 }
 0xbdb   :  { %vm3971_vm2 = vcmp.ge.f32.partialorder %v3963_v58, 0.0  ;;  %v3979_v54 = vmul.f32 0.2, %v3963_v58 }
 0xbdd   :  { %v3987_v36 = vsel %vm3971_vm2, %v3963_v58, %v3979_v54 }
 0xbde   :  { %v3995_v62 = vmul.f32 %v6793_v10, %v3987_v36 }
 0xbe0   :  { %v4002_v28 = vpack.c.bf16 %v3995_v62, %v3994_v25 }
 0xbe2   :  { %4024 = vmatpush.bf16.msrb.mxu3 %v4002_v28 }
 0xbe5   :  { %4323 = vmatmul.msk.bf16.vlgmr.msrb.gmra.mxu3 %vm3591_vm0, %v4006_v13 }
 0xbf4   :  { %s4393_s6 = spop %4392 }
 0xbf5   :  { %v4012_v34 = vstv %s4393_s6 }
 0xc68   :  { %v4026_v51 = vpop.f32.mrf.mxu3 }
 0xc69   :  { %v4027_v5 = vadd.f32 %v4026_v51, %v4012_v34 }
 0xc6b   :  { %4030 = vst [vmem:[%s7115_s10] sm:$0xff] %v4027_v5 }
 0xc70   :  { %v4028_v12 = vpop.f32.mrf.mxu3 }

</bundles_post_ra>
